<compile_context>
chip_gen: v6e
topology: v6e:2x2x1
jax: 0.10.0
libtpu: 0.0.40
codegen_flags: <defaults>
</compile_context>

<pallas_src>
import numpy as np
import jax
import jax.numpy as jnp
from jax.experimental import pallas as pl
from jax.experimental.pallas import tpu as pltpu


def _round_up(x, m):
    return (x + m - 1) // m * m


def _vmem_limits():
    """Returns (per-step VMEM budget for tile sizing, scoped vmem_limit_bytes)."""
    cap = 64 * 1024 * 1024
    try:
        cap = int(getattr(pltpu.get_tpu_info(), "vmem_capacity_bytes", cap))
    except Exception:
        pass
    if cap >= 100 * 1024 * 1024:                   # v5e / v6e: 128 MiB physical
        return 48 * 1024 * 1024, 64 * 1024 * 1024
    return 20 * 1024 * 1024, 32 * 1024 * 1024      # v7x: 64 MiB per TensorCore


def _pick_tile_h(H, W, C1, Cp, C2, budget):
    """Largest row-tile height dividing H whose working set fits the budget."""
    best = 1
    for th in range(1, H + 1):
        if H % th:
            continue
        need = ((th + 2) * (W + 2) * Cp * 2        # halo slab scratch (bf16)
                + 2 * th * W * C1 * 2              # x tile, double buffered
                + 2 * th * W * C2 * 4              # out tile, double buffered
                + 2 * 9 * Cp * C2 * 2              # folded 3x3 weights
                + 6 * th * W * max(Cp, C2) * 4)    # acc + per-tap slice temps
        if need <= budget:
            best = th
    return best


# ----------------------------------------------------------------------------
# Fused Bottleneck kernel: per (batch, row-tile) grid step
#   1) cv1 (1x1 conv, BN-folded, SiLU) on the tile + its 1-row halos -> VMEM slab
#   2) cv2 (3x3 conv) as 9 accumulated matmuls over the slab, BN bias, SiLU
#   3) fused residual add with the bf16 x tile already in VMEM
# ----------------------------------------------------------------------------
def _make_bottleneck_kernel(TH, W, C1, Cp, C2, add):
    def kernel(x_top_ref, x_mid_ref, x_bot_ref,
               w1_ref, b1_ref, w2_ref, b2_ref, o_ref, ys_ref):
        i = pl.program_id(1)
        last = pl.num_programs(1) - 1

        w1 = w1_ref[...]                      # (C1, Cp) bf16, BN scale folded
        b1 = b1_ref[...]                      # (1,  Cp) f32

        def cv1(rows):                        # (R, C1) bf16 -> (R, Cp) bf16
            a = jnp.dot(rows, w1, preferred_element_type=jnp.float32) + b1
            a = a * jax.nn.sigmoid(a)         # SiLU in f32
            return a.astype(ys_ref.dtype)

        # Zero the slab: supplies the 3x3 conv's zero padding (columns 0 / W+1
        # and the out-of-image halo rows at the top / bottom of the image).
        ys_ref[...] = jnp.zeros_like(ys_ref)

        # cv1 on the centre rows of this tile.
        xm = x_mid_ref[...].reshape(TH * W, C1)
        ys_ref[1:TH + 1, 1:W + 1, :] = cv1(xm).reshape(TH, W, Cp)

        # cv1 on the halo rows (only when they are real image rows).
        @pl.when(i > 0)
        def _():
            xt = x_top_ref[...].reshape(W, C1)
            ys_ref[0:1, 1:W + 1, :] = cv1(xt).reshape(1, W, Cp)

        @pl.when(i < last)
        def _():
            xb = x_bot_ref[...].reshape(W, C1)
            ys_ref[TH + 1:TH + 2, 1:W + 1, :] = cv1(xb).reshape(1, W, Cp)

        # cv2: 3x3 conv = 9 accumulated MXU matmuls straight from the VMEM slab
        # (no im2col materialisation, no HBM round trip of the intermediate).
        acc = jnp.zeros((TH * W, C2), jnp.float32)
        for t in range(9):
            di, dj = t // 3, t % 3
            tap = ys_ref[di:di + TH, dj:dj + W, :].reshape(TH * W, Cp)
            acc = acc + jnp.dot(tap, w2_ref[t],
                                preferred_element_type=jnp.float32)
        y = acc + b2_ref[...]
        y = y * jax.nn.sigmoid(y)             # SiLU in f32
        if add:                               # residual: x tile already in VMEM
            y = y + xm.astype(jnp.float32)
        o_ref[...] = y.reshape(1, TH, W, C2).astype(o_ref.dtype)

    return kernel


def apply_bottleneck_nhwc(p, x_bf16):
    B, H, W, C1 = x_bf16.shape
    C2, Cp = p['c2'], p['cp']
    budget, vmem_limit = _vmem_limits()
    TH = _pick_tile_h(H, W, C1, Cp, C2, budget)
    nh = H // TH

    kernel = _make_bottleneck_kernel(TH, W, C1, Cp, C2, p['add'])

    in_specs = [
        # 1-row halo above the tile (clamped at the image top, masked in-kernel)
        pl.BlockSpec((1, 1, W, C1),
                     lambda b, i: (b, jnp.maximum(i * TH - 1, 0), 0, 0)),
        # the row tile itself (also serves as the fused residual)
        pl.BlockSpec((1, TH, W, C1), lambda b, i: (b, i, 0, 0)),
        # 1-row halo below the tile (clamped at the image bottom, masked)
        pl.BlockSpec((1, 1, W, C1),
                     lambda b, i: (b, jnp.minimum(i * TH + TH, H - 1), 0, 0)),
        # weights / biases: constant-index resident blocks (fetched once)
        pl.BlockSpec((C1, Cp), lambda b, i: (0, 0)),
        pl.BlockSpec((1, Cp), lambda b, i: (0, 0)),
        pl.BlockSpec((9, Cp, C2), lambda b, i: (0, 0, 0)),
        pl.BlockSpec((1, C2), lambda b, i: (0, 0)),
    ]
    out_spec = pl.BlockSpec((1, TH, W, C2), lambda b, i: (b, i, 0, 0))

    return pl.pallas_call(
        kernel,
        out_shape=jax.ShapeDtypeStruct((B, H, W, C2), jnp.float32),
        grid_spec=pltpu.PrefetchScalarGridSpec(
            num_scalar_prefetch=0,
            grid=(B, nh),
            in_specs=in_specs,
            out_specs=out_spec,
            scratch_shapes=[pltpu.VMEM((TH + 2, W + 2, Cp), jnp.bfloat16)]),
        compiler_params=pltpu.CompilerParams(
            dimension_semantics=("parallel", "parallel"),
            vmem_limit_bytes=vmem_limit),
    )(x_bf16, x_bf16, x_bf16, p['w1'], p['b1'], p['w2'], p['b2'])


def bottleneck_forward(params, x_nchw):
    # NCHW f32 -> NHWC bf16 boundary conversion (single fused XLA pass over x);
    # the bf16 copy feeds both cv1 and the fused residual add.
    x = jnp.transpose(x_nchw, (0, 2, 3, 1)).astype(jnp.bfloat16)
    y = apply_bottleneck_nhwc(params, x)
    # TODO(synk): callers that can consume NHWC directly should skip this.
    return jnp.transpose(y, (0, 3, 1, 2))


# ----------------------------------------------------------------------------
# Parameter construction: deterministic, BN folded (eps=1e-5).  The BN scale is
# multiplied into the f32 weights BEFORE the bf16 cast; channel dims padded to
# lane-dense multiples of 128 once here (zero columns/rows).
# ----------------------------------------------------------------------------
def _init_conv(key, c1, c2, k):
    kw, kg, kb, km, kv = jax.random.split(key, 5)
    fan_in = c1 * k * k
    w = jax.random.normal(kw, (k, k, c1, c2), jnp.float32) / np.sqrt(fan_in)
    gamma = 1.0 + 0.05 * jax.random.normal(kg, (c2,), jnp.float32)
    beta = 0.05 * jax.random.normal(kb, (c2,), jnp.float32)
    mean = 0.05 * jax.random.normal(km, (c2,), jnp.float32)
    var = 1.0 + 0.1 * jnp.abs(jax.random.normal(kv, (c2,), jnp.float32))
    scale = gamma / jnp.sqrt(var + 1e-5)              # BatchNorm2d default eps
    bias = beta - mean * scale
    w_fold = w * scale                                # fold BN scale in f32
    return w_fold, bias


def init_bottleneck(key, c1, c2, shortcut=True, e=0.5):
    c_ = int(c2 * e)
    k1, k2 = jax.random.split(key)
    w1_f, b1_f = _init_conv(k1, c1, c_, 1)            # (1,1,c1,c_), (c_,)
    w2_f, b2_f = _init_conv(k2, c_, c2, 3)            # (3,3,c_,c2), (c2,)

    cp = _round_up(c_, 128)
    w1 = jnp.zeros((c1, cp), jnp.float32).at[:, :c_].set(
        w1_f.reshape(c1, c_)).astype(jnp.bfloat16)
    b1 = jnp.zeros((1, cp), jnp.float32).at[0, :c_].set(b1_f)
    w2 = jnp.zeros((9, cp, c2), jnp.float32).at[:, :c_, :].set(
        w2_f.reshape(9, c_, c2)).astype(jnp.bfloat16)
    b2 = b2_f.reshape(1, c2)

    return dict(w1=w1, b1=b1, w2=w2, b2=b2,
                w1_f32=w1_f, b1_f32=b1_f, w2_f32=w2_f, b2_f32=b2_f,
                add=bool(shortcut and c1 == c2), c1=c1, c2=c2, c_=c_, cp=cp)


# ----------------------------------------------------------------------------
# Pure-JAX f32 reference (same folded parameters) for correctness checking
# ----------------------------------------------------------------------------
def reference_forward(p, x_nchw):
    x = jnp.transpose(x_nchw, (0, 2, 3, 1)).astype(jnp.float32)

    def conv_bn_silu(z, w, b, k):
        y = jax.lax.conv_general_dilated(
            z, w, (1, 1), [(k // 2, k // 2)] * 2,
            dimension_numbers=('NHWC', 'HWIO', 'NHWC'))
        y = y + b
        return y * jax.nn.sigmoid(y)

    y = conv_bn_silu(x, p['w1_f32'], p['b1_f32'], 1)
    y = conv_bn_silu(y, p['w2_f32'], p['b2_f32'], 3)
    if p['add']:
        y = x + y
    return jnp.transpose(y, (0, 3, 1, 2))


if __name__ == "__main__":
    key = jax.random.PRNGKey(0)
    kp, kx = jax.random.split(key)
    B, c1, c2, H, W = 2, 64, 64, 16, 16
    params = init_bottleneck(kp, c1, c2, shortcut=True, e=0.5)
    x = jax.random.normal(kx, (B, c1, H, W), jnp.float32)

    out = jax.block_until_ready(bottleneck_forward(params, x))
    assert out.shape == (B, c2, H, W), out.shape
    assert np.isfinite(np.asarray(out)).all()

    ref = jax.block_until_ready(reference_forward(params, x))
    err = float(jnp.max(jnp.abs(out - ref)))
    scale = float(jnp.max(jnp.abs(ref)))
    assert err <= 0.03 * max(scale, 1.0), f"rel error too large: {err} / {scale}"
    print("KERNEL_OK")
</pallas_src>

<mosaic_0001>
module attributes {stable_mosaic.version = 11 : i64} {
  func.func @kernel(%arg0: i32, %arg1: i32, %arg2: memref<1x1x16x64xbf16, #tpu.memory_space<vmem>>, %arg3: memref<1x16x16x64xbf16, #tpu.memory_space<vmem>>, %arg4: memref<1x1x16x64xbf16, #tpu.memory_space<vmem>>, %arg5: memref<64x128xbf16, #tpu.memory_space<vmem>>, %arg6: memref<1x128xf32, #tpu.memory_space<vmem>>, %arg7: memref<9x128x64xbf16, #tpu.memory_space<vmem>>, %arg8: memref<1x64xf32, #tpu.memory_space<vmem>>, %arg9: memref<1x16x16x64xf32, #tpu.memory_space<vmem>>, %arg10: memref<18x18x128xbf16, #tpu.memory_space<vmem>>) attributes {dimension_semantics = [#tpu.dimension_semantics<parallel>, #tpu.dimension_semantics<parallel>], iteration_bounds = array<i64: 2, 1>, scalar_prefetch = 0 : i64, scratch_operands = 1 : i64, tpu.core_type = #tpu.core_type<tc>, window_params = [{transform_indices = @transform_0, window_bounds = array<i64: 1, 1, 16, 64>}, {transform_indices = @transform_1, window_bounds = array<i64: 1, 16, 16, 64>}, {transform_indices = @transform_2, window_bounds = array<i64: 1, 1, 16, 64>}, {pipeline_mode = #tpu.pipeline_mode<synchronous>, transform_indices = @transform_3, window_bounds = array<i64: 64, 128>}, {pipeline_mode = #tpu.pipeline_mode<synchronous>, transform_indices = @transform_4, window_bounds = array<i64: 1, 128>}, {pipeline_mode = #tpu.pipeline_mode<synchronous>, transform_indices = @transform_5, window_bounds = array<i64: 9, 128, 64>}, {pipeline_mode = #tpu.pipeline_mode<synchronous>, transform_indices = @transform_6, window_bounds = array<i64: 1, 64>}, {transform_indices = @transform_7, window_bounds = array<i64: 1, 16, 16, 64>}]} {
    %c0 = arith.constant 0 : index
    %c0_0 = arith.constant 0 : index
    %0 = vector.load %arg5[%c0, %c0_0] : memref<64x128xbf16, #tpu.memory_space<vmem>>, vector<64x128xbf16>
    %c0_1 = arith.constant 0 : index
    %c0_2 = arith.constant 0 : index
    %1 = vector.load %arg6[%c0_1, %c0_2] : memref<1x128xf32, #tpu.memory_space<vmem>>, vector<1x128xf32>
    %cst = arith.constant 0.000000e+00 : bf16
    %2 = vector.broadcast %cst : bf16 to vector<18x18x128xbf16>
    %c0_3 = arith.constant 0 : index
    %c0_4 = arith.constant 0 : index
    %c0_5 = arith.constant 0 : index
    %3 = vector.load %arg10[%c0_3, %c0_4, %c0_5] : memref<18x18x128xbf16, #tpu.memory_space<vmem>>, vector<18x18x128xbf16>
    tpu.vector_store %arg10[%c0_3, %c0_4, %c0_5], %2 {strides = array<i32>} : memref<18x18x128xbf16, #tpu.memory_space<vmem>>, vector<18x18x128xbf16>,
    %c0_6 = arith.constant 0 : index
    %c0_7 = arith.constant 0 : index
    %c0_8 = arith.constant 0 : index
    %c0_9 = arith.constant 0 : index
    %4 = vector.load %arg3[%c0_6, %c0_7, %c0_8, %c0_9] : memref<1x16x16x64xbf16, #tpu.memory_space<vmem>>, vector<1x16x16x64xbf16>
    %5 = vector.shape_cast %4 : vector<1x16x16x64xbf16> to vector<256x64xbf16>
    %cst_10 = arith.constant dense<0.000000e+00> : vector<256x128xf32>
    %6 = tpu.matmul %5, %0, %cst_10 {dimension_numbers = #tpu.dot_dimension_numbers<[1], [0], [0], [1], [0, 0, 1, 1], [], []>} : vector<256x64xbf16>, vector<64x128xbf16>, vector<256x128xf32> -> vector<256x128xf32>
    %7 = vector.broadcast %1 : vector<1x128xf32> to vector<256x128xf32>
    %8 = arith.addf %6, %7 : vector<256x128xf32>
    %9 = arith.negf %8 : vector<256x128xf32>
    %10 = math.exp %9 : vector<256x128xf32>
    %cst_11 = arith.constant 1.000000e+00 : f32
    %11 = vector.broadcast %cst_11 : f32 to vector<256x128xf32>
    %12 = arith.addf %11, %10 : vector<256x128xf32>
    %13 = arith.divf %11, %12 : vector<256x128xf32>
    %14 = arith.mulf %8, %13 : vector<256x128xf32>
    %15 = arith.truncf %14 : vector<256x128xf32> to vector<256x128xbf16>
    %16 = vector.shape_cast %15 : vector<256x128xbf16> to vector<16x16x128xbf16>
    %c1 = arith.constant 1 : index
    %c1_12 = arith.constant 1 : index
    %c0_13 = arith.constant 0 : index
    %17 = vector.load %arg10[%c1, %c1_12, %c0_13] : memref<18x18x128xbf16, #tpu.memory_space<vmem>>, vector<16x16x128xbf16>
    tpu.vector_store %arg10[%c1, %c1_12, %c0_13], %16 {strides = array<i32>} : memref<18x18x128xbf16, #tpu.memory_space<vmem>>, vector<16x16x128xbf16>,
    %c0_i32 = arith.constant 0 : i32
    %18 = arith.cmpi sgt, %arg1, %c0_i32 : i32
    %19 = arith.extui %18 : i1 to i32
    %c0_i32_14 = arith.constant 0 : i32
    %20 = arith.cmpi ne, %19, %c0_i32_14 : i32
    scf.if %20 {
      %c0_81 = arith.constant 0 : index
      %c0_82 = arith.constant 0 : index
      %c0_83 = arith.constant 0 : index
      %c0_84 = arith.constant 0 : index
      %92 = vector.load %arg2[%c0_81, %c0_82, %c0_83, %c0_84] : memref<1x1x16x64xbf16, #tpu.memory_space<vmem>>, vector<1x1x16x64xbf16>
      %93 = vector.shape_cast %92 : vector<1x1x16x64xbf16> to vector<16x64xbf16>
      %cst_85 = arith.constant dense<0.000000e+00> : vector<16x128xf32>
      %94 = tpu.matmul %93, %0, %cst_85 {dimension_numbers = #tpu.dot_dimension_numbers<[1], [0], [0], [1], [0, 0, 1, 1], [], []>} : vector<16x64xbf16>, vector<64x128xbf16>, vector<16x128xf32> -> vector<16x128xf32>
      %95 = vector.broadcast %1 : vector<1x128xf32> to vector<16x128xf32>
      %96 = arith.addf %94, %95 : vector<16x128xf32>
      %97 = arith.negf %96 : vector<16x128xf32>
      %98 = math.exp %97 : vector<16x128xf32>
      %cst_86 = arith.constant 1.000000e+00 : f32
      %99 = vector.broadcast %cst_86 : f32 to vector<16x128xf32>
      %100 = arith.addf %99, %98 : vector<16x128xf32>
      %101 = arith.divf %99, %100 : vector<16x128xf32>
      %102 = arith.mulf %96, %101 : vector<16x128xf32>
      %103 = arith.truncf %102 : vector<16x128xf32> to vector<16x128xbf16>
      %104 = vector.shape_cast %103 : vector<16x128xbf16> to vector<1x16x128xbf16>
      %c0_87 = arith.constant 0 : index
      %c1_88 = arith.constant 1 : index
      %c0_89 = arith.constant 0 : index
      %105 = vector.load %arg10[%c0_87, %c1_88, %c0_89] : memref<18x18x128xbf16, #tpu.memory_space<vmem>>, vector<1x16x128xbf16>
      tpu.vector_store %arg10[%c0_87, %c1_88, %c0_89], %104 {strides = array<i32>} : memref<18x18x128xbf16, #tpu.memory_space<vmem>>, vector<1x16x128xbf16>,
    } else {
    }
    %c0_i32_15 = arith.constant 0 : i32
    %21 = arith.cmpi slt, %arg1, %c0_i32_15 : i32
    %22 = arith.extui %21 : i1 to i32
    %c0_i32_16 = arith.constant 0 : i32
    %23 = arith.cmpi ne, %22, %c0_i32_16 : i32
    scf.if %23 {
      %c0_81 = arith.constant 0 : index
      %c0_82 = arith.constant 0 : index
      %c0_83 = arith.constant 0 : index
      %c0_84 = arith.constant 0 : index
      %92 = vector.load %arg4[%c0_81, %c0_82, %c0_83, %c0_84] : memref<1x1x16x64xbf16, #tpu.memory_space<vmem>>, vector<1x1x16x64xbf16>
      %93 = vector.shape_cast %92 : vector<1x1x16x64xbf16> to vector<16x64xbf16>
      %cst_85 = arith.constant dense<0.000000e+00> : vector<16x128xf32>
      %94 = tpu.matmul %93, %0, %cst_85 {dimension_numbers = #tpu.dot_dimension_numbers<[1], [0], [0], [1], [0, 0, 1, 1], [], []>} : vector<16x64xbf16>, vector<64x128xbf16>, vector<16x128xf32> -> vector<16x128xf32>
      %95 = vector.broadcast %1 : vector<1x128xf32> to vector<16x128xf32>
      %96 = arith.addf %94, %95 : vector<16x128xf32>
      %97 = arith.negf %96 : vector<16x128xf32>
      %98 = math.exp %97 : vector<16x128xf32>
      %cst_86 = arith.constant 1.000000e+00 : f32
      %99 = vector.broadcast %cst_86 : f32 to vector<16x128xf32>
      %100 = arith.addf %99, %98 : vector<16x128xf32>
      %101 = arith.divf %99, %100 : vector<16x128xf32>
      %102 = arith.mulf %96, %101 : vector<16x128xf32>
      %103 = arith.truncf %102 : vector<16x128xf32> to vector<16x128xbf16>
      %104 = vector.shape_cast %103 : vector<16x128xbf16> to vector<1x16x128xbf16>
      %c17 = arith.constant 17 : index
      %c1_87 = arith.constant 1 : index
      %c0_88 = arith.constant 0 : index
      %105 = vector.load %arg10[%c17, %c1_87, %c0_88] : memref<18x18x128xbf16, #tpu.memory_space<vmem>>, vector<1x16x128xbf16>
      tpu.vector_store %arg10[%c17, %c1_87, %c0_88], %104 {strides = array<i32>} : memref<18x18x128xbf16, #tpu.memory_space<vmem>>, vector<1x16x128xbf16>,
    } else {
    }
    %cst_17 = arith.constant 0.000000e+00 : f32
    %24 = vector.broadcast %cst_17 : f32 to vector<256x64xf32>
    %c0_18 = arith.constant 0 : index
    %c0_19 = arith.constant 0 : index
    %c0_20 = arith.constant 0 : index
    %25 = vector.load %arg10[%c0_18, %c0_19, %c0_20] : memref<18x18x128xbf16, #tpu.memory_space<vmem>>, vector<16x16x128xbf16>
    %26 = vector.shape_cast %25 : vector<16x16x128xbf16> to vector<256x128xbf16>
    %c0_21 = arith.constant 0 : index
    %c0_22 = arith.constant 0 : index
    %c0_23 = arith.constant 0 : index
    %27 = vector.load %arg7[%c0_21, %c0_22, %c0_23] : memref<9x128x64xbf16, #tpu.memory_space<vmem>>, vector<1x128x64xbf16>
    %28 = vector.shape_cast %27 : vector<1x128x64xbf16> to vector<128x64xbf16>
    %cst_24 = arith.constant dense<0.000000e+00> : vector<256x64xf32>
    %29 = tpu.matmul %26, %28, %cst_24 {dimension_numbers = #tpu.dot_dimension_numbers<[1], [0], [0], [1], [0, 0, 1, 1], [], []>} : vector<256x128xbf16>, vector<128x64xbf16>, vector<256x64xf32> -> vector<256x64xf32>
    %30 = arith.addf %24, %29 : vector<256x64xf32>
    %c0_25 = arith.constant 0 : index
    %c1_26 = arith.constant 1 : index
    %c0_27 = arith.constant 0 : index
    %31 = vector.load %arg10[%c0_25, %c1_26, %c0_27] : memref<18x18x128xbf16, #tpu.memory_space<vmem>>, vector<16x16x128xbf16>
    %32 = vector.shape_cast %31 : vector<16x16x128xbf16> to vector<256x128xbf16>
    %c1_28 = arith.constant 1 : index
    %c0_29 = arith.constant 0 : index
    %c0_30 = arith.constant 0 : index
    %33 = vector.load %arg7[%c1_28, %c0_29, %c0_30] : memref<9x128x64xbf16, #tpu.memory_space<vmem>>, vector<1x128x64xbf16>
    %34 = vector.shape_cast %33 : vector<1x128x64xbf16> to vector<128x64xbf16>
    %cst_31 = arith.constant dense<0.000000e+00> : vector<256x64xf32>
    %35 = tpu.matmul %32, %34, %cst_31 {dimension_numbers = #tpu.dot_dimension_numbers<[1], [0], [0], [1], [0, 0, 1, 1], [], []>} : vector<256x128xbf16>, vector<128x64xbf16>, vector<256x64xf32> -> vector<256x64xf32>
    %36 = arith.addf %30, %35 : vector<256x64xf32>
    %c0_32 = arith.constant 0 : index
    %c2 = arith.constant 2 : index
    %c0_33 = arith.constant 0 : index
    %37 = vector.load %arg10[%c0_32, %c2, %c0_33] : memref<18x18x128xbf16, #tpu.memory_space<vmem>>, vector<16x16x128xbf16>
    %38 = vector.shape_cast %37 : vector<16x16x128xbf16> to vector<256x128xbf16>
    %c2_34 = arith.constant 2 : index
    %c0_35 = arith.constant 0 : index
    %c0_36 = arith.constant 0 : index
    %39 = vector.load %arg7[%c2_34, %c0_35, %c0_36] : memref<9x128x64xbf16, #tpu.memory_space<vmem>>, vector<1x128x64xbf16>
    %40 = vector.shape_cast %39 : vector<1x128x64xbf16> to vector<128x64xbf16>
    %cst_37 = arith.constant dense<0.000000e+00> : vector<256x64xf32>
    %41 = tpu.matmul %38, %40, %cst_37 {dimension_numbers = #tpu.dot_dimension_numbers<[1], [0], [0], [1], [0, 0, 1, 1], [], []>} : vector<256x128xbf16>, vector<128x64xbf16>, vector<256x64xf32> -> vector<256x64xf32>
    %42 = arith.addf %36, %41 : vector<256x64xf32>
    %c1_38 = arith.constant 1 : index
    %c0_39 = arith.constant 0 : index
    %c0_40 = arith.constant 0 : index
    %43 = vector.load %arg10[%c1_38, %c0_39, %c0_40] : memref<18x18x128xbf16, #tpu.memory_space<vmem>>, vector<16x16x128xbf16>
    %44 = vector.shape_cast %43 : vector<16x16x128xbf16> to vector<256x128xbf16>
    %c3 = arith.constant 3 : index
    %c0_41 = arith.constant 0 : index
    %c0_42 = arith.constant 0 : index
    %45 = vector.load %arg7[%c3, %c0_41, %c0_42] : memref<9x128x64xbf16, #tpu.memory_space<vmem>>, vector<1x128x64xbf16>
    %46 = vector.shape_cast %45 : vector<1x128x64xbf16> to vector<128x64xbf16>
    %cst_43 = arith.constant dense<0.000000e+00> : vector<256x64xf32>
    %47 = tpu.matmul %44, %46, %cst_43 {dimension_numbers = #tpu.dot_dimension_numbers<[1], [0], [0], [1], [0, 0, 1, 1], [], []>} : vector<256x128xbf16>, vector<128x64xbf16>, vector<256x64xf32> -> vector<256x64xf32>
    %48 = arith.addf %42, %47 : vector<256x64xf32>
    %c1_44 = arith.constant 1 : index
    %c1_45 = arith.constant 1 : index
    %c0_46 = arith.constant 0 : index
    %49 = vector.load %arg10[%c1_44, %c1_45, %c0_46] : memref<18x18x128xbf16, #tpu.memory_space<vmem>>, vector<16x16x128xbf16>
    %50 = vector.shape_cast %49 : vector<16x16x128xbf16> to vector<256x128xbf16>
    %c4 = arith.constant 4 : index
    %c0_47 = arith.constant 0 : index
    %c0_48 = arith.constant 0 : index
    %51 = vector.load %arg7[%c4, %c0_47, %c0_48] : memref<9x128x64xbf16, #tpu.memory_space<vmem>>, vector<1x128x64xbf16>
    %52 = vector.shape_cast %51 : vector<1x128x64xbf16> to vector<128x64xbf16>
    %cst_49 = arith.constant dense<0.000000e+00> : vector<256x64xf32>
    %53 = tpu.matmul %50, %52, %cst_49 {dimension_numbers = #tpu.dot_dimension_numbers<[1], [0], [0], [1], [0, 0, 1, 1], [], []>} : vector<256x128xbf16>, vector<128x64xbf16>, vector<256x64xf32> -> vector<256x64xf32>
    %54 = arith.addf %48, %53 : vector<256x64xf32>
    %c1_50 = arith.constant 1 : index
    %c2_51 = arith.constant 2 : index
    %c0_52 = arith.constant 0 : index
    %55 = vector.load %arg10[%c1_50, %c2_51, %c0_52] : memref<18x18x128xbf16, #tpu.memory_space<vmem>>, vector<16x16x128xbf16>
    %56 = vector.shape_cast %55 : vector<16x16x128xbf16> to vector<256x128xbf16>
    %c5 = arith.constant 5 : index
    %c0_53 = arith.constant 0 : index
    %c0_54 = arith.constant 0 : index
    %57 = vector.load %arg7[%c5, %c0_53, %c0_54] : memref<9x128x64xbf16, #tpu.memory_space<vmem>>, vector<1x128x64xbf16>
    %58 = vector.shape_cast %57 : vector<1x128x64xbf16> to vector<128x64xbf16>
    %cst_55 = arith.constant dense<0.000000e+00> : vector<256x64xf32>
    %59 = tpu.matmul %56, %58, %cst_55 {dimension_numbers = #tpu.dot_dimension_numbers<[1], [0], [0], [1], [0, 0, 1, 1], [], []>} : vector<256x128xbf16>, vector<128x64xbf16>, vector<256x64xf32> -> vector<256x64xf32>
    %60 = arith.addf %54, %59 : vector<256x64xf32>
    %c2_56 = arith.constant 2 : index
    %c0_57 = arith.constant 0 : index
    %c0_58 = arith.constant 0 : index
    %61 = vector.load %arg10[%c2_56, %c0_57, %c0_58] : memref<18x18x128xbf16, #tpu.memory_space<vmem>>, vector<16x16x128xbf16>
    %62 = vector.shape_cast %61 : vector<16x16x128xbf16> to vector<256x128xbf16>
    %c6 = arith.constant 6 : index
    %c0_59 = arith.constant 0 : index
    %c0_60 = arith.constant 0 : index
    %63 = vector.load %arg7[%c6, %c0_59, %c0_60] : memref<9x128x64xbf16, #tpu.memory_space<vmem>>, vector<1x128x64xbf16>
    %64 = vector.shape_cast %63 : vector<1x128x64xbf16> to vector<128x64xbf16>
    %cst_61 = arith.constant dense<0.000000e+00> : vector<256x64xf32>
    %65 = tpu.matmul %62, %64, %cst_61 {dimension_numbers = #tpu.dot_dimension_numbers<[1], [0], [0], [1], [0, 0, 1, 1], [], []>} : vector<256x128xbf16>, vector<128x64xbf16>, vector<256x64xf32> -> vector<256x64xf32>
    %66 = arith.addf %60, %65 : vector<256x64xf32>
    %c2_62 = arith.constant 2 : index
    %c1_63 = arith.constant 1 : index
    %c0_64 = arith.constant 0 : index
    %67 = vector.load %arg10[%c2_62, %c1_63, %c0_64] : memref<18x18x128xbf16, #tpu.memory_space<vmem>>, vector<16x16x128xbf16>
    %68 = vector.shape_cast %67 : vector<16x16x128xbf16> to vector<256x128xbf16>
    %c7 = arith.constant 7 : index
    %c0_65 = arith.constant 0 : index
    %c0_66 = arith.constant 0 : index
    %69 = vector.load %arg7[%c7, %c0_65, %c0_66] : memref<9x128x64xbf16, #tpu.memory_space<vmem>>, vector<1x128x64xbf16>
    %70 = vector.shape_cast %69 : vector<1x128x64xbf16> to vector<128x64xbf16>
    %cst_67 = arith.constant dense<0.000000e+00> : vector<256x64xf32>
    %71 = tpu.matmul %68, %70, %cst_67 {dimension_numbers = #tpu.dot_dimension_numbers<[1], [0], [0], [1], [0, 0, 1, 1], [], []>} : vector<256x128xbf16>, vector<128x64xbf16>, vector<256x64xf32> -> vector<256x64xf32>
    %72 = arith.addf %66, %71 : vector<256x64xf32>
    %c2_68 = arith.constant 2 : index
    %c2_69 = arith.constant 2 : index
    %c0_70 = arith.constant 0 : index
    %73 = vector.load %arg10[%c2_68, %c2_69, %c0_70] : memref<18x18x128xbf16, #tpu.memory_space<vmem>>, vector<16x16x128xbf16>
    %74 = vector.shape_cast %73 : vector<16x16x128xbf16> to vector<256x128xbf16>
    %c8 = arith.constant 8 : index
    %c0_71 = arith.constant 0 : index
    %c0_72 = arith.constant 0 : index
    %75 = vector.load %arg7[%c8, %c0_71, %c0_72] : memref<9x128x64xbf16, #tpu.memory_space<vmem>>, vector<1x128x64xbf16>
    %76 = vector.shape_cast %75 : vector<1x128x64xbf16> to vector<128x64xbf16>
    %cst_73 = arith.constant dense<0.000000e+00> : vector<256x64xf32>
    %77 = tpu.matmul %74, %76, %cst_73 {dimension_numbers = #tpu.dot_dimension_numbers<[1], [0], [0], [1], [0, 0, 1, 1], [], []>} : vector<256x128xbf16>, vector<128x64xbf16>, vector<256x64xf32> -> vector<256x64xf32>
    %78 = arith.addf %72, %77 : vector<256x64xf32>
    %c0_74 = arith.constant 0 : index
    %c0_75 = arith.constant 0 : index
    %79 = vector.load %arg8[%c0_74, %c0_75] : memref<1x64xf32, #tpu.memory_space<vmem>>, vector<1x64xf32>
    %80 = vector.broadcast %79 : vector<1x64xf32> to vector<256x64xf32>
    %81 = arith.addf %78, %80 : vector<256x64xf32>
    %82 = arith.negf %81 : vector<256x64xf32>
    %83 = math.exp %82 : vector<256x64xf32>
    %cst_76 = arith.constant 1.000000e+00 : f32
    %84 = vector.broadcast %cst_76 : f32 to vector<256x64xf32>
    %85 = arith.addf %84, %83 : vector<256x64xf32>
    %86 = arith.divf %84, %85 : vector<256x64xf32>
    %87 = arith.mulf %81, %86 : vector<256x64xf32>
    %88 = arith.extf %5 : vector<256x64xbf16> to vector<256x64xf32>
    %89 = arith.addf %87, %88 : vector<256x64xf32>
    %90 = vector.shape_cast %89 : vector<256x64xf32> to vector<1x16x16x64xf32>
    %c0_77 = arith.constant 0 : index
    %c0_78 = arith.constant 0 : index
    %c0_79 = arith.constant 0 : index
    %c0_80 = arith.constant 0 : index
    %91 = vector.load %arg9[%c0_77, %c0_78, %c0_79, %c0_80] : memref<1x16x16x64xf32, #tpu.memory_space<vmem>>, vector<1x16x16x64xf32>
    tpu.vector_store %arg9[%c0_77, %c0_78, %c0_79, %c0_80], %90 {strides = array<i32>} : memref<1x16x16x64xf32, #tpu.memory_space<vmem>>, vector<1x16x16x64xf32>,
    return
  }
  func.func @transform_0(%arg0: i32, %arg1: i32) -> (i32, i32, i32, i32) {
    %c16_i32 = arith.constant 16 : i32
    %0 = arith.muli %arg1, %c16_i32 : i32
    %c1_i32 = arith.constant 1 : i32
    %1 = arith.subi %0, %c1_i32 : i32
    %c0_i32 = arith.constant 0 : i32
    %2 = arith.maxsi %1, %c0_i32 : i32
    %c0_i32_0 = arith.constant 0 : i32
    %c0_i32_1 = arith.constant 0 : i32
    %c0_i32_2 = arith.constant 0 : i32
    return %arg0, %2, %c0_i32_0, %c0_i32_1 : i32, i32, i32, i32
  }
  func.func @transform_1(%arg0: i32, %arg1: i32) -> (i32, i32, i32, i32) {
    %c0_i32 = arith.constant 0 : i32
    %c0_i32_0 = arith.constant 0 : i32
    %c0_i32_1 = arith.constant 0 : i32
    return %arg0, %arg1, %c0_i32, %c0_i32_0 : i32, i32, i32, i32
  }
  func.func @transform_2(%arg0: i32, %arg1: i32) -> (i32, i32, i32, i32) {
    %c16_i32 = arith.constant 16 : i32
    %0 = arith.muli %arg1, %c16_i32 : i32
    %c16_i32_0 = arith.constant 16 : i32
    %1 = arith.addi %0, %c16_i32_0 : i32
    %c15_i32 = arith.constant 15 : i32
    %2 = arith.minsi %1, %c15_i32 : i32
    %c0_i32 = arith.constant 0 : i32
    %c0_i32_1 = arith.constant 0 : i32
    %c0_i32_2 = arith.constant 0 : i32
    return %arg0, %2, %c0_i32, %c0_i32_1 : i32, i32, i32, i32
  }
  func.func @transform_3(%arg0: i32, %arg1: i32) -> (i32, i32) {
    %c0_i32 = arith.constant 0 : i32
    %c0_i32_0 = arith.constant 0 : i32
    %c0_i32_1 = arith.constant 0 : i32
    return %c0_i32, %c0_i32_0 : i32, i32
  }
  func.func @transform_4(%arg0: i32, %arg1: i32) -> (i32, i32) {
    %c0_i32 = arith.constant 0 : i32
    %c0_i32_0 = arith.constant 0 : i32
    %c0_i32_1 = arith.constant 0 : i32
    return %c0_i32, %c0_i32_0 : i32, i32
  }
  func.func @transform_5(%arg0: i32, %arg1: i32) -> (i32, i32, i32) {
    %c0_i32 = arith.constant 0 : i32
    %c0_i32_0 = arith.constant 0 : i32
    %c0_i32_1 = arith.constant 0 : i32
    %c0_i32_2 = arith.constant 0 : i32
    return %c0_i32, %c0_i32_0, %c0_i32_1 : i32, i32, i32
  }
  func.func @transform_6(%arg0: i32, %arg1: i32) -> (i32, i32) {
    %c0_i32 = arith.constant 0 : i32
    %c0_i32_0 = arith.constant 0 : i32
    %c0_i32_1 = arith.constant 0 : i32
    return %c0_i32, %c0_i32_0 : i32, i32
  }
  func.func @transform_7(%arg0: i32, %arg1: i32) -> (i32, i32, i32, i32) {
    %c0_i32 = arith.constant 0 : i32
    %c0_i32_0 = arith.constant 0 : i32
    %c0_i32_1 = arith.constant 0 : i32
    return %arg0, %arg1, %c0_i32, %c0_i32_0 : i32, i32, i32, i32
  }
}

</mosaic_0001>

<bundles_post_ra>
// kernel: tpu_custom_call.1
= control target key start
LH: loop header
LB: loop body
LE: loop exit
PB: predicated region body
PF: predicated region fallthrough
CT: control target
= control target key end

     0   :  { %12 = vsyncpa [#allocation4], 0  ;;  %s12091_s0 = inlined_call_operand.vmem [shape: bf16[2,16,16,64], index: 0, kind: input, shape index: {}]   ;;  %s12092_s1 = inlined_call_operand.vmem [shape: bf16[2,16,16,64], index: 1, kind: input, shape index: {}]   ;;  %s12093_s2 = inlined_call_operand.vmem [shape: bf16[2,16,16,64], index: 2, kind: input, shape index: {}]   ;;  %s12094_s3 = inlined_call_operand.vmem [shape: bf16[64,128], index: 3, kind: input, shape index: {}]   ;;  %s12095_s4 = inlined_call_operand.vmem [shape: f32[1,128], index: 4, kind: input, shape index: {}]   ;;  %s12096_s5 = inlined_call_operand.vmem [shape: bf16[9,128,64], index: 5, kind: input, shape index: {}]   ;;  %s12097_s6 = inlined_call_operand.vmem [shape: f32[1,64], index: 6, kind: input, shape index: {}]   ;;  %s12098_s7 = inlined_call_operand.hbm [shape: f32[2,16,16,64], index: 7, kind: output, shape index: {}]  }
   0x1   :  { %14 = vsyncpa [#allocation4 + $0x1], 0  ;;  %s9062_s23 = smov 0   ;;  %s9064_s2 = smov 0  }
   0x2   :  { %s9066_s24 = smov 0   ;;  %s9068_s25 = smov 0  }
   0x3   :  { %s9070_s26 = smov 0   ;;  %s9072_s27 = smov 0  }
   0x4 LB: > { %s7125_s28 = sadd.s32 4294967295, %s9016_s27   ;;  %s7126_s29 = sadd.s32 4294967294, %s9016_s27   ;;  %s9016_s27 = sphi %s9072_s27, %s20_s27   ;;  %s9012_s26 = sphi %s9070_s26, %s12281_s26   ;;  %s9008_s25 = sphi %s9068_s25, %s12280_s25   ;;  %s9004_s24 = sphi %s9066_s24, %s12279_s24   ;;  %s9000_s2 = sphi %s9064_s2, %s12278_s2   ;;  %s8996_s23 = sphi %s9062_s23, %s12277_s23  }
   0x5   : > { %s32_s30 = sadd.s32 1, %s9012_s26  ;;  %s225_s8 = sadd.s32 1, %s9004_s24 }
   0x6   : > { %p34_p0 = scmp.ge.s32.totalorder %s32_s30, 2  ;;  %p235_p1 = scmp.ne.s32.totalorder %s9004_s24, %s9000_s2 }
   0x7   : > { %p236_p2 = scmp.eq.s32.totalorder %s7125_s28, 1  ;;  %p241_p3 = scmp.ne.s32.totalorder %s9000_s2, %s8996_s23 }
   0x8   : > { %s12283_s30 = smov (%p34_p0, %s32_s30), 0  ;;  %p242_p5 = scmp.eq.s32.totalorder %s7126_s29, 1 }
   0x9   : > { %p9102_p4 = por %p236_p2, %p235_p1  ;;  %s220_s10 = ssub.s32 %s9012_s26, %s12283_s30 }
   0xa   : > { %p7129_p6 = scmp.ge.s32.totalorder %s9016_s27, 1  ;;  %p223_p7 = scmp.eq.s32.totalorder %s220_s10, 0 }
   0xb   : > { %p9109_p8 = por %p242_p5, %p241_p3  ;;  %p326_p9 = scmp.lt.s32.totalorder %s9016_s27, 3 }
   0xc   : > { %s9115_s12 = scalar_select %p223_p7, %s9004_s24, %s225_s8  }
   0xd   : > { %p327_p10 = pnand %p7129_p6, %p326_p9 }
   0xf   : > { %330 = sbr.rel (%p327_p10) target bundleno = 950 (0x3b6), region = 48 }
  0x14   : > { %v8503_v0 = vld [vmem:[%s12094_s3 + $0x18] sm:$0xff]   ;;  %p407_p11 = scmp.lt.s32.totalorder %s9008_s25, 1  ;;  %v9124_v1 = vld [vmem:[%s12094_s3 + $0x10] sm:$0xff]   ;;  %v9133_v2 = vld [vmem:[%s12094_s3 + $0x8] sm:$0xff]   ;;  %v9018_v3 = vmov 0   ;;  %vm641_vm0 = vcmask 523264  }
  0x15   : > { %7957 = vmatprep.subr.bf16.mxu0 %v8503_v0  ;;  %451 = vst [vmem:[#allocation2 + $0x18] sm:$0xf] %v9018_v3  ;;  %445 = vst [vmem:[#allocation2] sm:$0xf] %v9018_v3  ;;  %v8506_v5 = vld [vmem:[%s12094_s3] sm:$0xff]   ;;  %v8523_v21 = vld [vmem:[%s12096_s5 + $0x38] sm:$0xff]  }
  0x16   : > { %s9127_s17 = scalar_select %p407_p11, %s9008_s25, 1  ;;  %7958 = vmatpush3.bf16.msra.mxu0 %v8503_v0  ;;  %446 = vst [vmem:[#allocation2 + $0x4] sm:$0xf] %v9018_v3  ;;  %447 = vst [vmem:[#allocation2 + $0x8] sm:$0x1] %v9018_v3  ;;  %v8524_v22 = vld [vmem:[%s12096_s5 + $0x30] sm:$0xff]  }
  0x17   : > { %7959 = vmatprep.subr.bf16.mxu0 %v9124_v1  ;;  %448 = vst [vmem:[#allocation2 + $0xc] sm:$0xf] %v9018_v3  ;;  %449 = vst [vmem:[#allocation2 + $0x10] sm:$0xf] %v9018_v3  ;;  %v8526_v23 = vld [vmem:[%s12096_s5 + $0x28] sm:$0xff]   ;;  %v8525_v24 = vld [vmem:[%s12096_s5 + $0x78] sm:$0xff]  }
  0x18   : > { %s7681_s20 = sshll.u32 %s9127_s17, 7  ;;  %450 = vst [vmem:[#allocation2 + $0x14] sm:$0x1] %v9018_v3  ;;  %452 = vst [vmem:[#allocation2 + $0x1c] sm:$0xf] %v9018_v3  ;;  %7997 = vmatprep.subr.bf16.mxu1 %v8525_v24  ;;  %v8528_v25 = vld [vmem:[%s12096_s5 + $0x20] sm:$0xff]  }
  0x19   : > { %453 = vst [vmem:[#allocation2 + $0x20] sm:$0x1] %v9018_v3  ;;  %454 = vst [vmem:[#allocation2 + $0x24] sm:$0xf] %v9018_v3  ;;  %s9141_s0 = scalar_lea.vmem %s12092_s1, %s7681_s20  ;;  %7998 = vmatpush3.bf16.msra.mxu1 %v8525_v24  ;;  %v8527_v26 = vld [vmem:[%s12096_s5 + $0x70] sm:$0xff]   ;;  %v8530_v27 = vld [vmem:[%s12096_s5 + $0x18] sm:$0xff]  }
  0x1a   : > { %455 = vst [vmem:[#allocation2 + $0x28] sm:$0xf] %v9018_v3  ;;  %456 = vst [vmem:[#allocation2 + $0x2c] sm:$0x1] %v9018_v3  ;;  %v499_v4 = vld [vmem:[%s9141_s0] sm:$0xff]   ;;  %7960 = vmatpush3.bf16.msra.mxu0 %v9124_v1  ;;  %v501_v6 = vld [vmem:[%s9141_s0 + $0x8] sm:$0xff]   ;;  %7999 = vmatprep.subr.bf16.mxu1 %v8527_v26 }
  0x1b   : > { %457 = vst [vmem:[#allocation2 + $0x30] sm:$0xf] %v9018_v3  ;;  %458 = vst [vmem:[#allocation2 + $0x34] sm:$0xf] %v9018_v3  ;;  %7961 = vmatprep.subr.bf16.mxu0 %v9133_v2  ;;  %7965 = vmatprep.mubr.msk.bf16.mxu0 %vm641_vm0, %v499_v4  ;;  %v503_v7 = vld [vmem:[%s9141_s0 + $0x10] sm:$0xff]   ;;  %v505_v8 = vld [vmem:[%s9141_s0 + $0x18] sm:$0xff]  }
  0x1c   : > { %459 = vst [vmem:[#allocation2 + $0x38] sm:$0x1] %v9018_v3  ;;  %460 = vst [vmem:[#allocation2 + $0x3c] sm:$0xf] %v9018_v3  ;;  %v507_v9 = vld [vmem:[%s9141_s0 + $0x20] sm:$0xff]   ;;  %v509_v10 = vld [vmem:[%s9141_s0 + $0x28] sm:$0xff]  }
  0x1d   : > { %461 = vst [vmem:[#allocation2 + $0x40] sm:$0xf] %v9018_v3  ;;  %462 = vst [vmem:[#allocation2 + $0x44] sm:$0x1] %v9018_v3  ;;  %v511_v11 = vld [vmem:[%s9141_s0 + $0x30] sm:$0xff]   ;;  %v513_v12 = vld [vmem:[%s9141_s0 + $0x38] sm:$0xff]   ;;  %8000 = vmatpush3.bf16.msra.mxu1 %v8527_v26 }
  0x1e   : > { %463 = vst [vmem:[#allocation2 + $0x48] sm:$0xf] %v9018_v3  ;;  %464 = vst [vmem:[#allocation2 + $0x4c] sm:$0xf] %v9018_v3  ;;  %7962 = vmatpush3.bf16.msra.mxu0 %v9133_v2  ;;  %v515_v13 = vld [vmem:[%s9141_s0 + $0x40] sm:$0xff]   ;;  %v517_v14 = vld [vmem:[%s9141_s0 + $0x48] sm:$0xff]  }
  0x1f   : > { %465 = vst [vmem:[#allocation2 + $0x50] sm:$0x1] %v9018_v3  ;;  %466 = vst [vmem:[#allocation2 + $0x54] sm:$0xf] %v9018_v3  ;;  %7963 = vmatprep.subr.bf16.mxu0 %v8506_v5  ;;  %v519_v15 = vld [vmem:[%s9141_s0 + $0x50] sm:$0xff]   ;;  %v521_v16 = vld [vmem:[%s9141_s0 + $0x58] sm:$0xff]  }
  0x20   : > { %467 = vst [vmem:[#allocation2 + $0x58] sm:$0xf] %v9018_v3  ;;  %468 = vst [vmem:[#allocation2 + $0x5c] sm:$0x1] %v9018_v3  ;;  %v523_v17 = vld [vmem:[%s9141_s0 + $0x60] sm:$0xff]   ;;  %v525_v18 = vld [vmem:[%s9141_s0 + $0x68] sm:$0xff]  }
  0x21   : > { %469 = vst [vmem:[#allocation2 + $0x60] sm:$0xf] %v9018_v3  ;;  %470 = vst [vmem:[#allocation2 + $0x64] sm:$0xf] %v9018_v3  ;;  %v527_v19 = vld [vmem:[%s9141_s0 + $0x70] sm:$0xff]   ;;  %v529_v20 = vld [vmem:[%s9141_s0 + $0x78] sm:$0xff]  }
  0x22   : > { %471 = vst [vmem:[#allocation2 + $0x68] sm:$0x1] %v9018_v3  ;;  %472 = vst [vmem:[#allocation2 + $0x6c] sm:$0xf] %v9018_v3  ;;  %7964 = vmatpush3.bf16.msra.mxu0 %v8506_v5  ;;  %v8529_v28 = vld [vmem:[%s12096_s5 + $0x68] sm:$0xff]   ;;  %v8532_v29 = vld [vmem:[%s12096_s5 + $0x10] sm:$0xff]  }
  0x23   : > { %473 = vst [vmem:[#allocation2 + $0x70] sm:$0xf] %v9018_v3  ;;  %474 = vst [vmem:[#allocation2 + $0x74] sm:$0x1] %v9018_v3  ;;  %8045 = vmatprep.subr.bf16.mxu0 %v8523_v21  ;;  %8001 = vmatprep.subr.bf16.mxu1 %v8529_v28  ;;  %v8531_v30 = vld [vmem:[%s12096_s5 + $0x60] sm:$0xff]   ;;  %v8534_v31 = vld [vmem:[%s12096_s5 + $0x8] sm:$0xff]  }
  0x24   : > { %475 = vst [vmem:[#allocation2 + $0x78] sm:$0xf] %v9018_v3  ;;  %476 = vst [vmem:[#allocation2 + $0x7c] sm:$0xf] %v9018_v3  ;;  %8002 = vmatpush3.bf16.msra.mxu1 %v8529_v28  ;;  %v8533_v32 = vld [vmem:[%s12096_s5 + $0x58] sm:$0xff]   ;;  %v8536_v33 = vld [vmem:[%s12096_s5] sm:$0xff]  }
  0x25   : > { %477 = vst [vmem:[#allocation2 + $0x80] sm:$0x1] %v9018_v3  ;;  %478 = vst [vmem:[#allocation2 + $0x84] sm:$0xf] %v9018_v3  ;;  %7966 = vmatmul.mubr.msk.bf16.vlgmr.msra.gmra.mxu0 %vm641_vm0, %v501_v6  ;;  %8003 = vmatprep.subr.bf16.mxu1 %v8531_v30  ;;  %v8535_v34 = vld [vmem:[%s12096_s5 + $0x50] sm:$0xff]   ;;  %v8538_v42 = vld [vmem:[%s12096_s5 + $0x48] sm:$0xff]  }
  0x26   : > { %479 = vst [vmem:[#allocation2 + $0x88] sm:$0xf] %v9018_v3  ;;  %480 = vst [vmem:[#allocation2 + $0x8c] sm:$0x1] %v9018_v3  ;;  %7969 = vmatprep.mubr.msk.bf16.mxu0 %vm641_vm0, %v503_v7  ;;  %8046 = vmatpush3.bf16.msra.mxu0 %v8523_v21  ;;  %v1817_v35 = vld [vmem:[#allocation2] sm:$0xf] }
  0x27   : > { %481 = vst [vmem:[#allocation2 + $0x90] sm:$0xf] %v9018_v3  ;;  %482 = vst [vmem:[#allocation2 + $0x94] sm:$0xf] %v9018_v3  ;;  %8047 = vmatprep.subr.bf16.mxu0 %v8524_v22  ;;  %v1818_v36 = vld [vmem:[#allocation2 + $0x4] sm:$0xf] }
  0x28   : > { %483 = vst [vmem:[#allocation2 + $0x98] sm:$0x1] %v9018_v3  ;;  %484 = vst [vmem:[#allocation2 + $0x9c] sm:$0xf] %v9018_v3  ;;  %8004 = vmatpush3.bf16.msra.mxu1 %v8531_v30  ;;  %v7290_v37 = vcombine.low %v1817_v35, %v1818_v36  ;;  %v1885_v38 = vshrl.u32 %v1817_v35, 16  ;;  %v1888_v39 = vshll.u32 %v1817_v35, 16 }
  0x29   : > { %485 = vst [vmem:[#allocation2 + $0xa0] sm:$0xf] %v9018_v3  ;;  %486 = vst [vmem:[#allocation2 + $0xa4] sm:$0x1] %v9018_v3  ;;  %8005 = vmatprep.subr.bf16.mxu1 %v8533_v32  ;;  %v1894_v40 = vshll.u32 %v1818_v36, 16  ;;  %v1898_v41 = vshrl.u32 %v1818_v36, 16 }
  0x2a   : > { %487 = vst [vmem:[#allocation2 + $0xa8] sm:$0xf] %v9018_v3  ;;  %488 = vst [vmem:[#allocation2 + $0xac] sm:$0xf] %v9018_v3  ;;  %8048 = vmatpush3.bf16.msra.mxu0 %v8524_v22  ;;  %v1887_v43 = vrot.slane %v1885_v38, 4  ;;  %v1890_v44 = vrot.slane %v1888_v39, 5 }
  0x2b   : > { %489 = vst [vmem:[#allocation2 + $0xb0] sm:$0x1] %v9018_v3  ;;  %490 = vst [vmem:[#allocation2 + $0xb4] sm:$0xf] %v9018_v3  ;;  %8049 = vmatprep.subr.bf16.mxu0 %v8526_v23  ;;  %v1896_v45 = vrot.slane %v1894_v40, 5  ;;  %v1900_v47 = vrot.slane %v1898_v41, 4 }
  0x2c   : > { %491 = vst [vmem:[#allocation2 + $0xb8] sm:$0xf] %v9018_v3  ;;  %492 = vst [vmem:[#allocation2 + $0xbc] sm:$0x1] %v9018_v3  ;;  %8006 = vmatpush3.bf16.msra.mxu1 %v8533_v32  ;;  %v9226_v46 = vld [vmem:[#allocation2 + $0x8] sm:$0x1]  ;;  %v1891_v48 = vor.u32 %v1890_v44, %v1887_v43 }
  0x2d   : > { %493 = vst [vmem:[#allocation2 + $0xc0] sm:$0xf] %v9018_v3  ;;  %494 = vst [vmem:[#allocation2 + $0xc4] sm:$0xf] %v9018_v3  ;;  %7970 = vmatmul.mubr.msk.bf16.gmra.mxu0 %vm641_vm0, %v505_v8  ;;  %8007 = vmatprep.subr.bf16.mxu1 %v8535_v34  ;;  %vm1881_vm1 = vsmask.f32 3328  ;;  %v1901_v50 = vor.u32 %v1900_v47, %v1896_v45 }
  0x2e   : > { %495 = vst [vmem:[#allocation2 + $0xc8] sm:$0x1] %v9018_v3  ;;  %496 = vst [vmem:[#allocation2 + $0xcc] sm:$0xf] %v9018_v3  ;;  %7973 = vmatprep.mubr.msk.bf16.mxu0 %vm641_vm0, %v507_v9  ;;  %8050 = vmatpush3.bf16.msra.mxu0 %v8526_v23  ;;  %vm1882_vm2 = vsmask.f32 7440 }
  0x2f   : > { %497 = vst [vmem:[#allocation2 + $0xd0] sm:$0xf] %v9018_v3  ;;  %498 = vst [vmem:[#allocation2 + $0xd4] sm:$0x1] %v9018_v3  ;;  %8051 = vmatprep.subr.bf16.mxu0 %v8528_v25  ;;  %v1904_v49 = vshll.u32 %v9226_v46, 16  ;;  %v8541_v51 = vld [vmem:[%s12096_s5 + $0x40] sm:$0xff]  }
  0x30   : > { %8008 = vmatpush3.bf16.msra.mxu1 %v8535_v34  ;;  %v1892_v52 = vrot.slane %v1891_v48, 4  ;;  %vm9232_vm3 = vmor %vm1881_vm1, %vm1882_vm2  ;;  %v1902_v55 = vrot.slane %v1901_v50, 4  ;;  %v9243_v59 = vld [vmem:[%s12095_s4] ss:$0 sm:$0xff]  ;;  %v8543_v32 = vld [vmem:[%s12096_s5 + $0xb8] sm:$0xff]   ;;  %vm1495_vm4 = vcmask 1043456  }
  0x31   : > { %8009 = vmatprep.subr.bf16.mxu1 %v8538_v42  ;;  %v1906_v53 = vrot.slane %v1904_v49, 5  ;;  %vm1496_vm5 = vsmask.f32 7938  ;;  %vm1171_vm6 = vsmask.f32 256  ;;  %vm1502_vm8 = vcmask 1040384  }
  0x32   : > { %8052 = vmatpush3.bf16.msra.mxu0 %v8528_v25  ;;  %v1897_v56 = vsel %vm9232_vm3, %v1892_v52, %v1896_v45  ;;  %vm1172_vm7 = vsmask.f32 4368  ;;  %vm9344_vm9 = vmand %vm1495_vm4, %vm1496_vm5  ;;  %vm2911_vm12 = vcmask 1042432   ;;  %vm2912_vm13 = vcmask 1046532   ;;  %s386_s28 = sand.u32 1, %s9000_s2   ;;  %s7720_s10 = sshll.u32 %s9008_s25, 12 }
  0x33   : > { %8053 = vmatprep.subr.bf16.mxu0 %v8530_v27  ;;  %v1907_v57 = vsel %vm9232_vm3, %v1902_v55, %v1906_v53  ;;  %vm9365_vm10 = vmor %vm1171_vm6, %vm1172_vm7  ;;  %s7130_s29 = sshll.u32 %s386_s28, 8  ;;  %s12036_s15 = scalar_lea.hbm %s12098_s7, %s7720_s10 }
  0x34   : > { %8010 = vmatpush3.bf16.msra.mxu1 %v8538_v42  ;;  %v7266_v58 = vcombine.low %v1897_v56, %v1907_v57  ;;  %vm9371_vm11 = vmand %vm1502_vm8, %vm1171_vm6  ;;  %s11855_s8 = scalar_lea.vmem [#allocation3], %s7130_s29  ;;  %s12046_s25 = scalar_lea.sflag [#allocation4], %s386_s28 }
  0x35   : > { %7974 = vmatmul.mubr.msk.bf16.gmra.mxu0 %vm641_vm0, %v509_v10  ;;  %8011 = vmatprep.subr.bf16.mxu1 %v8541_v51  ;;  %vm9936_vm14 = vmor %vm2911_vm12, %vm2912_vm13  ;;  %s9019_s17 = smov [#allocation3]  }
  0x36   : > { %7977 = vmatprep.mubr.msk.bf16.mxu0 %vm641_vm0, %v511_v11  ;;  %8054 = vmatpush3.bf16.msra.mxu0 %v8530_v27  ;;  %s8944_s18 = sshll.u32 %s9019_s17, 4  ;;  %s8945_s18 = int_to_ptr.vmem [resolvable:$false] %s8944_s18 }
  0x37   : > { %8055 = vmatprep.subr.bf16.mxu0 %v8532_v29  ;;  %8013 = vmatprep.mubr.bf16.mxu1 %v7266_v58  ;;  %s8946_s19 = scalar_lea.vmem %s8945_s18, 8192 }
  0x38   : > { %8012 = vmatpush3.bf16.msra.mxu1 %v8541_v51 }
  0x39   : > { %8093 = vmatprep.subr.bf16.mxu1 %v8543_v32 }
  0x3a   : > { %8056 = vmatpush3.bf16.msra.mxu0 %v8532_v29 }
  0x3b   : > { %8057 = vmatprep.subr.bf16.mxu0 %v8534_v31 }
  0x3d   : > { %7978 = vmatmul.mubr.msk.bf16.gmra.mxu0 %vm641_vm0, %v513_v12 }
  0x3e   : > { %7981 = vmatprep.mubr.msk.bf16.mxu0 %vm641_vm0, %v515_v13  ;;  %8058 = vmatpush3.bf16.msra.mxu0 %v8534_v31 }
  0x3f   : > { %8059 = vmatprep.subr.bf16.mxu0 %v8536_v33 }
  0x42   : > { %8060 = vmatpush3.bf16.msra.mxu0 %v8536_v33 }
  0x45   : > { %7982 = vmatmul.mubr.msk.bf16.gmra.mxu0 %vm641_vm0, %v517_v14 }
  0x46   : > { %7985 = vmatprep.mubr.msk.bf16.mxu0 %vm641_vm0, %v519_v15 }
  0x4d   : > { %7986 = vmatmul.mubr.msk.bf16.gmra.mxu0 %vm641_vm0, %v521_v16 }
  0x4e   : > { %7989 = vmatprep.mubr.msk.bf16.mxu0 %vm641_vm0, %v523_v17 }
  0x55   : > { %7990 = vmatmul.mubr.msk.bf16.gmra.mxu0 %vm641_vm0, %v525_v18 }
  0x56   : > { %7993 = vmatprep.mubr.msk.bf16.mxu0 %vm641_vm0, %v527_v19 }
  0x5d   : > { %7994 = vmatmul.mubr.msk.bf16.gmra.mxu0 %vm641_vm0, %v529_v20 }
  0x5e   : > { %8061 = vmatprep.mubr.bf16.mxu0 %v7290_v37 }
  0xe5   : > { %v7967_v60 = vpop.f32.mrf.mxu0 }
  0xe6   : > { %v9246_v61 = vadd.f32 %v7967_v60, %v9243_v59 }
  0xe7   : > { %v724_v62 = vpop.f32.mrf.mxu0 }
  0xe8   : > { %v7176_v63 = vmul.f32 -1.442695, %v9246_v61  ;;  %v9250_v0 = vadd.f32 %v9243_v59, %v724_v62 }
  0xe9   : > { %v7968_v1 = vpop.f32.mrf.mxu0 }
  0xea   : > { %8659 = vpow2.f32 %v7176_v63  ;;  %v7174_v2 = vmul.f32 -1.442695, %v9250_v0  ;;  %v9254_v3 = vadd.f32 %v7968_v1, %v9243_v59 }
  0xeb   : > { %v727_v4 = vpop.f32.mrf.mxu0 }
  0xec   : > { %8661 = vpow2.f32 %v7174_v2  ;;  %v7177_v5 = vmul.f32 -1.442695, %v9254_v3  ;;  %v9258_v6 = vadd.f32 %v9243_v59, %v727_v4 }
  0xed   : > { %v7971_v7 = vpop.f32.mrf.mxu0 }
  0xee   : > { %8663 = vpow2.f32 %v7177_v5  ;;  %v7175_v8 = vmul.f32 -1.442695, %v9258_v6  ;;  %v9262_v9 = vadd.f32 %v7971_v7, %v9243_v59 }
  0xef   : > { %v740_v10 = vpop.f32.mrf.mxu0 }
  0xf0   : > { %8665 = vpow2.f32 %v7175_v8  ;;  %v7180_v11 = vmul.f32 -1.442695, %v9262_v9  ;;  %v9266_v12 = vadd.f32 %v9243_v59, %v740_v10 }
  0xf1   : > { %v7972_v13 = vpop.f32.mrf.mxu0 }
  0xf2   : > { %8667 = vpow2.f32 %v7180_v11  ;;  %v7178_v14 = vmul.f32 -1.442695, %v9266_v12  ;;  %v9270_v15 = vadd.f32 %v7972_v13, %v9243_v59 }
  0xf3   : > { %v743_v16 = vpop.f32.mrf.mxu0 }
  0xf4   : > { %8669 = vpow2.f32 %v7178_v14  ;;  %v7181_v17 = vmul.f32 -1.442695, %v9270_v15  ;;  %v9274_v18 = vadd.f32 %v9243_v59, %v743_v16 }
  0xf5   : > { %v7975_v19 = vpop.f32.mrf.mxu0 }
  0xf6   : > { %8671 = vpow2.f32 %v7181_v17  ;;  %v7179_v20 = vmul.f32 -1.442695, %v9274_v18  ;;  %v9278_v21 = vadd.f32 %v7975_v19, %v9243_v59 }
  0xf7   : > { %v8660_v22 = vpop.eup %8659  ;;  %v756_v23 = vpop.f32.mrf.mxu0 }
  0xf8   : > { %v949_v24 = vadd.f32 1.0, %v8660_v22  ;;  %8673 = vpow2.f32 %v7179_v20  ;;  %v7184_v25 = vmul.f32 -1.442695, %v9278_v21  ;;  %v9282_v26 = vadd.f32 %v9243_v59, %v756_v23 }
  0xf9   : > { %v8662_v27 = vpop.eup %8661  ;;  %v7976_v28 = vpop.f32.mrf.mxu0 }
  0xfa   : > { %8675 = vrcp.f32 %v949_v24  ;;  %v947_v29 = vadd.f32 1.0, %v8662_v27  ;;  %v7182_v30 = vmul.f32 -1.442695, %v9282_v26  ;;  %v9286_v31 = vadd.f32 %v7976_v28, %v9243_v59  ;;  %v9330_v28 = vld [vmem:[%s12096_s5 + $0xf8] sm:$0xff]  }
  0xfb   : > { %v8664_v33 = vpop.eup %8663  ;;  %8677 = vpow2.f32 %v7184_v25  ;;  %v759_v34 = vpop.f32.mrf.mxu0  ;;  %8141 = vmatprep.subr.bf16.mxu0 %v9330_v28 }
  0xfc   : > { %8679 = vrcp.f32 %v947_v29  ;;  %v950_v35 = vadd.f32 1.0, %v8664_v33  ;;  %v7185_v36 = vmul.f32 -1.442695, %v9286_v31  ;;  %v9293_v37 = vadd.f32 %v9243_v59, %v759_v34 }
  0xfd   : > { %v8666_v38 = vpop.eup %8665  ;;  %8681 = vpow2.f32 %v7182_v30  ;;  %v7979_v39 = vpop.f32.mrf.mxu0 }
  0xfe   : > { %8683 = vrcp.f32 %v950_v35  ;;  %v948_v40 = vadd.f32 1.0, %v8666_v38  ;;  %v7183_v41 = vmul.f32 -1.442695, %v9293_v37  ;;  %v9297_v42 = vadd.f32 %v7979_v39, %v9243_v59 }
  0xff   : > { %v8668_v43 = vpop.eup %8667  ;;  %8685 = vpow2.f32 %v7185_v36  ;;  %v772_v44 = vpop.f32.mrf.mxu0 }
 0x100   : > { %8687 = vrcp.f32 %v948_v40  ;;  %v953_v45 = vadd.f32 1.0, %v8668_v43  ;;  %v7188_v47 = vmul.f32 -1.442695, %v9297_v42  ;;  %v9301_v48 = vadd.f32 %v9243_v59, %v772_v44 }
 0x101   : > { %v8670_v49 = vpop.eup %8669  ;;  %8689 = vpow2.f32 %v7183_v41  ;;  %v7980_v50 = vpop.f32.mrf.mxu0 }
 0x102   : > { %8691 = vrcp.f32 %v953_v45  ;;  %v951_v51 = vadd.f32 1.0, %v8670_v49  ;;  %v7186_v52 = vmul.f32 -1.442695, %v9301_v48  ;;  %v9305_v53 = vadd.f32 %v7980_v50, %v9243_v59  ;;  %v1507_v49 = vld [vmem:[#allocation2 + $0x18] sm:$0xf] }
 0x103   : > { %v8672_v55 = vpop.eup %8671  ;;  %8693 = vpow2.f32 %v7188_v47  ;;  %v775_v56 = vpop.f32.mrf.mxu0 }
 0x104   : > { %8695 = vrcp.f32 %v951_v51  ;;  %v954_v57 = vadd.f32 1.0, %v8672_v55  ;;  %v7189_v58 = vmul.f32 -1.442695, %v9305_v53  ;;  %v9309_v60 = vadd.f32 %v9243_v59, %v775_v56 }
 0x105   : > { %v8674_v62 = vpop.eup %8673  ;;  %8697 = vpow2.f32 %v7186_v52  ;;  %v7983_v63 = vpop.f32.mrf.mxu0 }
 0x106   : > { %8699 = vrcp.f32 %v954_v57  ;;  %v952_v1 = vadd.f32 1.0, %v8674_v62  ;;  %v7187_v2 = vmul.f32 -1.442695, %v9309_v60  ;;  %v9313_v4 = vadd.f32 %v7983_v63, %v9243_v59 }
 0x107   : > { %v8676_v5 = vpop.eup %8675  ;;  %8701 = vpow2.f32 %v7189_v58  ;;  %v788_v7 = vpop.f32.mrf.mxu0 }
 0x108   : > { %v8678_v8 = vpop.eup %8677  ;;  %v1045_v10 = vmul.f32 %v8676_v5, %v9246_v61  ;;  %8703 = vrcp.f32 %v952_v1  ;;  %v7192_v11 = vmul.f32 -1.442695, %v9313_v4  ;;  %v9318_v13 = vadd.f32 %v9243_v59, %v788_v7 }
 0x109   : > { %v8680_v14 = vpop.eup %8679  ;;  %v957_v16 = vadd.f32 1.0, %v8678_v8  ;;  %8705 = vpow2.f32 %v7187_v2  ;;  %v7984_v17 = vpop.f32.mrf.mxu0  ;;  %v1498_v2 = vld [vmem:[#allocation2 + $0xc] sm:$0xf] }
 0x10a   : > { %v8682_v19 = vpop.eup %8681  ;;  %v7686_v20 = vpack.c.bf16 %v1045_v10, %v1045_v10  ;;  %v1043_v22 = vmul.f32 %v8680_v14, %v9250_v0  ;;  %8707 = vpow2.f32 %v7192_v11  ;;  %v9322_v24 = vmul.f32 -1.442695, %v9318_v13 }
 0x10b   : > { %v8684_v23 = vpop.eup %8683  ;;  %8709 = vrcp.f32 %v957_v16  ;;  %v955_v61 = vadd.f32 1.0, %v8682_v19  ;;  %v9325_v25 = vadd.f32 %v7984_v17, %v9243_v59  ;;  %v791_v27 = vpop.f32.mrf.mxu0 }
 0x10c   : > { %v8686_v29 = vpop.eup %8685  ;;  %v1192_v30 = vshrl.u32 %v7686_v20, 16  ;;  %v1195_v0 = vshll.u32 %v7686_v20, 16  ;;  %v7684_v32 = vpack.c.bf16 %v1043_v22, %v1043_v22  ;;  %v1046_v33 = vmul.f32 %v8684_v23, %v9254_v3  ;;  %v1511_v22 = vld [vmem:[#allocation2 + $0x20] sm:$0x1] }
 0x10d   : > { %v8688_v34 = vpop.eup %8687  ;;  %8711 = vrcp.f32 %v955_v61  ;;  %v958_v35 = vadd.f32 1.0, %v8686_v29  ;;  %v9334_v36 = vmul.f32 -1.442695, %v9325_v25  ;;  %v9337_v38 = vadd.f32 %v9243_v59, %v791_v27  ;;  %v9339_v39 = vpop.f32.mrf.mxu0  ;;  %v8552_v3 = vld [vmem:[%s12096_s5 + $0xa0] sm:$0xff]  }
 0x10e   : > { %v8690_v40 = vpop.eup %8689  ;;  %v1194_v41 = vrot.slane %v1192_v30, 7  ;;  %v1175_v43 = vshrl.u32 %v7684_v32, 16  ;;  %v1178_v44 = vshll.u32 %v7684_v32, 16  ;;  %v7687_v45 = vpack.c.bf16 %v1046_v33, %v1046_v33 }
 0x10f   : > { %v8692_v47 = vpop.eup %8691  ;;  %v1044_v50 = vmul.f32 %v8688_v34, %v9258_v6  ;;  %8713 = vrcp.f32 %v958_v35  ;;  %v956_v51 = vadd.f32 1.0, %v8690_v40  ;;  %v9350_v52 = vmul.f32 -1.442695, %v9337_v38  ;;  %v9352_v55 = vpop.f32.mrf.mxu0 }
 0x110   : > { %v9354_v56 = vpop.eup %8693  ;;  %v1197_v57 = vor.u32 %v1195_v0, %v1194_v41  ;;  %v1198_v58 = vrot.slane %v1194_v41, 4  ;;  %v1177_v62 = vrot.slane %v1175_v43, 7  ;;  %v1200_v63 = vshrl.u32 %v7687_v45, 16 }
 0x111   : > { %v8696_v1 = vpop.eup %8695  ;;  %v1203_v5 = vshll.u32 %v7687_v45, 16  ;;  %v7685_v7 = vpack.c.bf16 %v1044_v50, %v1044_v50  ;;  %v1049_v8 = vmul.f32 %v8692_v47, %v9262_v9  ;;  %8715 = vrcp.f32 %v956_v51  ;;  %v9357_v6 = vpop.f32.mrf.mxu0  ;;  %v1504_v51 = vld [vmem:[#allocation2 + $0x14] sm:$0x1] }
 0x112   : > { %v9359_v10 = vpop.eup %8697  ;;  %v1508_v11 = vsel %vm9344_vm9, %v1197_v57, %v1507_v49  ;;  %v1180_v14 = vor.u32 %v1178_v44, %v1177_v62  ;;  %v1181_v16 = vrot.slane %v1177_v62, 4  ;;  %v1202_v19 = vrot.slane %v1200_v63, 7 }
 0x113   : > { %v8700_v20 = vpop.eup %8699  ;;  %1509 = vst [vmem:[#allocation2 + $0x18] sm:$0xf] %v1508_v11  ;;  %v1183_v23 = vshrl.u32 %v7685_v7, 16  ;;  %v1186_v61 = vshll.u32 %v7685_v7, 16  ;;  %v7690_v27 = vpack.c.bf16 %v1049_v8, %v1049_v8  ;;  %v1047_v29 = vmul.f32 %v8696_v1, %v9266_v12  ;;  %v9376_v30 = vpop.f32.mrf.mxu0  ;;  %v1521_v11 = vld [vmem:[#allocation2 + $0x30] sm:$0xf] }
 0x114   : > { %v9378_v0 = vpop.eup %8701  ;;  %v1499_v32 = vsel %vm9344_vm9, %v1180_v14, %v1498_v2  ;;  %v1205_v33 = vor.u32 %v1203_v5, %v1202_v19  ;;  %v1207_v34 = vrot.slane %v1202_v19, 4  ;;  %v1050_v35 = vmul.f32 %v8700_v20, %v9270_v15 }
 0x115   : > { %v8704_v40 = vpop.eup %8703  ;;  %1500 = vst [vmem:[#allocation2 + $0xc] sm:$0xf] %v1499_v32  ;;  %v1185_v41 = vrot.slane %v1183_v23, 7  ;;  %v1226_v43 = vshrl.u32 %v7690_v27, 16  ;;  %v1229_v44 = vshll.u32 %v7690_v27, 16  ;;  %v7688_v45 = vpack.c.bf16 %v1047_v29, %v1047_v29  ;;  %v9383_v47 = vpop.f32.mrf.mxu0 }
 0x116   : > { %v9385_v12 = vpop.eup %8705  ;;  %v1206_v49 = vsel %vm9365_vm10, %v1198_v58, %v1205_v33  ;;  %v1512_v50 = vsel %vm9371_vm11, %v1207_v34, %v1511_v22  ;;  %v7691_v57 = vpack.c.bf16 %v1050_v35, %v1050_v35  ;;  %v1048_v15 = vmul.f32 %v8704_v40, %v9274_v18  ;;  %v1525_v34 = vld [vmem:[#allocation2 + $0x38] sm:$0x1] }
 0x117   : > { %v9392_v62 = vpop.eup %8707  ;;  %1510 = vst [vmem:[#allocation2 + $0x1c] sm:$0xf] %v1206_v49  ;;  %1513 = vst [vmem:[#allocation2 + $0x20] sm:$0x1] %v1512_v50  ;;  %v1188_v63 = vor.u32 %v1186_v61, %v1185_v41  ;;  %v1190_v1 = vrot.slane %v1185_v41, 4  ;;  %v1228_v2 = vrot.slane %v1226_v43, 7  ;;  %v9394_v7 = vpop.f32.mrf.mxu0 }
 0x118   : > { %v1209_v5 = vshrl.u32 %v7688_v45, 16  ;;  %v8710_v8 = vpop.eup %8709  ;;  %v1212_v58 = vshll.u32 %v7688_v45, 16  ;;  %v1234_v14 = vshrl.u32 %v7691_v57, 16  ;;  %v1237_v19 = vshll.u32 %v7691_v57, 16  ;;  %v1514_v61 = vld [vmem:[#allocation2 + $0x24] sm:$0xf] }
 0x119   : > { %v7689_v20 = vpack.c.bf16 %v1048_v15, %v1048_v15  ;;  %v1189_v22 = vsel %vm9365_vm10, %v1181_v16, %v1188_v63  ;;  %v1505_v18 = vsel %vm9371_vm11, %v1190_v1, %v1504_v51  ;;  %v1231_v23 = vor.u32 %v1229_v44, %v1228_v2  ;;  %v9405_v44 = vpop.f32.mrf.mxu0 }
 0x11a   : > { %v1232_v27 = vrot.slane %v1228_v2, 4  ;;  %v8712_v29 = vpop.eup %8711  ;;  %1501 = vst [vmem:[#allocation2 + $0x10] sm:$0xf] %v1189_v22  ;;  %1506 = vst [vmem:[#allocation2 + $0x14] sm:$0x1] %v1505_v18  ;;  %v1211_v32 = vrot.slane %v1209_v5, 7  ;;  %v1053_v43 = vmul.f32 %v8710_v8, %v9278_v21 }
 0x11b   : > { %v1236_v33 = vrot.slane %v1234_v14, 7  ;;  %v1217_v35 = vshrl.u32 %v7689_v20, 16  ;;  %v1220_v40 = vshll.u32 %v7689_v20, 16  ;;  %v1522_v41 = vsel %vm9344_vm9, %v1231_v23, %v1521_v11  ;;  %v1518_v8 = vld [vmem:[#allocation2 + $0x2c] sm:$0x1] }
 0x11c   : > { %v1051_v16 = vmul.f32 %v8712_v29, %v9282_v26  ;;  %v961_v45 = vadd.f32 1.0, %v9354_v56  ;;  %v8714_v49 = vpop.eup %8713  ;;  %1523 = vst [vmem:[#allocation2 + $0x30] sm:$0xf] %v1522_v41  ;;  %v1214_v50 = vor.u32 %v1212_v58, %v1211_v32  ;;  %v1215_v51 = vrot.slane %v1211_v32, 4 }
 0x11d   : > { %v1239_v57 = vor.u32 %v1237_v19, %v1236_v33  ;;  %v1241_v15 = vrot.slane %v1236_v33, 4  ;;  %v1219_v63 = vrot.slane %v1217_v35, 7  ;;  %v7694_v1 = vpack.c.bf16 %v1053_v43, %v1053_v43  ;;  %v1535_v33 = vld [vmem:[#allocation2 + $0x48] sm:$0xf] }
 0x11e   : > { %v7692_v2 = vpack.c.bf16 %v1051_v16, %v1051_v16  ;;  %v1054_v5 = vmul.f32 %v8714_v49, %v9286_v31  ;;  %v8716_v11 = vpop.eup %8715  ;;  %v1515_v21 = vsel %vm9344_vm9, %v1214_v50, %v1514_v61  ;;  %8717 = vrcp.f32 %v961_v45  ;;  %v9414_v31 = vpop.f32.mrf.mxu0  ;;  %v1528_v49 = vld [vmem:[#allocation2 + $0x3c] sm:$0xf] }
 0x11f   : > { %v1240_v26 = vsel %vm9365_vm10, %v1232_v27, %v1239_v57  ;;  %v1526_v56 = vsel %vm9371_vm11, %v1241_v15, %v1525_v34  ;;  %1516 = vst [vmem:[#allocation2 + $0x24] sm:$0xf] %v1515_v21  ;;  %v1222_v58 = vor.u32 %v1220_v40, %v1219_v63  ;;  %v1224_v14 = vrot.slane %v1219_v63, 4 }
 0x120   : > { %1524 = vst [vmem:[#allocation2 + $0x34] sm:$0xf] %v1240_v26  ;;  %1527 = vst [vmem:[#allocation2 + $0x38] sm:$0x1] %v1526_v56  ;;  %v1260_v19 = vshrl.u32 %v7694_v1, 16  ;;  %v1263_v20 = vshll.u32 %v7694_v1, 16  ;;  %v7695_v23 = vpack.c.bf16 %v1054_v5, %v1054_v5  ;;  %v1052_v61 = vmul.f32 %v8716_v11, %v9293_v37  ;;  %v7995_v50 = vpop.f32.mrf.mxu0 }
 0x121   : > { %v1243_v22 = vshrl.u32 %v7692_v2, 16  ;;  %v1246_v18 = vshll.u32 %v7692_v2, 16  ;;  %v1223_v27 = vsel %vm9365_vm10, %v1215_v51, %v1222_v58  ;;  %v1519_v29 = vsel %vm9371_vm11, %v1224_v14, %v1518_v8  ;;  %v1539_v1 = vld [vmem:[#allocation2 + $0x50] sm:$0x1]  ;;  %v1532_v56 = vld [vmem:[#allocation2 + $0x44] sm:$0x1] }
 0x122   : > { %v1262_v32 = vrot.slane %v1260_v19, 7  ;;  %v959_v34 = vadd.f32 1.0, %v9359_v10  ;;  %1517 = vst [vmem:[#allocation2 + $0x28] sm:$0xf] %v1223_v27  ;;  %1520 = vst [vmem:[#allocation2 + $0x2c] sm:$0x1] %v1519_v29  ;;  %v7693_v43 = vpack.c.bf16 %v1052_v61, %v1052_v61  ;;  %v9431_v58 = vadd.f32 %v9339_v39, %v9243_v59 }
 0x123   : > { %v1245_v35 = vrot.slane %v1243_v22, 7  ;;  %v1268_v40 = vshrl.u32 %v7695_v23, 16  ;;  %v1271_v41 = vshll.u32 %v7695_v23, 16  ;;  %v962_v37 = vadd.f32 1.0, %v9378_v0 }
 0x124   : > { %v1265_v16 = vor.u32 %v1263_v20, %v1262_v32  ;;  %v1266_v45 = vrot.slane %v1262_v32, 4  ;;  %8719 = vrcp.f32 %v959_v34  ;;  %v1251_v63 = vshrl.u32 %v7693_v43, 16 }
 0x125   : > { %v1248_v51 = vor.u32 %v1246_v18, %v1245_v35  ;;  %v1249_v57 = vrot.slane %v1245_v35, 4  ;;  %v1270_v15 = vrot.slane %v1268_v40, 7  ;;  %v1254_v2 = vshll.u32 %v7693_v43, 16 }
 0x126   : > { %v1536_v10 = vsel %vm9344_vm9, %v1265_v16, %v1535_v33  ;;  %8721 = vrcp.f32 %v962_v37  ;;  %v960_v5 = vadd.f32 1.0, %v9385_v12  ;;  %v1253_v0 = vrot.slane %v1251_v63, 7  ;;  %v836_v12 = vpop.f32.mrf.mxu0 }
 0x127   : > { %1537 = vst [vmem:[#allocation2 + $0x48] sm:$0xf] %v1536_v10  ;;  %v1529_v11 = vsel %vm9344_vm9, %v1248_v51, %v1528_v49  ;;  %v1273_v21 = vor.u32 %v1271_v41, %v1270_v15  ;;  %v1275_v26 = vrot.slane %v1270_v15, 4  ;;  %v965_v8 = vadd.f32 1.0, %v9392_v62  ;;  %v9483_v41 = vld [vmem:[#allocation2 + $0x10] sm:$0xf] }
 0x128   : > { %1530 = vst [vmem:[#allocation2 + $0x3c] sm:$0xf] %v1529_v11  ;;  %8723 = vrcp.f32 %v960_v5  ;;  %v9435_v14 = vadd.f32 %v9243_v59, %v9352_v55  ;;  %v1256_v22 = vor.u32 %v1254_v2, %v1253_v0  ;;  %v1258_v18 = vrot.slane %v1253_v0, 4  ;;  %v9498_v10 = vld [vmem:[#allocation2 + $0xc] sm:$0xf] }
 0x129   : > { %v1274_v19 = vsel %vm9365_vm10, %v1266_v45, %v1273_v21  ;;  %v1540_v20 = vsel %vm9371_vm11, %v1275_v26, %v1539_v1  ;;  %8725 = vrcp.f32 %v965_v8  ;;  %v7196_v62 = vmul.f32 -1.442695, %v9431_v58  ;;  %v1549_v21 = vld [vmem:[#allocation2 + $0x60] sm:$0xf] }
 0x12a   : > { %1538 = vst [vmem:[#allocation2 + $0x4c] sm:$0xf] %v1274_v19  ;;  %1541 = vst [vmem:[#allocation2 + $0x50] sm:$0x1] %v1540_v20  ;;  %v7194_v39 = vmul.f32 -1.442695, %v9435_v14  ;;  %v9445_v55 = vadd.f32 %v9357_v6, %v9243_v59  ;;  %v1257_v23 = vsel %vm9365_vm10, %v1249_v57, %v1256_v22  ;;  %v1533_v61 = vsel %vm9371_vm11, %v1258_v18, %v1532_v56 }
 0x12b   : > { %8727 = vpow2.f32 %v9322_v24  ;;  %v9454_v27 = vadd.f32 %v9243_v59, %v9376_v30  ;;  %v8718_v29 = vpop.eup %8717  ;;  %1531 = vst [vmem:[#allocation2 + $0x40] sm:$0xf] %v1257_v23  ;;  %1534 = vst [vmem:[#allocation2 + $0x44] sm:$0x1] %v1533_v61  ;;  %v9460_v32 = vadd.f32 %v9383_v47, %v9243_v59  ;;  %v9464_v33 = vadd.f32 %v9243_v59, %v9394_v7  ;;  %v7996_v24 = vpop.f32.mrf.mxu0  ;;  %v1542_v61 = vld [vmem:[#allocation2 + $0x54] sm:$0xf] }
 0x12c   : > { %8729 = vpow2.f32 %v9334_v36  ;;  %v7197_v6 = vmul.f32 -1.442695, %v9445_v55  ;;  %v1057_v34 = vmul.f32 %v8718_v29, %v9297_v42  ;;  %v9471_v36 = vadd.f32 %v9405_v44, %v9243_v59 }
 0x12d   : > { %8731 = vpow2.f32 %v9350_v52  ;;  %v7195_v30 = vmul.f32 -1.442695, %v9454_v27  ;;  %v7200_v35 = vmul.f32 -1.442695, %v9460_v32  ;;  %v9476_v47 = vadd.f32 %v9243_v59, %v9414_v31  ;;  %v839_v31 = vpop.f32.mrf.mxu0 }
 0x12e   : > { %8733 = vpow2.f32 %v7196_v62  ;;  %v7698_v40 = vpack.c.bf16 %v1057_v34, %v1057_v34  ;;  %v7198_v42 = vmul.f32 -1.442695, %v9464_v33  ;;  %v9481_v52 = vadd.f32 %v7995_v50, %v9243_v59  ;;  %v9493_v50 = vld [vmem:[#allocation2 + $0x18] sm:$0xf] }
 0x12f   : > { %8735 = vpow2.f32 %v7194_v39  ;;  %v7201_v44 = vmul.f32 -1.442695, %v9471_v36  ;;  %v7199_v43 = vmul.f32 -1.442695, %v9476_v47  ;;  %v9488_v16 = vadd.f32 %v9243_v59, %v836_v12 }
 0x130   : > { %8737 = vpow2.f32 %v7197_v6  ;;  %v1294_v49 = vshrl.u32 %v7698_v40, 16  ;;  %v1297_v37 = vshll.u32 %v7698_v40, 16  ;;  %v9491_v51 = vadd.f32 %v7996_v24, %v9243_v59  ;;  %v8558_v6 = vld [vmem:[%s12096_s5 + $0xe8] sm:$0xff]  }
 0x131   : > { %v8720_v45 = vpop.eup %8719  ;;  %8739 = vpow2.f32 %v7195_v30  ;;  %v7204_v15 = vmul.f32 -1.442695, %v9481_v52  ;;  %v7202_v63 = vmul.f32 -1.442695, %v9488_v16  ;;  %v9503_v5 = vadd.f32 %v9243_v59, %v839_v31 }
 0x132   : > { %v1055_v57 = vmul.f32 %v8720_v45, %v9301_v48  ;;  %8741 = vpow2.f32 %v7200_v35  ;;  %v9500_v2 = vrot.slane %v1294_v49, 7  ;;  %v7291_v11 = vcombine.low %v9498_v10, %v9483_v41  ;;  %v8555_v48 = vld [vmem:[%s12096_s5 + $0xf0] sm:$0xff]  }
 0x133   : > { %v8722_v1 = vpop.eup %8721  ;;  %8743 = vpow2.f32 %v7198_v42  ;;  %v1933_v56 = vshrl.u32 %v9493_v50, 16  ;;  %v9515_v19 = vmul.f32 -1.442695, %v9491_v51  ;;  %v9519_v62 = vmul.f32 -1.442695, %v9503_v5 }
 0x134   : > { %v7696_v26 = vpack.c.bf16 %v1055_v57, %v1055_v57  ;;  %v1058_v0 = vmul.f32 %v8722_v1, %v9305_v53  ;;  %8745 = vpow2.f32 %v7201_v44  ;;  %v1299_v12 = vor.u32 %v1297_v37, %v9500_v2  ;;  %8062 = vmatmul.mubr.bf16.vlgmr.msra.gmra.mxu0 %v7291_v11  ;;  %v1553_v42 = vld [vmem:[#allocation2 + $0x68] sm:$0x1] }
 0x135   : > { %v8724_v8 = vpop.eup %8723  ;;  %v1300_v59 = vrot.slane %v9500_v2, 4  ;;  %8747 = vpow2.f32 %v7199_v43  ;;  %8142 = vmatpush3.bf16.msra.mxu0 %v9330_v28  ;;  %v9524_v29 = vrot.slane %v1933_v56, 4  ;;  %v1936_v28 = vshll.u32 %v9493_v50, 16 }
 0x136   : > { %v1277_v20 = vshrl.u32 %v7696_v26, 16  ;;  %v7699_v22 = vpack.c.bf16 %v1058_v0, %v1058_v0  ;;  %v1056_v18 = vmul.f32 %v8724_v8, %v9309_v60  ;;  %v8726_v53 = vpop.eup %8725  ;;  %v1550_v39 = vsel %vm9344_vm9, %v1299_v12, %v1549_v21  ;;  %8143 = vmatprep.subr.bf16.mxu0 %v8555_v48  ;;  %v8560_v21 = vld [vmem:[%s12096_s5 + $0xe0] sm:$0xff]  }
 0x137   : > { %v1280_v23 = vshll.u32 %v7696_v26, 16  ;;  %8749 = vpow2.f32 %v7204_v15  ;;  %1551 = vst [vmem:[#allocation2 + $0x60] sm:$0xf] %v1550_v39  ;;  %v1061_v44 = vmul.f32 %v8726_v53, %v9313_v4 }
 0x138   : > { %v8728_v60 = vpop.eup %8727  ;;  %v1279_v24 = vrot.slane %v1277_v20, 7  ;;  %v1302_v34 = vshrl.u32 %v7699_v22, 16  ;;  %v7697_v30 = vpack.c.bf16 %v1056_v18, %v1056_v18  ;;  %v1305_v40 = vshll.u32 %v7699_v22, 16 }
 0x139   : > { %v8730_v35 = vpop.eup %8729  ;;  %v963_v43 = vadd.f32 1.0, %v8728_v60  ;;  %8751 = vpow2.f32 %v7202_v63  ;;  %8144 = vmatpush3.bf16.msra.mxu0 %v8555_v48  ;;  %v7702_v2 = vpack.c.bf16 %v1061_v44, %v1061_v44  ;;  %v1546_v48 = vld [vmem:[#allocation2 + $0x5c] sm:$0x1] }
 0x13a   : > { %v8732_v31 = vpop.eup %8731  ;;  %v1282_v45 = vor.u32 %v1280_v23, %v1279_v24  ;;  %v1283_v49 = vrot.slane %v1279_v24, 4  ;;  %v1304_v37 = vrot.slane %v1302_v34, 7  ;;  %v1285_v57 = vshrl.u32 %v7697_v30, 16  ;;  %8145 = vmatprep.subr.bf16.mxu0 %v8558_v6  ;;  %v1563_v34 = vld [vmem:[#allocation2 + $0x78] sm:$0xf] }
 0x13b   : > { %v8734_v15 = vpop.eup %8733  ;;  %v1288_v1 = vshll.u32 %v7697_v30, 16  ;;  %8753 = vrcp.f32 %v963_v43  ;;  %v966_v11 = vadd.f32 1.0, %v8730_v35  ;;  %v1328_v12 = vshrl.u32 %v7702_v2, 16 }
 0x13c   : > { %v8736_v26 = vpop.eup %8735  ;;  %v1543_v4 = vsel %vm9344_vm9, %v1282_v45, %v1542_v61  ;;  %v1307_v63 = vor.u32 %v1305_v40, %v1304_v37  ;;  %v1309_v0 = vrot.slane %v1304_v37, 4  ;;  %v1287_v56 = vrot.slane %v1285_v57, 7 }
 0x13d   : > { %v8738_v8 = vpop.eup %8737  ;;  %1544 = vst [vmem:[#allocation2 + $0x54] sm:$0xf] %v1543_v4  ;;  %v1331_v20 = vshll.u32 %v7702_v2, 16  ;;  %8755 = vrcp.f32 %v966_v11  ;;  %v964_v22 = vadd.f32 1.0, %v8732_v31  ;;  %8146 = vmatpush3.bf16.msra.mxu0 %v8558_v6  ;;  %v9540_v24 = vrot.slane %v1328_v12, 7 }
 0x13e   : > { %v8740_v18 = vpop.eup %8739  ;;  %v1308_v53 = vsel %vm9365_vm10, %v1300_v59, %v1307_v63  ;;  %v1554_v39 = vsel %vm9371_vm11, %v1309_v0, %v1553_v42  ;;  %v1290_v23 = vor.u32 %v1288_v1, %v1287_v56  ;;  %v1292_v60 = vrot.slane %v1287_v56, 4  ;;  %8147 = vmatprep.subr.bf16.mxu0 %v8560_v21  ;;  %v8563_v59 = vld [vmem:[%s12096_s5 + $0xd8] sm:$0xff]   ;;  %v1823_v1 = vld [vmem:[#allocation2 + $0x24] sm:$0xf]  ;;  %v9554_v2 = vld [vmem:[#allocation2 + $0x28] sm:$0xf] }
 0x13f   : > { %v8742_v61 = vpop.eup %8741  ;;  %1552 = vst [vmem:[#allocation2 + $0x64] sm:$0xf] %v1308_v53  ;;  %1555 = vst [vmem:[#allocation2 + $0x68] sm:$0x1] %v1554_v39  ;;  %8757 = vrcp.f32 %v964_v22  ;;  %v969_v30 = vadd.f32 1.0, %v8734_v15  ;;  %v967_v35 = vadd.f32 1.0, %v8736_v26  ;;  %v1333_v37 = vor.u32 %v1331_v20, %v9540_v24 }
 0x140   : > { %v8744_v40 = vpop.eup %8743  ;;  %v1291_v42 = vsel %vm9365_vm10, %v1283_v49, %v1290_v23  ;;  %v1547_v6 = vsel %vm9371_vm11, %v1292_v60, %v1546_v48  ;;  %v970_v44 = vadd.f32 1.0, %v8738_v8  ;;  %v968_v43 = vadd.f32 1.0, %v8740_v18  ;;  %v9549_v31 = vld [vmem:[#allocation2 + $0x1c] sm:$0xf]  ;;  %v8565_v56 = vld [vmem:[%s12096_s5 + $0xd0] sm:$0xff]  }
 0x141   : > { %v8746_v45 = vpop.eup %8745  ;;  %1545 = vst [vmem:[#allocation2 + $0x58] sm:$0xf] %v1291_v42  ;;  %1548 = vst [vmem:[#allocation2 + $0x5c] sm:$0x1] %v1547_v6  ;;  %8759 = vrcp.f32 %v969_v30  ;;  %v973_v57 = vadd.f32 1.0, %v8742_v61  ;;  %v9552_v15 = vrot.slane %v1936_v28, 5  ;;  %8148 = vmatpush3.bf16.msra.mxu0 %v8560_v21  ;;  %v1564_v63 = vsel %vm9344_vm9, %v1333_v37, %v1563_v34 }
 0x142   : > { %v8748_v49 = vpop.eup %8747  ;;  %v1334_v11 = vrot.slane %v9540_v24, 4  ;;  %8761 = vrcp.f32 %v967_v35  ;;  %v971_v26 = vadd.f32 1.0, %v8744_v40  ;;  %v974_v4 = vadd.f32 1.0, %v8746_v45  ;;  %8149 = vmatprep.subr.bf16.mxu0 %v8563_v59  ;;  %1565 = vst [vmem:[#allocation2 + $0x78] sm:$0xf] %v1564_v63  ;;  %v8568_v35 = vld [vmem:[%s12096_s5 + $0xc8] sm:$0xff]  }
 0x143   : > { %8763 = vrcp.f32 %v970_v44  ;;  %v1946_v0 = vshrl.u32 %v9549_v31, 16  ;;  %v7292_v28 = vcombine.low %v9493_v50, %v9549_v31  ;;  %v972_v48 = vadd.f32 1.0, %v8748_v49  ;;  %v9566_v18 = vld [vmem:[#allocation2 + $0x14] sm:$0x1] }
 0x144   : > { %v8750_v8 = vpop.eup %8749  ;;  %8765 = vrcp.f32 %v968_v43  ;;  %v1957_v12 = vshrl.u32 %v1823_v1, 16  ;;  %v1960_v21 = vshll.u32 %v1823_v1, 16  ;;  %v7293_v22 = vcombine.low %v1823_v1, %v9554_v2 }
 0x145   : > { %8767 = vrcp.f32 %v973_v57  ;;  %v977_v20 = vadd.f32 1.0, %v8750_v8  ;;  %8065 = vmatprep.mubr.bf16.mxu0 %v7292_v28  ;;  %v1909_v50 = vshrl.u32 %v9498_v10, 16  ;;  %v1970_v23 = vshrl.u32 %v9554_v2, 16  ;;  %8150 = vmatpush3.bf16.msra.mxu0 %v8563_v59 }
 0x146   : > { %v8752_v53 = vpop.eup %8751  ;;  %8769 = vrcp.f32 %v971_v26  ;;  %v9569_v39 = vrot.slane %v1957_v12, 4  ;;  %v1912_v60 = vshll.u32 %v9498_v10, 16  ;;  %8066 = vmatmul.mubr.bf16.gmra.mxu0 %v7293_v22  ;;  %v1918_v30 = vshll.u32 %v9483_v41, 16  ;;  %8151 = vmatprep.subr.bf16.mxu0 %v8565_v56  ;;  %v9579_v10 = vld [vmem:[#allocation2 + $0x30] sm:$0xf] }
 0x147   : > { %8771 = vrcp.f32 %v974_v4  ;;  %v975_v61 = vadd.f32 1.0, %v8752_v53  ;;  %v1911_v34 = vrot.slane %v1909_v50, 4  ;;  %v1922_v6 = vshrl.u32 %v9483_v41, 16 }
 0x148   : > { %v8754_v40 = vpop.eup %8753  ;;  %8773 = vrcp.f32 %v972_v48  ;;  %v1914_v42 = vrot.slane %v1912_v60, 5  ;;  %v1928_v44 = vshll.u32 %v9566_v18, 16  ;;  %v9582_v43 = vrot.slane %v1960_v21, 5 }
 0x149   : > { %v1059_v59 = vmul.f32 %v8754_v40, %v9318_v13  ;;  %8775 = vrcp.f32 %v977_v20  ;;  %v9584_v45 = vrot.slane %v1918_v30, 5  ;;  %v1924_v1 = vrot.slane %v1922_v6, 4  ;;  %8152 = vmatpush3.bf16.msra.mxu0 %v8565_v56  ;;  %v8570_v13 = vld [vmem:[%s12096_s5 + $0xc0] sm:$0xff]  }
 0x14a   : > { %v8756_v37 = vpop.eup %8755  ;;  %8777 = vrcp.f32 %v975_v61  ;;  %v1915_v57 = vor.u32 %v1914_v42, %v1911_v34  ;;  %v9588_v4 = vrot.slane %v1928_v44, 5  ;;  %v1981_v63 = vshrl.u32 %v9579_v10, 16  ;;  %8153 = vmatprep.subr.bf16.mxu0 %v8568_v35  ;;  %v1556_v42 = vld [vmem:[#allocation2 + $0x6c] sm:$0xf] }
 0x14b   : > { %v7700_v26 = vpack.c.bf16 %v1059_v59, %v1059_v59  ;;  %v1062_v41 = vmul.f32 %v8756_v37, %v9325_v25  ;;  %8779 = vpow2.f32 %v9515_v19  ;;  %v1925_v48 = vor.u32 %v1924_v1, %v9584_v45 }
 0x14c   : > { %v8758_v28 = vpop.eup %8757  ;;  %v9595_v8 = vrot.slane %v1915_v57, 4  ;;  %v1984_v56 = vshll.u32 %v9579_v10, 16  ;;  %8781 = vpow2.f32 %v9519_v62  ;;  %v9607_v53 = vrot.slane %v1981_v63, 4 }
 0x14d   : > { %v1311_v12 = vshrl.u32 %v7700_v26, 16  ;;  %v7703_v25 = vpack.c.bf16 %v1062_v41, %v1062_v41  ;;  %v1060_v21 = vmul.f32 %v8758_v28, %v9337_v38  ;;  %v1314_v22 = vshll.u32 %v7700_v26, 16  ;;  %8154 = vmatpush3.bf16.msra.mxu0 %v8568_v35  ;;  %v8585_v38 = vld [vmem:[%s12096_s5 + $0x178] sm:$0xff]   ;;  %v1567_v28 = vld [vmem:[#allocation2 + $0x80] sm:$0x1] }
 0x14e   : > { %v8760_v20 = vpop.eup %8759  ;;  %v1921_v50 = vsel %vm9232_vm3, %v9595_v8, %v9584_v45  ;;  %v9605_v19 = vrot.slane %v1925_v48, 4  ;;  %v9609_v40 = vrot.slane %v1984_v56, 5  ;;  %8155 = vmatprep.subr.bf16.mxu0 %v8570_v13  ;;  %v9687_v8 = vld [vmem:[#allocation2 + $0x20] sm:$0x1] }
 0x14f   : > { %v8762_v60 = vpop.eup %8761  ;;  %v1313_v61 = vrot.slane %v1311_v12, 7  ;;  %v1336_v34 = vshrl.u32 %v7703_v25, 16  ;;  %v7701_v30 = vpack.c.bf16 %v1060_v21, %v1060_v21  ;;  %v1339_v6 = vshll.u32 %v7703_v25, 16 }
 0x150   : > { %v8764_v62 = vpop.eup %8763  ;;  %v1065_v44 = vmul.f32 %v8760_v20, %v9431_v58  ;;  %v1063_v59 = vmul.f32 %v8762_v60, %v9435_v14  ;;  %v1931_v35 = vsel %vm9232_vm3, %v9605_v19, %v9588_v4  ;;  %v1605_v4 = vld [vmem:[#allocation2 + $0xc0] sm:$0xf] }
 0x151   : > { %v8766_v37 = vpop.eup %8765  ;;  %v1316_v57 = vor.u32 %v1314_v22, %v1313_v61  ;;  %v1317_v1 = vrot.slane %v1313_v61, 4  ;;  %v1338_v26 = vrot.slane %v1336_v34, 7  ;;  %v1319_v41 = vshrl.u32 %v7701_v30, 16  ;;  %8156 = vmatpush3.bf16.msra.mxu0 %v8570_v13  ;;  %v1560_v61 = vld [vmem:[#allocation2 + $0x74] sm:$0x1] }
 0x152   : > { %v8768_v63 = vpop.eup %8767  ;;  %v1322_v48 = vshll.u32 %v7701_v30, 16  ;;  %v7706_v56 = vpack.c.bf16 %v1065_v44, %v1065_v44  ;;  %v7704_v12 = vpack.c.bf16 %v1063_v59, %v1063_v59  ;;  %v1066_v25 = vmul.f32 %v8764_v62, %v9445_v55  ;;  %8237 = vmatprep.subr.bf16.mxu0 %v8585_v38 }
 0x153   : > { %v8770_v58 = vpop.eup %8769  ;;  %v1557_v14 = vsel %vm9344_vm9, %v1316_v57, %v1556_v42  ;;  %v1341_v21 = vor.u32 %v1339_v6, %v1338_v26  ;;  %v1343_v20 = vrot.slane %v1338_v26, 4  ;;  %v1321_v60 = vrot.slane %v1319_v41, 7 }
 0x154   : > { %v8772_v22 = vpop.eup %8771  ;;  %1558 = vst [vmem:[#allocation2 + $0x6c] sm:$0xf] %v1557_v14  ;;  %v1362_v34 = vshrl.u32 %v7706_v56, 16  ;;  %v1365_v49 = vshll.u32 %v7706_v56, 16  ;;  %v1345_v7 = vshrl.u32 %v7704_v12, 16  ;;  %v1348_v30 = vshll.u32 %v7704_v12, 16 }
 0x155   : > { %v8774_v44 = vpop.eup %8773  ;;  %v1342_v55 = vsel %vm9365_vm10, %v1334_v11, %v1341_v21  ;;  %v1568_v13 = vsel %vm9371_vm11, %v1343_v20, %v1567_v28  ;;  %v1324_v62 = vor.u32 %v1322_v48, %v1321_v60  ;;  %v1326_v42 = vrot.slane %v1321_v60, 4  ;;  %v1577_v28 = vld [vmem:[#allocation2 + $0x90] sm:$0xf]  ;;  %v1570_v48 = vld [vmem:[#allocation2 + $0x84] sm:$0xf] }
 0x156   : > { %v9629_v6 = vpop.eup %8775  ;;  %1566 = vst [vmem:[#allocation2 + $0x7c] sm:$0xf] %v1342_v55  ;;  %1569 = vst [vmem:[#allocation2 + $0x80] sm:$0x1] %v1568_v13  ;;  %v1364_v38 = vrot.slane %v1362_v34, 7  ;;  %v1347_v59 = vrot.slane %v1345_v7, 7  ;;  %v7707_v57 = vpack.c.bf16 %v1066_v25, %v1066_v25  ;;  %v1064_v26 = vmul.f32 %v8766_v37, %v9454_v27 }
 0x157   : > { %v9632_v41 = vpop.eup %8777  ;;  %v1325_v24 = vsel %vm9365_vm10, %v1317_v1, %v1324_v62  ;;  %v1561_v11 = vsel %vm9371_vm11, %v1326_v42, %v1560_v61  ;;  %v1069_v56 = vmul.f32 %v8768_v63, %v9460_v32  ;;  %v1067_v12 = vmul.f32 %v8770_v58, %v9464_v33  ;;  %v1581_v58 = vld [vmem:[#allocation2 + $0x98] sm:$0x1] }
 0x158   : > { %1559 = vst [vmem:[#allocation2 + $0x70] sm:$0xf] %v1325_v24  ;;  %1562 = vst [vmem:[#allocation2 + $0x74] sm:$0x1] %v1561_v11  ;;  %v1367_v7 = vor.u32 %v1365_v49, %v1364_v38  ;;  %v1368_v25 = vrot.slane %v1364_v38, 4  ;;  %v1350_v14 = vor.u32 %v1348_v30, %v1347_v59  ;;  %v1351_v27 = vrot.slane %v1347_v59, 4  ;;  %v8780_v37 = vpop.eup %8779 }
 0x159   : > { %v1370_v21 = vshrl.u32 %v7707_v57, 16  ;;  %v1373_v20 = vshll.u32 %v7707_v57, 16  ;;  %v7705_v60 = vpack.c.bf16 %v1064_v26, %v1064_v26  ;;  %v7710_v1 = vpack.c.bf16 %v1069_v56, %v1069_v56  ;;  %v8782_v34 = vpop.eup %8781 }
 0x15a   : > { %v1578_v61 = vsel %vm9344_vm9, %v1367_v7, %v1577_v28  ;;  %v1571_v32 = vsel %vm9344_vm9, %v1350_v14, %v1570_v48  ;;  %v7708_v63 = vpack.c.bf16 %v1067_v12, %v1067_v12  ;;  %v1070_v33 = vmul.f32 %v8772_v22, %v9471_v36  ;;  %v1574_v28 = vld [vmem:[#allocation2 + $0x8c] sm:$0x1] }
 0x15b   : > { %1579 = vst [vmem:[#allocation2 + $0x90] sm:$0xf] %v1578_v61  ;;  %1572 = vst [vmem:[#allocation2 + $0x84] sm:$0xf] %v1571_v32  ;;  %v1372_v49 = vrot.slane %v1370_v21, 7  ;;  %v1353_v30 = vshrl.u32 %v7705_v60, 16  ;;  %v1068_v22 = vmul.f32 %v8774_v44, %v9476_v47 }
 0x15c   : > { %v1356_v55 = vshll.u32 %v7705_v60, 16  ;;  %v1396_v13 = vshrl.u32 %v7710_v1, 16  ;;  %v1399_v62 = vshll.u32 %v7710_v1, 16  ;;  %v1379_v42 = vshrl.u32 %v7708_v63, 16  ;;  %v1591_v60 = vld [vmem:[#allocation2 + $0xa8] sm:$0xf] }
 0x15d   : > { %v1382_v38 = vshll.u32 %v7708_v63, 16  ;;  %v7711_v59 = vpack.c.bf16 %v1070_v33, %v1070_v33  ;;  %v1375_v57 = vor.u32 %v1373_v20, %v1372_v49  ;;  %v1377_v26 = vrot.slane %v1372_v49, 4  ;;  %v1584_v20 = vld [vmem:[#allocation2 + $0x9c] sm:$0xf] }
 0x15e   : > { %v1355_v24 = vrot.slane %v1353_v30, 7  ;;  %v1398_v11 = vrot.slane %v1396_v13, 7  ;;  %v9645_v48 = vrot.slane %v1379_v42, 7  ;;  %v7709_v33 = vpack.c.bf16 %v1068_v22, %v1068_v22  ;;  %v1595_v30 = vld [vmem:[#allocation2 + $0xb0] sm:$0x1] }
 0x15f   : > { %v1404_v56 = vshrl.u32 %v7711_v59, 16  ;;  %v1407_v36 = vshll.u32 %v7711_v59, 16  ;;  %v1376_v12 = vsel %vm9365_vm10, %v1368_v25, %v1375_v57  ;;  %v1582_v7 = vsel %vm9371_vm11, %v1377_v26, %v1581_v58 }
 0x160   : > { %v1358_v14 = vor.u32 %v1356_v55, %v1355_v24  ;;  %v1360_v21 = vrot.slane %v1355_v24, 4  ;;  %1580 = vst [vmem:[#allocation2 + $0x94] sm:$0xf] %v1376_v12  ;;  %1583 = vst [vmem:[#allocation2 + $0x98] sm:$0x1] %v1582_v7  ;;  %v1401_v1 = vor.u32 %v1399_v62, %v1398_v11  ;;  %v1402_v61 = vrot.slane %v1398_v11, 4 }
 0x161   : > { %v1384_v32 = vor.u32 %v1382_v38, %v9645_v48  ;;  %v1385_v63 = vrot.slane %v9645_v48, 4  ;;  %v1406_v25 = vrot.slane %v1404_v56, 7  ;;  %v1073_v55 = vmul.f32 %v9629_v6, %v9481_v52  ;;  %v9666_v11 = vld [vmem:[#allocation2 + $0x34] sm:$0xf] }
 0x162   : > { %v1359_v47 = vsel %vm9365_vm10, %v1351_v27, %v1358_v14  ;;  %v1575_v44 = vsel %vm9371_vm11, %v1360_v21, %v1574_v28  ;;  %v1592_v49 = vsel %vm9344_vm9, %v1401_v1, %v1591_v60  ;;  %v1071_v27 = vmul.f32 %v9632_v41, %v9488_v16  ;;  %v8546_v41 = vld [vmem:[%s12096_s5 + $0xb0] sm:$0xff]   ;;  %v1827_v14 = vld [vmem:[#allocation2 + $0x3c] sm:$0xf] }
 0x163   : > { %1573 = vst [vmem:[#allocation2 + $0x88] sm:$0xf] %v1359_v47  ;;  %1576 = vst [vmem:[#allocation2 + $0x8c] sm:$0x1] %v1575_v44  ;;  %v1585_v58 = vsel %vm9344_vm9, %v1384_v32, %v1584_v20  ;;  %v1409_v13 = vor.u32 %v1407_v36, %v1406_v25  ;;  %v1411_v62 = vrot.slane %v1406_v25, 4  ;;  %v1387_v42 = vshrl.u32 %v7709_v33, 16 }
 0x164   : > { %1593 = vst [vmem:[#allocation2 + $0xa8] sm:$0xf] %v1592_v49  ;;  %1586 = vst [vmem:[#allocation2 + $0x9c] sm:$0xf] %v1585_v58  ;;  %v1390_v38 = vshll.u32 %v7709_v33, 16  ;;  %v7714_v59 = vpack.c.bf16 %v1073_v55, %v1073_v55  ;;  %v7712_v57 = vpack.c.bf16 %v1071_v27, %v1071_v27  ;;  %v978_v26 = vadd.f32 1.0, %v8780_v37 }
 0x165   : > { %v976_v24 = vadd.f32 1.0, %v8782_v34  ;;  %v1410_v28 = vsel %vm9365_vm10, %v1402_v61, %v1409_v13  ;;  %v1596_v52 = vsel %vm9371_vm11, %v1411_v62, %v1595_v30  ;;  %v1389_v6 = vrot.slane %v1387_v42, 7  ;;  %v1588_v37 = vld [vmem:[#allocation2 + $0xa4] sm:$0x1]  ;;  %v1598_v60 = vld [vmem:[#allocation2 + $0xb4] sm:$0xf] }
 0x166   : > { %v7267_v16 = vcombine.low %v1921_v50, %v1931_v35  ;;  %1594 = vst [vmem:[#allocation2 + $0xac] sm:$0xf] %v1410_v28  ;;  %1597 = vst [vmem:[#allocation2 + $0xb0] sm:$0x1] %v1596_v52  ;;  %v1430_v34 = vshrl.u32 %v7714_v59, 16  ;;  %v1433_v48 = vshll.u32 %v7714_v59, 16  ;;  %8783 = vrcp.f32 %v978_v26 }
 0x167   : > { %v1413_v56 = vshrl.u32 %v7712_v57, 16  ;;  %v1416_v36 = vshll.u32 %v7712_v57, 16  ;;  %v1392_v22 = vor.u32 %v1390_v38, %v1389_v6  ;;  %v1394_v12 = vrot.slane %v1389_v6, 4  ;;  %v8915_v35 = vld [vmem:[%s12096_s5 + $0xb8] sm:$0xff]   ;;  %v8549_v61 = vld [vmem:[%s12096_s5 + $0xa8] sm:$0xff]  }
 0x168   : > { %8014 = vmatmul.mubr.bf16.vlgmr.msra.gmra.mxu1 %v7267_v16  ;;  %v7294_v45 = vcombine.low %v9579_v10, %v9666_v11  ;;  %v9689_v50 = vrot.slane %v1430_v34, 7  ;;  %8785 = vrcp.f32 %v976_v24  ;;  %v1939_v7 = vor.u32 %v9552_v15, %v9524_v29  ;;  %v9712_v47 = vld [vmem:[#allocation2 + $0x40] sm:$0xf]  ;;  %v9714_v44 = vld [vmem:[#allocation2 + $0x2c] sm:$0x1] }
 0x169   : > { %v9691_v19 = vrot.slane %v1413_v56, 7  ;;  %8094 = vmatpush3.bf16.msra.mxu1 %v8915_v35  ;;  %v1393_v21 = vsel %vm9365_vm10, %v1385_v63, %v1392_v22  ;;  %v1589_v10 = vsel %vm9371_vm11, %v1394_v12, %v1588_v37  ;;  %v1942_v20 = vshll.u32 %v9549_v31, 16  ;;  %v1829_v27 = vld [vmem:[#allocation2 + $0x48] sm:$0xf]  ;;  %v9725_v59 = vld [vmem:[#allocation2 + $0x4c] sm:$0xf] }
 0x16a   : > { %8069 = vmatprep.mubr.bf16.mxu0 %v7294_v45  ;;  %v1948_v1 = vrot.slane %v1946_v0, 4  ;;  %8095 = vmatprep.subr.bf16.mxu1 %v8546_v41  ;;  %1587 = vst [vmem:[#allocation2 + $0xa0] sm:$0xf] %v1393_v21  ;;  %1590 = vst [vmem:[#allocation2 + $0xa4] sm:$0x1] %v1589_v10  ;;  %v1435_v29 = vor.u32 %v1433_v48, %v9689_v50  ;;  %v1436_v15 = vrot.slane %v9689_v50, 4 }
 0x16b   : > { %v1418_v32 = vor.u32 %v1416_v36, %v9691_v19  ;;  %v1994_v63 = vshrl.u32 %v9666_v11, 16  ;;  %v1940_v31 = vrot.slane %v1939_v7, 4  ;;  %v1944_v0 = vrot.slane %v1942_v20, 5  ;;  %v9741_v36 = vld [vmem:[#allocation2 + $0x38] sm:$0x1] }
 0x16c   : > { %v1952_v25 = vshll.u32 %v9687_v8, 16  ;;  %v2005_v33 = vshrl.u32 %v1827_v14, 16  ;;  %v1606_v49 = vsel %vm9344_vm9, %v1435_v29, %v1605_v4  ;;  %v1419_v58 = vrot.slane %v9691_v19, 4  ;;  %v8557_v12 = vld [vmem:[%s12096_s5 + $0x98] sm:$0xff]  }
 0x16d   : > { %v1599_v30 = vsel %vm9344_vm9, %v1418_v32, %v1598_v60  ;;  %v2008_v55 = vshll.u32 %v1827_v14, 16  ;;  %8096 = vmatpush3.bf16.msra.mxu1 %v8546_v41  ;;  %1607 = vst [vmem:[#allocation2 + $0xc0] sm:$0xf] %v1606_v49  ;;  %v1945_v13 = vsel %vm9232_vm3, %v1940_v31, %v1944_v0  ;;  %v1949_v62 = vor.u32 %v1948_v1, %v1944_v0 }
 0x16e   : > { %1600 = vst [vmem:[#allocation2 + $0xb4] sm:$0xf] %v1599_v30  ;;  %v1954_v42 = vrot.slane %v1952_v25, 5  ;;  %v2018_v38 = vshrl.u32 %v9712_v47, 16  ;;  %8097 = vmatprep.subr.bf16.mxu1 %v8549_v61  ;;  %v9730_v57 = vrot.slane %v2005_v33, 4  ;;  %v7295_v26 = vcombine.low %v1827_v14, %v9712_v47 }
 0x16f   : > { %v1963_v24 = vor.u32 %v9582_v43, %v9569_v39  ;;  %v1966_v28 = vshll.u32 %v9554_v2, 16  ;;  %v1950_v52 = vrot.slane %v1949_v62, 4  ;;  %v1972_v6 = vrot.slane %v1970_v23, 4  ;;  %v1831_v23 = vld [vmem:[#allocation2 + $0x54] sm:$0xf] }
 0x170   : > { %v1976_v16 = vshll.u32 %v9714_v44, 16  ;;  %v2029_v41 = vshrl.u32 %v1829_v27, 16  ;;  %v9739_v37 = vrot.slane %v2008_v55, 5  ;;  %8070 = vmatmul.mubr.bf16.gmra.mxu0 %v7295_v26  ;;  %v2032_v56 = vshll.u32 %v1829_v27, 16  ;;  %v9754_v14 = vld [vmem:[#allocation2 + $0x58] sm:$0xf] }
 0x171   : > { %v1964_v34 = vrot.slane %v1963_v24, 4  ;;  %v1968_v48 = vrot.slane %v1966_v28, 5  ;;  %8098 = vmatpush3.bf16.msra.mxu1 %v8549_v61  ;;  %v1955_v39 = vsel %vm9232_vm3, %v1950_v52, %v1954_v42  ;;  %v2042_v22 = vshrl.u32 %v9725_v59, 16  ;;  %v9775_v24 = vld [vmem:[#allocation2 + $0x44] sm:$0x1] }
 0x172   : > { %v1978_v43 = vrot.slane %v1976_v16, 5  ;;  %v7296_v2 = vcombine.low %v1829_v27, %v9725_v59  ;;  %8099 = vmatprep.subr.bf16.mxu1 %v8552_v3  ;;  %v7268_v4 = vcombine.low %v1945_v13, %v1955_v39  ;;  %v9752_v7 = vrot.slane %v2029_v41, 4  ;;  %v1833_v52 = vld [vmem:[#allocation2 + $0x60] sm:$0xf] }
 0x173   : > { %v1969_v45 = vsel %vm9232_vm3, %v1964_v34, %v1968_v48  ;;  %v1973_v35 = vor.u32 %v1972_v6, %v1968_v48  ;;  %v1987_v21 = vor.u32 %v9609_v40, %v9607_v53  ;;  %v1990_v10 = vshll.u32 %v9666_v11, 16  ;;  %v8784_v1 = vpop.eup %8783  ;;  %v8562_v40 = vld [vmem:[%s12096_s5 + $0x90] sm:$0xff]   ;;  %v8567_v48 = vld [vmem:[%s12096_s5 + $0x88] sm:$0xff]  }
 0x174   : > { %8073 = vmatprep.mubr.bf16.mxu0 %v7296_v2  ;;  %v1996_v60 = vrot.slane %v1994_v63, 4  ;;  %v2000_v20 = vshll.u32 %v9741_v36, 16  ;;  %8017 = vmatprep.mubr.bf16.mxu1 %v7268_v4  ;;  %v9760_v29 = vrot.slane %v2032_v56, 5  ;;  %v2053_v32 = vshrl.u32 %v1831_v23, 16  ;;  %v1609_v4 = vld [vmem:[#allocation2 + $0xc8] sm:$0x1] }
 0x175   : > { %v1974_v61 = vrot.slane %v1973_v35, 4  ;;  %v2056_v31 = vshll.u32 %v1831_v23, 16  ;;  %8100 = vmatpush3.bf16.msra.mxu1 %v8552_v3  ;;  %v8786_v0 = vpop.eup %8785  ;;  %v1074_v25 = vmul.f32 %v8784_v1, %v9491_v51  ;;  %v1988_v33 = vrot.slane %v1987_v21, 4  ;;  %v1602_v1 = vld [vmem:[#allocation2 + $0xbc] sm:$0x1] }
 0x176   : > { %v1992_v49 = vrot.slane %v1990_v10, 5  ;;  %v2066_v53 = vshrl.u32 %v9754_v14, 16  ;;  %8101 = vmatprep.subr.bf16.mxu1 %v8557_v12  ;;  %v1072_v63 = vmul.f32 %v8786_v0, %v9503_v5  ;;  %v2002_v55 = vrot.slane %v2000_v20, 5  ;;  %v9790_v10 = vld [vmem:[#allocation2 + $0x64] sm:$0xf] }
 0x177   : > { %v1979_v30 = vsel %vm9232_vm3, %v1974_v61, %v1978_v43  ;;  %v9770_v27 = vrot.slane %v2053_v32, 4  ;;  %v7715_v13 = vpack.c.bf16 %v1074_v25, %v1074_v25  ;;  %v9772_v42 = vrot.slane %v2056_v31, 5  ;;  %v8571_v31 = vld [vmem:[%s12096_s5 + $0x80] sm:$0xff]  }
 0x178   : > { %v7269_v62 = vcombine.low %v1969_v45, %v1979_v30  ;;  %v1997_v51 = vor.u32 %v1996_v60, %v1992_v49  ;;  %v7713_v3 = vpack.c.bf16 %v1072_v63, %v1072_v63  ;;  %v7297_v26 = vcombine.low %v1831_v23, %v9754_v14 }
 0x179   : > { %v2011_v28 = vor.u32 %v9739_v37, %v9730_v57  ;;  %v2014_v5 = vshll.u32 %v9712_v47, 16  ;;  %8102 = vmatpush3.bf16.msra.mxu1 %v8557_v12  ;;  %v1438_v6 = vshrl.u32 %v7715_v13, 16  ;;  %v1993_v16 = vsel %vm9232_vm3, %v1988_v33, %v1992_v49 }
 0x17a   : > { %8018 = vmatmul.mubr.bf16.gmra.mxu1 %v7269_v62  ;;  %v1998_v41 = vrot.slane %v1997_v51, 4  ;;  %v2020_v34 = vrot.slane %v2018_v38, 4  ;;  %8103 = vmatprep.subr.bf16.mxu1 %v8562_v40  ;;  %v1441_v56 = vshll.u32 %v7715_v13, 16  ;;  %v1421_v57 = vshrl.u32 %v7713_v3, 16  ;;  %v9804_v13 = vld [vmem:[#allocation2 + $0x50] sm:$0x1] }
 0x17b   : > { %8074 = vmatmul.mubr.bf16.gmra.mxu0 %v7297_v26  ;;  %v2012_v37 = vrot.slane %v2011_v28, 4  ;;  %v2016_v39 = vrot.slane %v2014_v5, 5  ;;  %v1440_v43 = vrot.slane %v1438_v6, 7  ;;  %v2024_v23 = vshll.u32 %v9775_v24, 16  ;;  %v1835_v62 = vld [vmem:[#allocation2 + $0x6c] sm:$0xf] }
 0x17c   : > { %v2003_v2 = vsel %vm9232_vm3, %v1998_v41, %v2002_v55  ;;  %v2077_v12 = vshrl.u32 %v1833_v52, 16  ;;  %v1423_v45 = vrot.slane %v1421_v57, 7  ;;  %v1424_v38 = vshll.u32 %v7713_v3, 16  ;;  %v9815_v26 = vld [vmem:[#allocation2 + $0x70] sm:$0xf] }
 0x17d   : > { %v7270_v35 = vcombine.low %v1993_v16, %v2003_v2  ;;  %v2021_v21 = vor.u32 %v2020_v34, %v2016_v39  ;;  %8104 = vmatpush3.bf16.msra.mxu1 %v8562_v40  ;;  %v1443_v60 = vor.u32 %v1441_v56, %v1440_v43  ;;  %v1445_v20 = vrot.slane %v1440_v43, 4  ;;  %v9835_v43 = vld [vmem:[#allocation2 + $0x7c] sm:$0xf] }
 0x17e   : > { %v2017_v61 = vsel %vm9232_vm3, %v2012_v37, %v2016_v39  ;;  %v2026_v32 = vrot.slane %v2024_v23, 5  ;;  %8105 = vmatprep.subr.bf16.mxu1 %v8567_v48  ;;  %v1426_v0 = vor.u32 %v1424_v38, %v1423_v45  ;;  %v1428_v25 = vrot.slane %v1423_v45, 4 }
 0x17f   : > { %8021 = vmatprep.mubr.bf16.mxu1 %v7270_v35  ;;  %v2022_v33 = vrot.slane %v2021_v21, 4  ;;  %v2080_v49 = vshll.u32 %v1833_v52, 16  ;;  %v1444_v40 = vsel %vm9365_vm10, %v1436_v15, %v1443_v60  ;;  %v1610_v63 = vsel %vm9371_vm11, %v1445_v20, %v1609_v4  ;;  %v9844_v20 = vld [vmem:[#allocation2 + $0x68] sm:$0x1] }
 0x180   : > { %v2079_v30 = vrot.slane %v2077_v12, 4  ;;  %v7298_v55 = vcombine.low %v1833_v52, %v9790_v10  ;;  %1608 = vst [vmem:[#allocation2 + $0xc4] sm:$0xf] %v1444_v40  ;;  %1611 = vst [vmem:[#allocation2 + $0xc8] sm:$0x1] %v1610_v63  ;;  %v1427_v51 = vsel %vm9365_vm10, %v1419_v58, %v1426_v0  ;;  %v1603_v50 = vsel %vm9371_vm11, %v1428_v25, %v1602_v1  ;;  %v9825_v58 = vld [vmem:[%s12096_s5 + $0x138] sm:$0xff]  }
 0x181   : > { %v2027_v15 = vsel %vm9232_vm3, %v2022_v33, %v2026_v32  ;;  %v2090_v3 = vshrl.u32 %v9790_v10, 16  ;;  %8106 = vmatpush3.bf16.msra.mxu1 %v8567_v48  ;;  %1601 = vst [vmem:[#allocation2 + $0xb8] sm:$0xf] %v1427_v51  ;;  %1604 = vst [vmem:[#allocation2 + $0xbc] sm:$0x1] %v1603_v50  ;;  %v2035_v19 = vor.u32 %v9760_v29, %v9752_v7  ;;  %v2038_v17 = vshll.u32 %v9725_v59, 16 }
 0x182   : > { %v7271_v28 = vcombine.low %v2017_v61, %v2027_v15  ;;  %8077 = vmatprep.mubr.bf16.mxu0 %v7298_v55  ;;  %v2044_v9 = vrot.slane %v2042_v22, 4  ;;  %8107 = vmatprep.subr.bf16.mxu1 %v8571_v31  ;;  %v2082_v5 = vrot.slane %v2080_v49, 5  ;;  %v2048_v52 = vshll.u32 %v9804_v13, 16  ;;  %v9829_v29 = vld [vmem:[#allocation2 + $0x5c] sm:$0x1] }
 0x183   : > { %v2101_v6 = vshrl.u32 %v1835_v62, 16  ;;  %v2104_v16 = vshll.u32 %v1835_v62, 16  ;;  %v2036_v41 = vrot.slane %v2035_v19, 4  ;;  %v2040_v34 = vrot.slane %v2038_v17, 5  ;;  %v1837_v48 = vld [vmem:[#allocation2 + $0x78] sm:$0xf] }
 0x184   : > { %8022 = vmatmul.mubr.bf16.gmra.mxu1 %v7271_v28  ;;  %v7299_v7 = vcombine.low %v1835_v62, %v9815_v26  ;;  %v2059_v22 = vor.u32 %v9772_v42, %v9770_v27  ;;  %v2050_v56 = vrot.slane %v2048_v52, 5  ;;  %v2114_v37 = vshrl.u32 %v9815_v26, 16  ;;  %v1839_v0 = vld [vmem:[#allocation2 + $0x84] sm:$0xf]  ;;  %v9849_v25 = vld [vmem:[#allocation2 + $0x88] sm:$0xf] }
 0x185   : > { %v2103_v57 = vrot.slane %v2101_v6, 4  ;;  %v2062_v39 = vshll.u32 %v9754_v14, 16  ;;  %8108 = vmatpush3.bf16.msra.mxu1 %v8571_v31  ;;  %v2045_v2 = vor.u32 %v2044_v9, %v2040_v34  ;;  %v2106_v23 = vrot.slane %v2104_v16, 5  ;;  %v9859_v52 = vld [vmem:[#allocation2 + $0x74] sm:$0x1] }
 0x186   : > { %8078 = vmatmul.mubr.bf16.gmra.mxu0 %v7299_v7  ;;  %v2060_v12 = vrot.slane %v2059_v22, 4  ;;  %v2068_v4 = vrot.slane %v2066_v53, 4  ;;  %8189 = vmatprep.subr.bf16.mxu1 %v9825_v58  ;;  %v2041_v27 = vsel %vm9232_vm3, %v2036_v41, %v2040_v34  ;;  %v2072_v45 = vshll.u32 %v9829_v29, 16  ;;  %v1841_v16 = vld [vmem:[#allocation2 + $0x90] sm:$0xf] }
 0x187   : > { %v2064_v42 = vrot.slane %v2062_v39, 5  ;;  %v2125_v38 = vshrl.u32 %v1837_v48, 16  ;;  %v2046_v35 = vrot.slane %v2045_v2, 4  ;;  %v2128_v21 = vshll.u32 %v1837_v48, 16  ;;  %v9863_v22 = vld [vmem:[#allocation2 + $0x94] sm:$0xf] }
 0x188   : > { %v7300_v60 = vcombine.low %v1837_v48, %v9835_v43  ;;  %v2083_v1 = vor.u32 %v2082_v5, %v2079_v30  ;;  %v2074_v32 = vrot.slane %v2072_v45, 5  ;;  %v2138_v31 = vshrl.u32 %v9835_v43, 16 }
 0x189   : > { %v2065_v61 = vsel %vm9232_vm3, %v2060_v12, %v2064_v42  ;;  %v2069_v53 = vor.u32 %v2068_v4, %v2064_v42  ;;  %v2051_v33 = vsel %vm9232_vm3, %v2046_v35, %v2050_v56  ;;  %v2127_v49 = vrot.slane %v2125_v38, 4  ;;  %v9868_v38 = vld [vmem:[#allocation2 + $0x80] sm:$0x1] }
 0x18a   : > { %8081 = vmatprep.mubr.bf16.mxu0 %v7300_v60  ;;  %v2084_v40 = vrot.slane %v2083_v1, 4  ;;  %v2086_v63 = vshll.u32 %v9790_v10, 16  ;;  %v7272_v55 = vcombine.low %v2041_v27, %v2051_v33  ;;  %v2092_v62 = vrot.slane %v2090_v3, 4 }
 0x18b   : > { %v2070_v30 = vrot.slane %v2069_v53, 4  ;;  %v2096_v51 = vshll.u32 %v9844_v20, 16  ;;  %v2130_v50 = vrot.slane %v2128_v21, 5  ;;  %v2149_v28 = vshrl.u32 %v1839_v0, 16  ;;  %v1843_v21 = vld [vmem:[#allocation2 + $0x9c] sm:$0xf] }
 0x18c   : > { %v2088_v15 = vrot.slane %v2086_v63, 5  ;;  %v2152_v19 = vshll.u32 %v1839_v0, 16  ;;  %8025 = vmatprep.mubr.bf16.mxu1 %v7272_v55  ;;  %v2162_v9 = vshrl.u32 %v9849_v25, 16  ;;  %v7301_v5 = vcombine.low %v1839_v0, %v9849_v25  ;;  %v9873_v53 = vld [vmem:[#allocation2 + $0xa0] sm:$0xf] }
 0x18d   : > { %v2075_v17 = vsel %vm9232_vm3, %v2070_v30, %v2074_v32  ;;  %v2107_v6 = vor.u32 %v2106_v23, %v2103_v57  ;;  %v2098_v7 = vrot.slane %v2096_v51, 5  ;;  %v2151_v48 = vrot.slane %v2149_v28, 4  ;;  %v9880_v28 = vld [vmem:[#allocation2 + $0x8c] sm:$0x1] }
 0x18e   : > { %v7273_v41 = vcombine.low %v2065_v61, %v2075_v17  ;;  %v2089_v3 = vsel %vm9232_vm3, %v2084_v40, %v2088_v15  ;;  %v2093_v34 = vor.u32 %v2092_v62, %v2088_v15  ;;  %8082 = vmatmul.mubr.bf16.gmra.mxu0 %v7301_v5  ;;  %v2110_v39 = vshll.u32 %v9815_v26, 16 }
 0x18f   : > { %v2108_v56 = vrot.slane %v2107_v6, 4  ;;  %v2116_v2 = vrot.slane %v2114_v37, 4  ;;  %v2120_v4 = vshll.u32 %v9859_v52, 16  ;;  %v2173_v57 = vshrl.u32 %v1841_v16, 16 }
 0x190   : > { %8026 = vmatmul.mubr.bf16.gmra.mxu1 %v7273_v41  ;;  %v2094_v12 = vrot.slane %v2093_v34, 4  ;;  %v2176_v23 = vshll.u32 %v1841_v16, 16  ;;  %v2154_v27 = vrot.slane %v2152_v19, 5  ;;  %v2112_v42 = vrot.slane %v2110_v39, 5 }
 0x191   : > { %v7302_v45 = vcombine.low %v1841_v16, %v9863_v22  ;;  %v2131_v35 = vor.u32 %v2130_v50, %v2127_v49  ;;  %v2122_v1 = vrot.slane %v2120_v4, 5  ;;  %v2175_v61 = vrot.slane %v2173_v57, 4  ;;  %v1845_v16 = vld [vmem:[#allocation2 + $0xa8] sm:$0xf]  ;;  %v9888_v4 = vld [vmem:[#allocation2 + $0x98] sm:$0x1] }
 0x192   : > { %v2099_v60 = vsel %vm9232_vm3, %v2094_v12, %v2098_v7  ;;  %v2186_v37 = vshrl.u32 %v9863_v22, 16  ;;  %v2113_v0 = vsel %vm9232_vm3, %v2108_v56, %v2112_v42  ;;  %v2117_v33 = vor.u32 %v2116_v2, %v2112_v42  ;;  %v9886_v7 = vld [vmem:[#allocation2 + $0xac] sm:$0xf] }
 0x193   : > { %v7274_v32 = vcombine.low %v2089_v3, %v2099_v60  ;;  %v2178_v40 = vrot.slane %v2176_v23, 5  ;;  %8085 = vmatprep.mubr.bf16.mxu0 %v7302_v45  ;;  %v2134_v63 = vshll.u32 %v9835_v43, 16  ;;  %v2140_v49 = vrot.slane %v2138_v31, 4 }
 0x194   : > { %v2144_v55 = vshll.u32 %v9868_v38, 16  ;;  %v2197_v30 = vshrl.u32 %v1843_v21, 16  ;;  %v2118_v62 = vrot.slane %v2117_v33, 4  ;;  %v2132_v51 = vrot.slane %v2131_v35, 4 }
 0x195   : > { %8029 = vmatprep.mubr.bf16.mxu1 %v7274_v32  ;;  %v2200_v50 = vshll.u32 %v1843_v21, 16  ;;  %v7303_v15 = vcombine.low %v1843_v21, %v9873_v53  ;;  %v2136_v19 = vrot.slane %v2134_v63, 5  ;;  %v2210_v5 = vshrl.u32 %v9873_v53, 16  ;;  %v1847_v21 = vld [vmem:[#allocation2 + $0xb4] sm:$0xf] }
 0x196   : > { %v2146_v17 = vrot.slane %v2144_v55, 5  ;;  %v2155_v6 = vor.u32 %v2154_v27, %v2151_v48  ;;  %v2123_v31 = vsel %vm9232_vm3, %v2118_v62, %v2122_v1  ;;  %v2199_v41 = vrot.slane %v2197_v30, 4  ;;  %v9900_v30 = vld [vmem:[#allocation2 + $0xb8] sm:$0xf] }
 0x197   : > { %8086 = vmatmul.mubr.bf16.gmra.mxu0 %v7303_v15  ;;  %v2158_v3 = vshll.u32 %v9849_v25, 16  ;;  %v2164_v34 = vrot.slane %v2162_v9, 4  ;;  %v7275_v56 = vcombine.low %v2113_v0, %v2123_v31  ;;  %v2141_v39 = vor.u32 %v2140_v49, %v2136_v19 }
 0x198   : > { %v2202_v2 = vrot.slane %v2200_v50, 5  ;;  %v2156_v12 = vrot.slane %v2155_v6, 4  ;;  %v2168_v48 = vshll.u32 %v9880_v28, 16  ;;  %v2221_v23 = vshrl.u32 %v1845_v16, 16 }
 0x199   : > { %v2160_v57 = vrot.slane %v2158_v3, 5  ;;  %v2224_v27 = vshll.u32 %v1845_v16, 16  ;;  %8030 = vmatmul.mubr.bf16.gmra.mxu1 %v7275_v56  ;;  %v2137_v42 = vsel %vm9232_vm3, %v2132_v51, %v2136_v19  ;;  %v2142_v45 = vrot.slane %v2141_v39, 4  ;;  %v9907_v3 = vld [vmem:[#allocation2 + $0xa4] sm:$0x1] }
 0x19a   : > { %v7304_v9 = vcombine.low %v1845_v16, %v9886_v7  ;;  %v2179_v35 = vor.u32 %v2178_v40, %v2175_v61  ;;  %v2170_v32 = vrot.slane %v2168_v48, 5  ;;  %v2234_v0 = vshrl.u32 %v9886_v7, 16  ;;  %v9909_v48 = vld [vmem:[#allocation2 + $0xb0] sm:$0x1] }
 0x19b   : > { %v2161_v60 = vsel %vm9232_vm3, %v2156_v12, %v2160_v57  ;;  %v2165_v1 = vor.u32 %v2164_v34, %v2160_v57  ;;  %v2147_v33 = vsel %vm9232_vm3, %v2142_v45, %v2146_v17  ;;  %v2223_v63 = vrot.slane %v2221_v23, 4  ;;  %v8569_v57 = vld [vmem:[#allocation2 + $0xc] sm:$0xff]  }
 0x19c   : > { %v2226_v49 = vrot.slane %v2224_v27, 5  ;;  %8089 = vmatprep.mubr.bf16.mxu0 %v7304_v9  ;;  %v2182_v55 = vshll.u32 %v9863_v22, 16  ;;  %v7276_v62 = vcombine.low %v2137_v42, %v2147_v33  ;;  %v2188_v40 = vrot.slane %v2186_v37, 4  ;;  %v2863_v33 = vld [vmem:[#allocation2] sm:$0xe] }
 0x19d   : > { %v2166_v61 = vrot.slane %v2165_v1, 4  ;;  %v2192_v51 = vshll.u32 %v9888_v4, 16  ;;  %v2180_v50 = vrot.slane %v2179_v35, 4  ;;  %v2245_v19 = vshrl.u32 %v1847_v21, 16 }
 0x19e   : > { %v2184_v15 = vrot.slane %v2182_v55, 5  ;;  %v2248_v6 = vshll.u32 %v1847_v21, 16  ;;  %8033 = vmatprep.mubr.bf16.mxu1 %v7276_v62  ;;  %v2258_v16 = vshrl.u32 %v9900_v30, 16  ;;  %v7305_v31 = vcombine.low %v1847_v21, %v9900_v30 }
 0x19f   : > { %v2171_v17 = vsel %vm9232_vm3, %v2166_v61, %v2170_v32  ;;  %v2203_v34 = vor.u32 %v2202_v2, %v2199_v41  ;;  %v2194_v39 = vrot.slane %v2192_v51, 5  ;;  %v2247_v12 = vrot.slane %v2245_v19, 4  ;;  %v2864_v19 = vld [vmem:[#allocation2 + $0xc] sm:$0xe] }
 0x1a0   : > { %v7277_v37 = vcombine.low %v2161_v60, %v2171_v17  ;;  %v2189_v56 = vor.u32 %v2188_v40, %v2184_v15  ;;  %v2250_v23 = vrot.slane %v2248_v6, 5  ;;  %8090 = vmatmul.mubr.bf16.gmra.mxu0 %v7305_v31  ;;  %v2206_v42 = vshll.u32 %v9873_v53, 16  ;;  %v9919_v40 = vld [vmem:[#allocation2 + $0xbc] sm:$0x1] }
 0x1a1   : > { %v2204_v27 = vrot.slane %v2203_v34, 4  ;;  %v2212_v45 = vrot.slane %v2210_v5, 4  ;;  %v2216_v35 = vshll.u32 %v9907_v3, 16  ;;  %8157 = vmatprep.mubr.bf16.mxu0 %v8569_v57  ;;  %v2227_v41 = vor.u32 %v2226_v49, %v2223_v63  ;;  %v8572_v31 = vld [vmem:[#allocation2 + $0x18] sm:$0xff]  }
 0x1a2   : > { %8034 = vmatmul.mubr.bf16.gmra.mxu1 %v7277_v37  ;;  %v2190_v9 = vrot.slane %v2189_v56, 4  ;;  %v2230_v2 = vshll.u32 %v9886_v7, 16  ;;  %v2208_v21 = vrot.slane %v2206_v42, 5  ;;  %v2236_v60 = vrot.slane %v2234_v0, 4  ;;  %v8573_v42 = vld [vmem:[#allocation2 + $0x24] sm:$0xff]  }
 0x1a3   : > { %v2240_v1 = vshll.u32 %v9909_v48, 16  ;;  %v2251_v32 = vor.u32 %v2250_v23, %v2247_v12  ;;  %v2185_v55 = vsel %vm9232_vm3, %v2180_v50, %v2184_v15  ;;  %v2228_v62 = vrot.slane %v2227_v41, 4  ;;  %v2865_v12 = vld [vmem:[#allocation2 + $0x18] sm:$0xe] }
 0x1a4   : > { %v2195_v5 = vsel %vm9232_vm3, %v2190_v9, %v2194_v39  ;;  %v2232_v61 = vrot.slane %v2230_v2, 5  ;;  %v2209_v63 = vsel %vm9232_vm3, %v2204_v27, %v2208_v21  ;;  %v2213_v49 = vor.u32 %v2212_v45, %v2208_v21  ;;  %v8916_v45 = vld [vmem:[#allocation2 + $0x4] sm:$0xf]  ;;  %v8917_v21 = vld [vmem:[#allocation2 + $0x10] sm:$0xf] }
 0x1a5   : > { %v7278_v51 = vcombine.low %v2185_v55, %v2195_v5  ;;  %v2218_v0 = vrot.slane %v2216_v35, 5  ;;  %v2242_v17 = vrot.slane %v2240_v1, 5  ;;  %v2252_v34 = vrot.slane %v2251_v32, 4  ;;  %v8587_v35 = vld [vmem:[%s12096_s5 + $0x170] sm:$0xff]   ;;  %v2866_v1 = vld [vmem:[#allocation2 + $0x24] sm:$0xe] }
 0x1a6   : > { %v2237_v6 = vor.u32 %v2236_v60, %v2232_v61  ;;  %v2254_v50 = vshll.u32 %v9900_v30, 16  ;;  %v2214_v15 = vrot.slane %v2213_v49, 4  ;;  %v2260_v37 = vrot.slane %v2258_v16, 4 }
 0x1a7   : > { %8037 = vmatprep.mubr.bf16.mxu1 %v7278_v51  ;;  %v2264_v56 = vshll.u32 %v9919_v40, 16  ;;  %v7314_v39 = vrot.slane %v2863_v33, 9  ;;  %v2233_v57 = vsel %vm9232_vm3, %v2228_v62, %v2232_v61  ;;  %v2916_v9 = vrot.slane %v8916_v45, 5 }
 0x1a8   : > { %v2238_v23 = vrot.slane %v2237_v6, 4  ;;  %v2256_v27 = vrot.slane %v2254_v50, 5  ;;  %v2219_v41 = vsel %vm9232_vm3, %v2214_v15, %v2218_v0  ;;  %8158 = vmatmul.mubr.bf16.vlgmr.msra.gmra.mxu0 %v8572_v31  ;;  %v7315_v2 = vrot.slane %v2864_v19, 9  ;;  %v8918_v0 = vld [vmem:[%s12096_s5 + $0x178] sm:$0xff]  }
 0x1a9   : > { %v2266_v16 = vrot.slane %v2264_v56, 5  ;;  %v2923_v60 = vrot.slane %v8917_v21, 5  ;;  %v7279_v32 = vcombine.low %v2209_v63, %v2219_v41  ;;  %8161 = vmatprep.mubr.bf16.mxu0 %v8573_v42  ;;  %v7316_v62 = vrot.slane %v2865_v12, 9  ;;  %8238 = vmatpush3.bf16.msra.mxu0 %v8918_v0  ;;  %v8919_v31 = vld [vmem:[#allocation2 + $0x1c] sm:$0xf]  ;;  %v8574_v21 = vld [vmem:[#allocation2 + $0x30] sm:$0xff]  }
 0x1aa   : > { %v2243_v33 = vsel %vm9232_vm3, %v2238_v23, %v2242_v17  ;;  %v2261_v55 = vor.u32 %v2260_v37, %v2256_v27  ;;  %v2257_v51 = vsel %vm9232_vm3, %v2252_v34, %v2256_v27  ;;  %v2917_v49 = vsel %vm9936_vm14, %v7314_v39, %v2916_v9  ;;  %8239 = vmatprep.subr.bf16.mxu0 %v8587_v35  ;;  %v8590_v34 = vld [vmem:[%s12096_s5 + $0x168] sm:$0xff]   ;;  %v2867_v23 = vld [vmem:[#allocation2 + $0x30] sm:$0xe]  ;;  %v2868_v41 = vld [vmem:[#allocation2 + $0x3c] sm:$0xe] }
 0x1ab   : > { %v7280_v61 = vcombine.low %v2233_v57, %v2243_v33  ;;  %v2918_v63 = vrot.slane %v2916_v9, 4  ;;  %8038 = vmatmul.mubr.bf16.gmra.mxu1 %v7279_v32  ;;  %v9949_v6 = vsel %vm9936_vm14, %v7315_v2, %v2923_v60  ;;  %v2925_v17 = vrot.slane %v2923_v60, 4  ;;  %v8920_v12 = vld [vmem:[#allocation2 + $0x28] sm:$0xf] }
 0x1ac   : > { %v2262_v19 = vrot.slane %v2261_v55, 4  ;;  %v2930_v50 = vrot.slane %v8919_v31, 5  ;;  %v12125_v15 = vrot.slane %v9226_v46, 5  ;;  %v2933_v56 = vrot.slane %v9687_v8, 5  ;;  %v8592_v55 = vld [vmem:[%s12096_s5 + $0x160] sm:$0xff]  }
 0x1ad   : > { %8041 = vmatprep.mubr.bf16.mxu1 %v7280_v61  ;;  %v7317_v39 = vrot.slane %v2866_v1, 9  ;;  %v2937_v57 = vrot.slane %v8920_v12, 5  ;;  %v12126_v45 = vrot.slane %v9566_v18, 5  ;;  %v2940_v46 = vrot.slane %v9714_v44, 5  ;;  %8240 = vmatpush3.bf16.msra.mxu0 %v8587_v35  ;;  %v8576_v1 = vld [vmem:[#allocation2 + $0x3c] sm:$0xff]  }
 0x1ae   : > { %v2920_v37 = vsel %vm9936_vm14, %v2918_v63, %v12125_v15  ;;  %v2267_v27 = vsel %vm9232_vm3, %v2262_v19, %v2266_v16  ;;  %v9972_v60 = vsel %vm9936_vm14, %v7316_v62, %v2930_v50  ;;  %v2932_v16 = vrot.slane %v2930_v50, 4  ;;  %8241 = vmatprep.subr.bf16.mxu0 %v8590_v34  ;;  %v8595_v12 = vld [vmem:[%s12096_s5 + $0x158] sm:$0xff]  }
 0x1af   : > { %v7346_v42 = vcombine.low %v2917_v49, %v2920_v37  ;;  %v9965_v9 = vsel %vm9936_vm14, %v2925_v17, %v12126_v45  ;;  %v7281_v2 = vcombine.low %v2257_v51, %v2267_v27  ;;  %v9976_v18 = vsel %vm9936_vm14, %v7317_v39, %v2937_v57  ;;  %v2869_v49 = vld [vmem:[#allocation2 + $0x48] sm:$0xe]  ;;  %v2870_v17 = vld [vmem:[#allocation2 + $0x54] sm:$0xe]  ;;  %v2871_v39 = vld [vmem:[#allocation2 + $0x60] sm:$0xe] }
 0x1b0   : > { %v7347_v8 = vcombine.low %v9949_v6, %v9965_v9  ;;  %v2939_v32 = vrot.slane %v2937_v57, 4  ;;  %v7318_v33 = vrot.slane %v2867_v23, 9  ;;  %v2944_v44 = vrot.slane %v9666_v11, 5  ;;  %8162 = vmatmul.mubr.bf16.gmra.mxu0 %v8574_v21 }
 0x1b1   : > { %v9984_v62 = vsel %vm9936_vm14, %v2932_v16, %v2933_v56  ;;  %v2947_v35 = vrot.slane %v9741_v36, 5  ;;  %v7319_v61 = vrot.slane %v2868_v41, 9  ;;  %v2951_v51 = vrot.slane %v9712_v47, 5  ;;  %8165 = vmatprep.mubr.bf16.mxu0 %v8576_v1  ;;  %8242 = vmatpush3.bf16.msra.mxu0 %v8590_v34  ;;  %v8577_v41 = vld [vmem:[#allocation2 + $0x48] sm:$0xff]  }
 0x1b2   : > { %v7348_v11 = vcombine.low %v9972_v60, %v9984_v62  ;;  %v9992_v63 = vsel %vm9936_vm14, %v2939_v32, %v2940_v46  ;;  %v2946_v0 = vrot.slane %v2944_v44, 4  ;;  %v2954_v19 = vrot.slane %v9775_v24, 5  ;;  %8243 = vmatprep.subr.bf16.mxu0 %v8592_v55 }
 0x1b3   : > { %v7349_v31 = vcombine.low %v9976_v18, %v9992_v63  ;;  %v9999_v36 = vsel %vm9936_vm14, %v7318_v33, %v2944_v44  ;;  %v10003_v47 = vsel %vm9936_vm14, %v7319_v61, %v2951_v51  ;;  %v2953_v50 = vrot.slane %v2951_v51, 4  ;;  %8042 = vmatmul.mubr.bf16.gmra.mxu1 %v7281_v2  ;;  %v8579_v2 = vld [vmem:[#allocation2 + $0x54] sm:$0xff]  }
 0x1b4   : > { %v10007_v15 = vsel %vm9936_vm14, %v2946_v0, %v2947_v35  ;;  %v7320_v24 = vrot.slane %v2869_v49, 9  ;;  %v2958_v37 = vrot.slane %v9725_v59, 5  ;;  %v2961_v56 = vrot.slane %v9804_v13, 5  ;;  %8109 = vmatprep.mubr.bf16.mxu1 %v7346_v42  ;;  %v2872_v59 = vld [vmem:[#allocation2 + $0x6c] sm:$0xe]  ;;  %v8597_v61 = vld [vmem:[%s12096_s5 + $0x150] sm:$0xff]  }
 0x1b5   : > { %v7350_v34 = vcombine.low %v9999_v36, %v10007_v15  ;;  %v10018_v57 = vsel %vm9936_vm14, %v2953_v50, %v2954_v19  ;;  %v7321_v23 = vrot.slane %v2870_v17, 9  ;;  %v2965_v27 = vrot.slane %v9754_v14, 5  ;;  %8244 = vmatpush3.bf16.msra.mxu0 %v8592_v55  ;;  %v2873_v35 = vld [vmem:[#allocation2 + $0x78] sm:$0xe]  ;;  %v2874_v49 = vld [vmem:[#allocation2 + $0x84] sm:$0xe] }
 0x1b6   : > { %v7351_v13 = vcombine.low %v10003_v47, %v10018_v57  ;;  %v10025_v45 = vsel %vm9936_vm14, %v7320_v24, %v2958_v37  ;;  %v2960_v46 = vrot.slane %v2958_v37, 4  ;;  %v2968_v42 = vrot.slane %v9829_v29, 5  ;;  %8245 = vmatprep.subr.bf16.mxu0 %v8595_v12 }
 0x1b7   : > { %v10030_v21 = vsel %vm9936_vm14, %v7321_v23, %v2965_v27  ;;  %v2967_v16 = vrot.slane %v2965_v27, 4  ;;  %v7322_v1 = vrot.slane %v2871_v39, 9  ;;  %v2972_v14 = vrot.slane %v9790_v10, 5  ;;  %v2875_v39 = vld [vmem:[#allocation2 + $0x90] sm:$0xe] }
 0x1b8   : > { %v10035_v32 = vsel %vm9936_vm14, %v2960_v46, %v2961_v56  ;;  %v2975_v33 = vrot.slane %v9844_v20, 5  ;;  %v7323_v44 = vrot.slane %v2872_v59, 9  ;;  %v2979_v29 = vrot.slane %v9815_v26, 5  ;;  %8166 = vmatmul.mubr.bf16.gmra.mxu0 %v8577_v41  ;;  %v8578_v26 = vld [vmem:[%s12096_s5 + $0x130] sm:$0xff]  }
 0x1b9   : > { %v7352_v10 = vcombine.low %v10025_v45, %v10035_v32  ;;  %v10046_v55 = vsel %vm9936_vm14, %v2967_v16, %v2968_v42  ;;  %v2974_v51 = vrot.slane %v2972_v14, 4  ;;  %v2982_v20 = vrot.slane %v9859_v52, 5  ;;  %8169 = vmatprep.mubr.bf16.mxu0 %v8579_v2  ;;  %8246 = vmatpush3.bf16.msra.mxu0 %v8595_v12  ;;  %v4488_v12 = vld [vmem:[#allocation2 + $0xc] sm:$0xe]  ;;  %v10100_v41 = vld [vmem:[#allocation2 + $0x10] sm:$0xf] }
 0x1ba   : > { %v7353_v0 = vcombine.low %v10030_v21, %v10046_v55  ;;  %v10056_v19 = vsel %vm9936_vm14, %v7322_v1, %v2972_v14  ;;  %v10060_v17 = vsel %vm9936_vm14, %v7323_v44, %v2979_v29  ;;  %v2981_v50 = vrot.slane %v2979_v29, 4  ;;  %8247 = vmatprep.subr.bf16.mxu0 %v8597_v61  ;;  %v8580_v2 = vld [vmem:[#allocation2 + $0x60] sm:$0xff]   ;;  %v8582_v44 = vld [vmem:[#allocation2 + $0x6c] sm:$0xff]   ;;  %v10286_v55 = vld [vmem:[%s12096_s5 + $0x1b8] sm:$0xff]  }
 0x1bb   : > { %v10064_v52 = vsel %vm9936_vm14, %v2974_v51, %v2975_v33  ;;  %v7324_v24 = vrot.slane %v2873_v35, 9  ;;  %v2986_v37 = vrot.slane %v9835_v43, 5  ;;  %v2989_v56 = vrot.slane %v9868_v38, 5  ;;  %8110 = vmatmul.mubr.bf16.vlgmr.msra.gmra.mxu1 %v7347_v8  ;;  %v8600_v43 = vld [vmem:[%s12096_s5 + $0x148] sm:$0xff]   ;;  %v2876_v38 = vld [vmem:[#allocation2 + $0x9c] sm:$0xe] }
 0x1bc   : > { %v7354_v23 = vcombine.low %v10056_v19, %v10064_v52  ;;  %v10075_v27 = vsel %vm9936_vm14, %v2981_v50, %v2982_v20  ;;  %v7325_v59 = vrot.slane %v2874_v49, 9  ;;  %v2993_v46 = vrot.slane %v9849_v25, 5  ;;  %8190 = vmatpush3.bf16.msra.mxu1 %v9825_v58  ;;  %8113 = vmatprep.mubr.bf16.mxu1 %v7348_v11  ;;  %v8581_v58 = vld [vmem:[%s12096_s5 + $0x128] sm:$0xff]   ;;  %v10108_v33 = vld [vmem:[#allocation2 + $0x14] sm:$0x1] }
 0x1bd   : > { %v7355_v6 = vcombine.low %v10060_v17, %v10075_v27  ;;  %v10089_v9 = vsel %vm9936_vm14, %v7324_v24, %v2986_v37  ;;  %v2988_v25 = vrot.slane %v2986_v37, 4  ;;  %v2996_v8 = vrot.slane %v9880_v28, 5  ;;  %8191 = vmatprep.subr.bf16.mxu1 %v8578_v26  ;;  %8248 = vmatpush3.bf16.msra.mxu0 %v8597_v61  ;;  %v2877_v20 = vld [vmem:[#allocation2 + $0xa8] sm:$0xe] }
 0x1be   : > { %v10097_v60 = vsel %vm9936_vm14, %v7325_v59, %v2993_v46  ;;  %v2995_v62 = vrot.slane %v2993_v46, 4  ;;  %v7326_v11 = vrot.slane %v2875_v39, 9  ;;  %v3000_v42 = vrot.slane %v9863_v22, 5  ;;  %8249 = vmatprep.subr.bf16.mxu0 %v8600_v43  ;;  %v10139_v59 = vld [vmem:[#allocation2 + $0x1c] sm:$0xf]  ;;  %v8593_v52 = vld [vmem:[#allocation2 + $0xa8] sm:$0xff]  }
 0x1bf   : > { %v10104_v28 = vsel %vm9936_vm14, %v2988_v25, %v2989_v56  ;;  %v3003_v16 = vrot.slane %v9888_v4, 5  ;;  %v7327_v1 = vrot.slane %v2876_v38, 9  ;;  %v3007_v14 = vrot.slane %v9873_v53, 5  ;;  %v8601_v4 = vld [vmem:[%s12096_s5 + $0x140] sm:$0xff]   ;;  %v4492_v53 = vld [vmem:[#allocation2 + $0x3c] sm:$0xe] }
 0x1c0   : > { %v7356_v29 = vcombine.low %v10089_v9, %v10104_v28  ;;  %v10114_v22 = vsel %vm9936_vm14, %v2995_v62, %v2996_v8  ;;  %v3002_v35 = vrot.slane %v3000_v42, 4  ;;  %v3010_v51 = vrot.slane %v9907_v3, 5  ;;  %8192 = vmatpush3.bf16.msra.mxu1 %v8578_v26  ;;  %8170 = vmatmul.mubr.bf16.gmra.mxu0 %v8580_v2  ;;  %v4489_v3 = vld [vmem:[#allocation2 + $0x18] sm:$0xe]  ;;  %v8584_v26 = vld [vmem:[%s12096_s5 + $0x120] sm:$0xff]  }
 0x1c1   : > { %v10124_v61 = vsel %vm9936_vm14, %v7326_v11, %v3000_v42  ;;  %v10128_v49 = vsel %vm9936_vm14, %v7327_v1, %v3007_v14  ;;  %v3009_v50 = vrot.slane %v3007_v14, 4  ;;  %8193 = vmatprep.subr.bf16.mxu1 %v8581_v58  ;;  %8173 = vmatprep.mubr.bf16.mxu0 %v8582_v44  ;;  %v7450_v37 = vrot.slane %v4488_v12, 9  ;;  %v10148_v62 = vld [vmem:[#allocation2 + $0x20] sm:$0x1]  ;;  %v2878_v12 = vld [vmem:[#allocation2 + $0xb4] sm:$0xe] }
 0x1c2   : > { %v10135_v24 = vsel %vm9936_vm14, %v3002_v35, %v3003_v16  ;;  %v4554_v56 = vrot.slane %v10100_v41, 5  ;;  %v4557_v39 = vrot.slane %v10108_v33, 5  ;;  %8250 = vmatpush3.bf16.msra.mxu0 %v8600_v43  ;;  %v7328_v25 = vrot.slane %v2877_v20, 9  ;;  %v3734_v16 = vld [vmem:[#allocation2 + $0xc] sm:$0xf]  ;;  %v8589_v14 = vld [vmem:[%s12096_s5 + $0x118] sm:$0xff]  }
 0x1c3   : > { %v10145_v38 = vsel %vm9936_vm14, %v3009_v50, %v3010_v51  ;;  %v3014_v8 = vrot.slane %v9886_v7, 5  ;;  %8114 = vmatmul.mubr.bf16.gmra.mxu1 %v7349_v31  ;;  %v3017_v43 = vrot.slane %v9909_v48, 5  ;;  %8251 = vmatprep.subr.bf16.mxu0 %v8601_v4  ;;  %v10163_v7 = vld [vmem:[%s12096_s5 + $0x1f8] sm:$0xff]   ;;  %v7451_v31 = vrot.slane %v4489_v3, 9  ;;  %v4490_v1 = vld [vmem:[#allocation2 + $0x24] sm:$0xe] }
 0x1c4   : > { %v10157_v42 = vsel %vm9936_vm14, %v7450_v37, %v4554_v56  ;;  %v4556_v2 = vrot.slane %v4554_v56, 4  ;;  %8117 = vmatprep.mubr.bf16.mxu1 %v7350_v34  ;;  %8194 = vmatpush3.bf16.msra.mxu1 %v8581_v58  ;;  %v4561_v48 = vrot.slane %v10139_v59, 5  ;;  %v4564_v36 = vrot.slane %v10148_v62, 5  ;;  %v10182_v58 = vld [vmem:[#allocation2 + $0x28] sm:$0xf]  ;;  %v8583_v35 = vld [vmem:[#allocation2 + $0x78] sm:$0xff]  }
 0x1c5   : > { %v10170_v18 = vsel %vm9936_vm14, %v7328_v25, %v3014_v8  ;;  %v3016_v63 = vrot.slane %v3014_v8, 4  ;;  %8195 = vmatprep.subr.bf16.mxu1 %v8584_v26  ;;  %v7329_v15 = vrot.slane %v2878_v12, 9  ;;  %v3021_v34 = vrot.slane %v9900_v30, 5  ;;  %v10191_v37 = vld [vmem:[#allocation2 + $0x2c] sm:$0x1]  ;;  %v8586_v56 = vld [vmem:[#allocation2 + $0x84] sm:$0xff]  }
 0x1c6   : > { %v10178_v44 = vsel %vm9936_vm14, %v4556_v2, %v4557_v39  ;;  %8252 = vmatpush3.bf16.msra.mxu0 %v8601_v4  ;;  %v4563_v50 = vrot.slane %v4561_v48, 4  ;;  %v3024_v3 = vrot.slane %v9919_v40, 5  ;;  %v10197_v39 = vsel %vm9936_vm14, %v7451_v31, %v4561_v48  ;;  %v3737_v11 = vld [vmem:[#allocation2 + $0x18] sm:$0xf]  ;;  %v4493_v19 = vld [vmem:[#allocation2 + $0x48] sm:$0xe] }
 0x1c7   : > { %v7482_v51 = vcombine.low %v10157_v42, %v10178_v44  ;;  %v10188_v20 = vsel %vm9936_vm14, %v3016_v63, %v3017_v43  ;;  %v10201_v25 = vsel %vm9936_vm14, %v7329_v15, %v3021_v34  ;;  %v3023_v8 = vrot.slane %v3021_v34, 4  ;;  %8333 = vmatprep.subr.bf16.mxu0 %v10163_v7  ;;  %v4491_v43 = vld [vmem:[#allocation2 + $0x30] sm:$0xe] }
 0x1c8   : > { %8174 = vmatmul.mubr.bf16.gmra.mxu0 %v8583_v35  ;;  %8196 = vmatpush3.bf16.msra.mxu1 %v8584_v26  ;;  %v10206_v40 = vsel %vm9936_vm14, %v4563_v50, %v4564_v36  ;;  %v7452_v4 = vrot.slane %v4490_v1, 9  ;;  %v4568_v12 = vrot.slane %v10182_v58, 5  ;;  %v3783_v2 = vshrl.u32 %v3734_v16, 16  ;;  %v8594_v63 = vld [vmem:[%s12096_s5 + $0x110] sm:$0xff]  }
 0x1c9   : > { %8177 = vmatprep.mubr.bf16.mxu0 %v8586_v56  ;;  %8197 = vmatprep.subr.bf16.mxu1 %v8589_v14  ;;  %v10214_v31 = vsel %vm9936_vm14, %v3023_v8, %v3024_v3  ;;  %v4571_v26 = vrot.slane %v10191_v37, 5  ;;  %v3786_v48 = vshll.u32 %v3734_v16, 16  ;;  %v3792_v36 = vshll.u32 %v10100_v41, 16  ;;  %v10218_v1 = vld [vmem:[#allocation2 + $0x34] sm:$0xf] }
 0x1ca   : > { %v4570_v35 = vrot.slane %v4568_v12, 4  ;;  %v3785_v50 = vrot.slane %v3783_v2, 4  ;;  %v10224_v56 = vld [vmem:[#allocation2 + $0x38] sm:$0x1]  ;;  %v3796_v8 = vshrl.u32 %v10100_v41, 16  ;;  %v3802_v30 = vshll.u32 %v10108_v33, 16 }
 0x1cb   : > { %8118 = vmatmul.mubr.bf16.gmra.mxu1 %v7351_v13  ;;  %v3788_v3 = vrot.slane %v3786_v48, 5  ;;  %v3794_v16 = vrot.slane %v3792_v36, 5  ;;  %v10236_v2 = vsel %vm9936_vm14, %v7452_v4, %v4568_v12  ;;  %v7453_v57 = vrot.slane %v4491_v43, 9  ;;  %v8599_v41 = vld [vmem:[%s12096_s5 + $0x108] sm:$0xff]   ;;  %v3740_v43 = vld [vmem:[#allocation2 + $0x24] sm:$0xf] }
 0x1cc   : > { %8121 = vmatprep.mubr.bf16.mxu1 %v7352_v10  ;;  %8198 = vmatpush3.bf16.msra.mxu1 %v8589_v14  ;;  %v10240_v47 = vsel %vm9936_vm14, %v4570_v35, %v4571_v26  ;;  %v4575_v13 = vrot.slane %v10218_v1, 5  ;;  %v3798_v10 = vrot.slane %v3796_v8, 4  ;;  %v4578_v33 = vrot.slane %v10224_v56, 5  ;;  %v8588_v14 = vld [vmem:[#allocation2 + $0x90] sm:$0xff]   ;;  %v8591_v36 = vld [vmem:[#allocation2 + $0x9c] sm:$0xff]  }
 0x1cd   : > { %8199 = vmatprep.subr.bf16.mxu1 %v8594_v63  ;;  %v7484_v45 = vcombine.low %v10236_v2, %v10240_v47  ;;  %v3789_v32 = vor.u32 %v3788_v3, %v3785_v50  ;;  %v3804_v4 = vrot.slane %v3802_v30, 5  ;;  %v3807_v26 = vshrl.u32 %v3737_v11, 16 }
 0x1ce   : > { %v4577_v12 = vrot.slane %v4575_v13, 4  ;;  %v3810_v48 = vshll.u32 %v3737_v11, 16  ;;  %v3799_v34 = vor.u32 %v3798_v10, %v3794_v16  ;;  %v3816_v15 = vshll.u32 %v10139_v59, 16  ;;  %v10256_v11 = vld [vmem:[#allocation2 + $0x40] sm:$0xf] }
 0x1cf   : > { %v3790_v35 = vrot.slane %v3789_v32, 4  ;;  %v3820_v46 = vshrl.u32 %v10139_v59, 16  ;;  %v3809_v3 = vrot.slane %v3807_v26, 4  ;;  %v3826_v8 = vshll.u32 %v10148_v62, 16  ;;  %v8602_v32 = vld [vmem:[%s12096_s5 + $0x100] sm:$0xff]  }
 0x1d0   : > { %8178 = vmatmul.mubr.bf16.gmra.mxu0 %v8588_v14  ;;  %8200 = vmatpush3.bf16.msra.mxu1 %v8594_v63  ;;  %v10253_v50 = vsel %vm9936_vm14, %v4577_v12, %v4578_v33  ;;  %v3812_v30 = vrot.slane %v3810_v48, 5  ;;  %v3800_v63 = vrot.slane %v3799_v34, 4  ;;  %v10265_v10 = vsel %vm9936_vm14, %v7453_v57, %v4575_v13  ;;  %v10267_v14 = vld [vmem:[#allocation2 + $0x44] sm:$0x1] }
 0x1d1   : > { %8181 = vmatprep.mubr.bf16.mxu0 %v8591_v36  ;;  %8201 = vmatprep.subr.bf16.mxu1 %v8599_v41  ;;  %v3795_v59 = vsel %vm9232_vm3, %v3790_v35, %v3794_v16  ;;  %v3818_v33 = vrot.slane %v3816_v15, 5  ;;  %v7485_v62 = vcombine.low %v10265_v10, %v10253_v50  ;;  %v3822_v26 = vrot.slane %v3820_v46, 4 }
 0x1d2   : > { %v3813_v12 = vor.u32 %v3812_v30, %v3809_v3  ;;  %v3828_v48 = vrot.slane %v3826_v8, 5  ;;  %v3805_v34 = vsel %vm9232_vm3, %v3800_v63, %v3804_v4  ;;  %v7454_v16 = vrot.slane %v4492_v53, 9  ;;  %v10294_v30 = vld [vmem:[#allocation2 + $0x4c] sm:$0xf]  ;;  %v8596_v8 = vld [vmem:[#allocation2 + $0xb4] sm:$0xff]  }
 0x1d3   : > { %8122 = vmatmul.mubr.bf16.gmra.mxu1 %v7353_v0  ;;  %v4582_v57 = vrot.slane %v10256_v11, 5  ;;  %v3831_v13 = vshrl.u32 %v3740_v43, 16  ;;  %v3823_v36 = vor.u32 %v3822_v26, %v3818_v33  ;;  %v4585_v46 = vrot.slane %v10267_v14, 5 }
 0x1d4   : > { %8125 = vmatprep.mubr.bf16.mxu1 %v7354_v23  ;;  %8202 = vmatpush3.bf16.msra.mxu1 %v8599_v41  ;;  %v3814_v15 = vrot.slane %v3813_v12, 4  ;;  %v3834_v35 = vshll.u32 %v3740_v43, 16  ;;  %v10281_v21 = vcombine.low %v3795_v59, %v3805_v34  ;;  %v3840_v4 = vshll.u32 %v10182_v58, 16  ;;  %v3743_v34 = vld [vmem:[#allocation2 + $0x30] sm:$0xf] }
 0x1d5   : > { %8203 = vmatprep.subr.bf16.mxu1 %v8602_v32  ;;  %v4584_v0 = vrot.slane %v4582_v57, 4  ;;  %v3833_v53 = vrot.slane %v3831_v13, 4  ;;  %v3824_v23 = vrot.slane %v3823_v36, 4  ;;  %v10291_v41 = vsel %vm9936_vm14, %v7454_v16, %v4582_v57  ;;  %v10305_v13 = vld [vmem:[#allocation2 + $0x50] sm:$0x1] }
 0x1d6   : > { %v3836_v43 = vrot.slane %v3834_v35, 5  ;;  %v3844_v3 = vshrl.u32 %v10182_v58, 16  ;;  %v3819_v59 = vsel %vm9232_vm3, %v3814_v15, %v3818_v33  ;;  %v3842_v12 = vrot.slane %v3840_v4, 5 }
 0x1d7   : > { %v10300_v63 = vsel %vm9936_vm14, %v4584_v0, %v4585_v46  ;;  %v3850_v26 = vshll.u32 %v10191_v37, 16  ;;  %v3829_v16 = vsel %vm9232_vm3, %v3824_v23, %v3828_v48  ;;  %v7455_v36 = vrot.slane %v4493_v19, 9  ;;  %v10319_v23 = vld [vmem:[#allocation2 + $0x58] sm:$0xf] }
 0x1d8   : > { %8182 = vmatmul.mubr.bf16.gmra.mxu0 %v8593_v52  ;;  %8204 = vmatpush3.bf16.msra.mxu1 %v8602_v32  ;;  %v3837_v58 = vor.u32 %v3836_v43, %v3833_v53  ;;  %v3846_v57 = vrot.slane %v3844_v3, 4  ;;  %v10308_v33 = vcombine.low %v3819_v59, %v3829_v16  ;;  %v7486_v15 = vcombine.low %v10291_v41, %v10300_v63  ;;  %v8598_v16 = vld [vmem:[#allocation2 + $0xc0] sm:$0xff]  }
 0x1d9   : > { %8185 = vmatprep.mubr.bf16.mxu0 %v8596_v8  ;;  %8285 = vmatprep.subr.bf16.mxu1 %v10286_v55  ;;  %v3852_v37 = vrot.slane %v3850_v26, 5  ;;  %v4589_v46 = vrot.slane %v10294_v30, 5  ;;  %v3855_v0 = vshrl.u32 %v3743_v34, 16  ;;  %v3858_v48 = vshll.u32 %v3743_v34, 16  ;;  %v3746_v34 = vld [vmem:[#allocation2 + $0x3c] sm:$0xf] }
 0x1da   : > { %v3838_v32 = vrot.slane %v3837_v58, 4  ;;  %v3847_v35 = vor.u32 %v3846_v57, %v3842_v12  ;;  %v4592_v4 = vrot.slane %v10305_v13, 5  ;;  %v3864_v19 = vshll.u32 %v10218_v1, 16  ;;  %v10339_v57 = vld [vmem:[#allocation2 + $0x5c] sm:$0x1] }
 0x1db   : > { %8126 = vmatmul.mubr.bf16.gmra.mxu1 %v7355_v6  ;;  %v4591_v53 = vrot.slane %v4589_v46, 4  ;;  %v3868_v52 = vshrl.u32 %v10218_v1, 16  ;;  %v10326_v3 = vsel %vm9936_vm14, %v7455_v36, %v4589_v46  ;;  %v3857_v17 = vrot.slane %v3855_v0, 4  ;;  %v4494_v6 = vld [vmem:[#allocation2 + $0x54] sm:$0xe] }
 0x1dc   : > { %8129 = vmatprep.mubr.bf16.mxu1 %v7356_v29  ;;  %v3848_v43 = vrot.slane %v3847_v35, 4  ;;  %v3860_v27 = vrot.slane %v3858_v48, 5  ;;  %v3866_v59 = vrot.slane %v3864_v19, 5  ;;  %v3874_v26 = vshll.u32 %v10224_v56, 16 }
 0x1dd   : > { %v10330_v8 = vsel %vm9936_vm14, %v4591_v53, %v4592_v4  ;;  %v3870_v1 = vrot.slane %v3868_v52, 4  ;;  %v3843_v9 = vsel %vm9232_vm3, %v3838_v32, %v3842_v12  ;;  %v7456_v35 = vrot.slane %v4494_v6, 9  ;;  %v10349_v52 = vld [vmem:[#allocation2 + $0x64] sm:$0xf] }
 0x1de   : > { %v3853_v28 = vsel %vm9232_vm3, %v3848_v43, %v3852_v37  ;;  %v7487_v29 = vcombine.low %v10326_v3, %v10330_v8  ;;  %v3861_v58 = vor.u32 %v3860_v27, %v3857_v17  ;;  %v4596_v56 = vrot.slane %v10319_v23, 5  ;;  %v4499_v3 = vld [vmem:[#allocation2 + $0x90] sm:$0xe] }
 0x1df   : > { %v10341_v36 = vcombine.low %v3843_v9, %v3853_v28  ;;  %v3871_v46 = vor.u32 %v3870_v1, %v3866_v59  ;;  %v3876_v48 = vrot.slane %v3874_v26, 5  ;;  %v3879_v53 = vshrl.u32 %v3746_v34, 16  ;;  %v4495_v1 = vld [vmem:[#allocation2 + $0x60] sm:$0xe]  ;;  %v10373_v28 = vld [vmem:[#allocation2 + $0x68] sm:$0x1] }
 0x1e0   : > { %8186 = vmatmul.mubr.bf16.gmra.mxu0 %v8598_v16  ;;  %v3862_v0 = vrot.slane %v3861_v58, 4  ;;  %v3882_v12 = vshll.u32 %v3746_v34, 16  ;;  %v4598_v32 = vrot.slane %v4596_v56, 4  ;;  %v4599_v4 = vrot.slane %v10339_v57, 5 }
 0x1e1   : > { %8253 = vmatprep.mubr.bf16.mxu0 %v7482_v51  ;;  %v3872_v37 = vrot.slane %v3871_v46, 4  ;;  %v3888_v19 = vshll.u32 %v10256_v11, 16  ;;  %v3881_v17 = vrot.slane %v3879_v53, 4  ;;  %v3892_v6 = vshrl.u32 %v10256_v11, 16 }
 0x1e2   : > { %v3867_v43 = vsel %vm9232_vm3, %v3862_v0, %v3866_v59  ;;  %v3884_v27 = vrot.slane %v3882_v12, 5  ;;  %v12127_v42 = vcombine.low %v10097_v60, %v10114_v22  ;;  %v10361_v51 = vsel %vm9936_vm14, %v4598_v32, %v4599_v4  ;;  %v3749_v59 = vld [vmem:[#allocation2 + $0x48] sm:$0xf]  ;;  %v10384_v4 = vld [vmem:[#allocation2 + $0x70] sm:$0xf] }
 0x1e3   : > { %v3877_v44 = vsel %vm9232_vm3, %v3872_v37, %v3876_v48  ;;  %v3890_v26 = vrot.slane %v3888_v19, 5  ;;  %v3898_v34 = vshll.u32 %v10267_v14, 16  ;;  %v12128_v16 = vcombine.low %v10124_v61, %v10135_v24 }
 0x1e4   : > { %8130 = vmatmul.mubr.bf16.gmra.mxu1 %v12127_v42  ;;  %v10367_v11 = vcombine.low %v3867_v43, %v3877_v44  ;;  %v10371_v60 = vsel %vm9936_vm14, %v7456_v35, %v4596_v56  ;;  %v3885_v22 = vor.u32 %v3884_v27, %v3881_v17  ;;  %v3894_v9 = vrot.slane %v3892_v6, 4  ;;  %v8608_v35 = vld [vmem:[%s12096_s5 + $0x1f0] sm:$0xff]  }
 0x1e5   : > { %8133 = vmatprep.mubr.bf16.mxu1 %v12128_v16  ;;  %v7488_v58 = vcombine.low %v10371_v60, %v10361_v51  ;;  %v3900_v46 = vrot.slane %v3898_v34, 5  ;;  %v7457_v14 = vrot.slane %v4495_v1, 9  ;;  %v4603_v0 = vrot.slane %v10349_v52, 5  ;;  %v4496_v1 = vld [vmem:[#allocation2 + $0x6c] sm:$0xe] }
 0x1e6   : > { %v3886_v48 = vrot.slane %v3885_v22, 4  ;;  %v3895_v61 = vor.u32 %v3894_v9, %v3890_v26  ;;  %v3903_v24 = vshrl.u32 %v3749_v59, 16  ;;  %v3906_v53 = vshll.u32 %v3749_v59, 16  ;;  %v8616_v51 = vld [vmem:[%s12096_s5 + $0x1c8] sm:$0xff]  }
 0x1e7   : > { %v4605_v56 = vrot.slane %v4603_v0, 4  ;;  %v4606_v12 = vrot.slane %v10373_v28, 5  ;;  %v3912_v37 = vshll.u32 %v10294_v30, 16  ;;  %v3916_v32 = vshrl.u32 %v10294_v30, 16 }
 0x1e8   : > { %v12129_v19 = vcombine.low %v10197_v39, %v10206_v40  ;;  %v3896_v43 = vrot.slane %v3895_v61, 4  ;;  %v10391_v17 = vsel %vm9936_vm14, %v7457_v14, %v4603_v0  ;;  %v3905_v27 = vrot.slane %v3903_v24, 4  ;;  %v3752_v40 = vld [vmem:[#allocation2 + $0x54] sm:$0xf] }
 0x1e9   : > { %v3908_v6 = vrot.slane %v3906_v53, 5  ;;  %v10398_v30 = vsel %vm9936_vm14, %v4605_v56, %v4606_v12  ;;  %v3914_v42 = vrot.slane %v3912_v37, 5  ;;  %v3918_v44 = vrot.slane %v3916_v32, 4 }
 0x1ea   : > { %8254 = vmatmul.mubr.bf16.vlgmr.msra.gmra.mxu0 %v12129_v19  ;;  %v3922_v39 = vshll.u32 %v10305_v13, 16  ;;  %v3891_v34 = vsel %vm9232_vm3, %v3886_v48, %v3890_v26  ;;  %v3901_v59 = vsel %vm9232_vm3, %v3896_v43, %v3900_v46  ;;  %v7489_v2 = vcombine.low %v10391_v17, %v10398_v30  ;;  %v8610_v13 = vld [vmem:[%s12096_s5 + $0x1e8] sm:$0xff]   ;;  %v8611_v19 = vld [vmem:[%s12096_s5 + $0x1e0] sm:$0xff]  }
 0x1eb   : > { %8257 = vmatprep.mubr.bf16.mxu0 %v7484_v45  ;;  %8334 = vmatpush3.bf16.msra.mxu0 %v10163_v7  ;;  %v3909_v47 = vor.u32 %v3908_v6, %v3905_v27  ;;  %v10408_v45 = vld [vmem:[#allocation2 + $0x74] sm:$0x1]  ;;  %v12130_v7 = vcombine.low %v10128_v49, %v10145_v38  ;;  %v10416_v16 = vcombine.low %v3891_v34, %v3901_v59  ;;  %v7458_v22 = vrot.slane %v4496_v1, 9  ;;  %v10424_v38 = vld [vmem:[#allocation2 + $0x7c] sm:$0xf] }
 0x1ec   : > { %8335 = vmatprep.subr.bf16.mxu0 %v8608_v35  ;;  %v3919_v26 = vor.u32 %v3918_v44, %v3914_v42  ;;  %v4610_v9 = vrot.slane %v10384_v4, 5  ;;  %v12131_v46 = vcombine.low %v10170_v18, %v10188_v20  ;;  %v3924_v0 = vrot.slane %v3922_v39, 5  ;;  %v4497_v20 = vld [vmem:[#allocation2 + $0x78] sm:$0xe]  ;;  %v3755_v1 = vld [vmem:[#allocation2 + $0x60] sm:$0xf] }
 0x1ed   : > { %8134 = vmatmul.mubr.bf16.gmra.mxu1 %v12130_v7  ;;  %v3910_v14 = vrot.slane %v3909_v47, 4  ;;  %v3927_v48 = vshrl.u32 %v3752_v40, 16  ;;  %v3930_v61 = vshll.u32 %v3752_v40, 16  ;;  %v4613_v56 = vrot.slane %v10408_v45, 5  ;;  %v10448_v40 = vld [vmem:[#allocation2 + $0x80] sm:$0x1] }
 0x1ee   : > { %8137 = vmatprep.mubr.bf16.mxu1 %v12131_v46  ;;  %v3920_v24 = vrot.slane %v3919_v26, 4  ;;  %v4612_v53 = vrot.slane %v4610_v9, 4  ;;  %v3936_v49 = vshll.u32 %v10319_v23, 16  ;;  %v3940_v18 = vshrl.u32 %v10319_v23, 16  ;;  %v8613_v26 = vld [vmem:[%s12096_s5 + $0x1d8] sm:$0xff]  }
 0x1ef   : > { %8336 = vmatpush3.bf16.msra.mxu0 %v8608_v35  ;;  %v3915_v12 = vsel %vm9232_vm3, %v3910_v14, %v3914_v42  ;;  %v3929_v37 = vrot.slane %v3927_v48, 4  ;;  %v3932_v32 = vrot.slane %v3930_v61, 5  ;;  %v3946_v6 = vshll.u32 %v10339_v57, 16  ;;  %v10470_v61 = vld [vmem:[#allocation2 + $0x88] sm:$0xf] }
 0x1f0   : > { %8337 = vmatprep.subr.bf16.mxu0 %v8610_v13  ;;  %v3925_v43 = vsel %vm9232_vm3, %v3920_v24, %v3924_v0  ;;  %v10436_v27 = vsel %vm9936_vm14, %v4612_v53, %v4613_v56  ;;  %v3938_v35 = vrot.slane %v3936_v49, 5  ;;  %v10446_v42 = vsel %vm9936_vm14, %v7458_v22, %v4610_v9  ;;  %v4498_v9 = vld [vmem:[#allocation2 + $0x84] sm:$0xe]  ;;  %v3758_v53 = vld [vmem:[#allocation2 + $0x6c] sm:$0xf] }
 0x1f1   : > { %v10442_v23 = vcombine.low %v3915_v12, %v3925_v43  ;;  %v3933_v44 = vor.u32 %v3932_v32, %v3929_v37  ;;  %v3942_v39 = vrot.slane %v3940_v18, 4  ;;  %v7490_v57 = vcombine.low %v10446_v42, %v10436_v27  ;;  %v10483_v37 = vld [vmem:[#allocation2 + $0x8c] sm:$0x1]  ;;  %v8614_v32 = vld [vmem:[%s12096_s5 + $0x1d0] sm:$0xff]  }
 0x1f2   : > { %8258 = vmatmul.mubr.bf16.gmra.mxu0 %v7485_v62  ;;  %v3948_v34 = vrot.slane %v3946_v6, 5  ;;  %v7459_v50 = vrot.slane %v4497_v20, 9  ;;  %v4617_v10 = vrot.slane %v10424_v38, 5  ;;  %v3951_v47 = vshrl.u32 %v3755_v1, 16  ;;  %v8604_v43 = vld [vmem:[%s12096_s5 + $0x1b0] sm:$0xff]  }
 0x1f3   : > { %8261 = vmatprep.mubr.bf16.mxu0 %v7486_v15  ;;  %8338 = vmatpush3.bf16.msra.mxu0 %v8610_v13  ;;  %v3934_v62 = vrot.slane %v3933_v44, 4  ;;  %v3943_v59 = vor.u32 %v3942_v39, %v3938_v35  ;;  %v3954_v7 = vshll.u32 %v3755_v1, 16  ;;  %v12132_v41 = vcombine.low %v10201_v25, %v10214_v31 }
 0x1f4   : > { %8339 = vmatprep.subr.bf16.mxu0 %v8611_v19  ;;  %v4619_v63 = vrot.slane %v4617_v10, 4  ;;  %v4620_v15 = vrot.slane %v10448_v40, 5  ;;  %v3960_v22 = vshll.u32 %v10349_v52, 16  ;;  %v3964_v13 = vshrl.u32 %v10349_v52, 16 }
 0x1f5   : > { %8138 = vmatmul.mubr.bf16.gmra.mxu1 %v12132_v41  ;;  %v3944_v46 = vrot.slane %v3943_v59, 4  ;;  %v10468_v14 = vsel %vm9936_vm14, %v7459_v50, %v4617_v10  ;;  %v3953_v0 = vrot.slane %v3951_v47, 4  ;;  %v3956_v48 = vrot.slane %v3954_v7, 5  ;;  %v10505_v47 = vld [vmem:[#allocation2 + $0x94] sm:$0xf] }
 0x1f6   : > { %8205 = vmatprep.mubr.bf16.mxu1 %v10281_v21  ;;  %v10474_v25 = vsel %vm9936_vm14, %v4619_v63, %v4620_v15  ;;  %v3962_v31 = vrot.slane %v3960_v22, 5  ;;  %v3966_v24 = vrot.slane %v3964_v13, 4  ;;  %v3970_v52 = vshll.u32 %v10373_v28, 16  ;;  %v10526_v22 = vld [vmem:[#allocation2 + $0x98] sm:$0x1] }
 0x1f7   : > { %8340 = vmatpush3.bf16.msra.mxu0 %v8611_v19  ;;  %v3939_v21 = vsel %vm9232_vm3, %v3934_v62, %v3938_v35  ;;  %v3949_v56 = vsel %vm9232_vm3, %v3944_v46, %v3948_v34  ;;  %v7491_v49 = vcombine.low %v10468_v14, %v10474_v25  ;;  %v3957_v12 = vor.u32 %v3956_v48, %v3953_v0  ;;  %v8612_v25 = vld [vmem:[%s12096_s5 + $0x190] sm:$0xff]  }
 0x1f8   : > { %8341 = vmatprep.subr.bf16.mxu0 %v8613_v26  ;;  %v10488_v28 = vcombine.low %v3939_v21, %v3949_v56  ;;  %v3967_v18 = vor.u32 %v3966_v24, %v3962_v31  ;;  %v7460_v20 = vrot.slane %v4498_v9, 9  ;;  %v4624_v19 = vrot.slane %v10470_v61, 5  ;;  %v10534_v24 = vld [vmem:[#allocation2 + $0x9c] sm:$0xe] }
 0x1f9   : > { %v3958_v35 = vrot.slane %v3957_v12, 4  ;;  %v3972_v6 = vrot.slane %v3970_v52, 5  ;;  %v3975_v1 = vshrl.u32 %v3758_v53, 16  ;;  %v3978_v44 = vshll.u32 %v3758_v53, 16  ;;  %v8617_v12 = vld [vmem:[%s12096_s5 + $0x1c0] sm:$0xff]  }
 0x1fa   : > { %8262 = vmatmul.mubr.bf16.gmra.mxu0 %v7487_v29  ;;  %v3968_v39 = vrot.slane %v3967_v18, 4  ;;  %v4626_v34 = vrot.slane %v4624_v19, 4  ;;  %v4627_v50 = vrot.slane %v10483_v37, 5  ;;  %v3984_v10 = vshll.u32 %v10384_v4, 16 }
 0x1fb   : > { %8265 = vmatprep.mubr.bf16.mxu0 %v7488_v58  ;;  %8342 = vmatpush3.bf16.msra.mxu0 %v8613_v26  ;;  %v3963_v8 = vsel %vm9232_vm3, %v3958_v35, %v3962_v31  ;;  %v3977_v29 = vrot.slane %v3975_v1, 4  ;;  %v3980_v62 = vrot.slane %v3978_v44, 5  ;;  %v3988_v59 = vshrl.u32 %v10384_v4, 16  ;;  %v3761_v4 = vld [vmem:[#allocation2 + $0x78] sm:$0xf] }
 0x1fc   : > { %8343 = vmatprep.subr.bf16.mxu0 %v8614_v32  ;;  %v3973_v60 = vsel %vm9232_vm3, %v3968_v39, %v3972_v6  ;;  %v10515_v58 = vsel %vm9936_vm14, %v4626_v34, %v4627_v50  ;;  %v3986_v7 = vrot.slane %v3984_v10, 5  ;;  %v3994_v26 = vshll.u32 %v10408_v45, 16  ;;  %v8605_v45 = vld [vmem:[%s12096_s5 + $0x1a8] sm:$0xff]   ;;  %v10549_v35 = vld [vmem:[#allocation2 + $0xa0] sm:$0xf]  ;;  %v10578_v10 = vld [vmem:[%s12096_s5 + $0x238] sm:$0xff]  }
 0x1fd   : > { %8206 = vmatmul.mubr.bf16.vlgmr.msra.gmra.mxu1 %v10308_v33  ;;  %v10520_v41 = vcombine.low %v3963_v8, %v3973_v60  ;;  %v10524_v33 = vsel %vm9936_vm14, %v7460_v20, %v4624_v19  ;;  %v3981_v63 = vor.u32 %v3980_v62, %v3977_v29  ;;  %v3990_v15 = vrot.slane %v3988_v59, 4  ;;  %v3764_v6 = vld [vmem:[#allocation2 + $0x84] sm:$0xf]  ;;  %v4501_v62 = vld [vmem:[#allocation2 + $0xa8] sm:$0xe]  ;;  %v8609_v59 = vld [vmem:[%s12096_s5 + $0x198] sm:$0xff]  }
 0x1fe   : > { %8286 = vmatpush3.bf16.msra.mxu1 %v10286_v55  ;;  %8209 = vmatprep.mubr.bf16.mxu1 %v10341_v36  ;;  %v7492_v55 = vcombine.low %v10524_v33, %v10515_v58  ;;  %v3996_v13 = vrot.slane %v3994_v26, 5  ;;  %v7461_v36 = vrot.slane %v4499_v3, 9  ;;  %v4631_v9 = vrot.slane %v10505_v47, 5  ;;  %v10568_v44 = vld [vmem:[#allocation2 + $0xa4] sm:$0x1] }
 0x1ff   : > { %8287 = vmatprep.subr.bf16.mxu1 %v8604_v43  ;;  %8344 = vmatpush3.bf16.msra.mxu0 %v8614_v32  ;;  %v3982_v46 = vrot.slane %v3981_v63, 4  ;;  %v3991_v0 = vor.u32 %v3990_v15, %v3986_v7  ;;  %v3999_v48 = vshrl.u32 %v3761_v4, 16  ;;  %v4002_v31 = vshll.u32 %v3761_v4, 16 }
 0x200   : > { %8345 = vmatprep.subr.bf16.mxu0 %v8616_v51  ;;  %v4633_v52 = vrot.slane %v4631_v9, 4  ;;  %v4634_v53 = vrot.slane %v10526_v22, 5  ;;  %v4008_v21 = vshll.u32 %v10424_v38, 16  ;;  %v4012_v56 = vshrl.u32 %v10424_v38, 16  ;;  %v8606_v38 = vld [vmem:[%s12096_s5 + $0x1a0] sm:$0xff]  }
 0x201   : > { %v3992_v32 = vrot.slane %v3991_v0, 4  ;;  %v10547_v18 = vsel %vm9936_vm14, %v7461_v36, %v4631_v9  ;;  %v4001_v20 = vrot.slane %v3999_v48, 4  ;;  %v4004_v19 = vrot.slane %v4002_v31, 5  ;;  %v3767_v0 = vld [vmem:[#allocation2 + $0x90] sm:$0xf] }
 0x202   : > { %8288 = vmatpush3.bf16.msra.mxu1 %v8604_v43  ;;  %8266 = vmatmul.mubr.bf16.gmra.mxu0 %v7489_v2  ;;  %v10559_v17 = vsel %vm9936_vm14, %v4633_v52, %v4634_v53  ;;  %v4010_v30 = vrot.slane %v4008_v21, 5  ;;  %v4014_v2 = vrot.slane %v4012_v56, 4  ;;  %v4018_v43 = vshll.u32 %v10448_v40, 16  ;;  %v10604_v52 = vld [vmem:[#allocation2 + $0xb0] sm:$0x1] }
 0x203   : > { %8289 = vmatprep.subr.bf16.mxu1 %v8605_v45  ;;  %8269 = vmatprep.mubr.bf16.mxu0 %v7490_v57  ;;  %v3987_v1 = vsel %vm9232_vm3, %v3982_v46, %v3986_v7  ;;  %v3997_v27 = vsel %vm9232_vm3, %v3992_v32, %v3996_v13  ;;  %v7493_v42 = vcombine.low %v10547_v18, %v10559_v17  ;;  %v7462_v40 = vrot.slane %v10534_v24, 9  ;;  %v8618_v18 = vld [vmem:[%s12096_s5 + $0x180] sm:$0xff]  }
 0x204   : > { %v4005_v57 = vor.u32 %v4004_v19, %v4001_v20  ;;  %8346 = vmatpush3.bf16.msra.mxu0 %v8616_v51  ;;  %v10571_v39 = vcombine.low %v3987_v1, %v3997_v27  ;;  %v4015_v34 = vor.u32 %v4014_v2, %v4010_v30  ;;  %v4638_v50 = vrot.slane %v10549_v35, 5  ;;  %v4502_v19 = vld [vmem:[#allocation2 + $0xb4] sm:$0xe] }
 0x205   : > { %8210 = vmatmul.mubr.bf16.gmra.mxu1 %v10367_v11  ;;  %8347 = vmatprep.subr.bf16.mxu0 %v8617_v12  ;;  %v4020_v8 = vrot.slane %v4018_v43, 5  ;;  %v4023_v29 = vshrl.u32 %v3764_v6, 16  ;;  %v4026_v11 = vshll.u32 %v3764_v6, 16  ;;  %v4641_v7 = vrot.slane %v10568_v44, 5  ;;  %v10622_v6 = vld [vmem:[#allocation2 + $0xb8] sm:$0xf] }
 0x206   : > { %8213 = vmatprep.mubr.bf16.mxu1 %v10416_v16  ;;  %8290 = vmatpush3.bf16.msra.mxu1 %v8605_v45  ;;  %v4006_v3 = vrot.slane %v4005_v57, 4  ;;  %v4016_v51 = vrot.slane %v4015_v34, 4  ;;  %v4640_v60 = vrot.slane %v4638_v50, 4  ;;  %v4032_v26 = vshll.u32 %v10470_v61, 16  ;;  %v10589_v45 = vld [vmem:[#allocation2 + $0xac] sm:$0xf] }
 0x207   : > { %8291 = vmatprep.subr.bf16.mxu1 %v8606_v38  ;;  %v4025_v4 = vrot.slane %v4023_v29, 4  ;;  %v4028_v63 = vrot.slane %v4026_v11, 5  ;;  %v4036_v15 = vshrl.u32 %v10470_v61, 16  ;;  %v4042_v46 = vshll.u32 %v10483_v37, 16  ;;  %v8615_v57 = vld [vmem:[%s12096_s5 + $0x188] sm:$0xff]  }
 0x208   : > { %v4011_v16 = vsel %vm9232_vm3, %v4006_v3, %v4010_v30  ;;  %8348 = vmatpush3.bf16.msra.mxu0 %v8617_v12  ;;  %v4021_v13 = vsel %vm9232_vm3, %v4016_v51, %v4020_v8  ;;  %v4642_v36 = vsel %vm9936_vm14, %v4640_v60, %v4641_v7  ;;  %v4034_v9 = vrot.slane %v4032_v26, 5  ;;  %v10638_v8 = vld [vmem:[#allocation2 + $0xbc] sm:$0x1]  ;;  %v4503_v26 = vld [vmem:[#allocation2 + $0xc0] sm:$0xe] }
 0x209   : > { %8381 = vmatprep.subr.bf16.mxu0 %v10578_v10  ;;  %v10600_v61 = vcombine.low %v4011_v16, %v4021_v13  ;;  %v4639_v48 = vsel %vm9936_vm14, %v7462_v40, %v4638_v50  ;;  %v4029_v31 = vor.u32 %v4028_v63, %v4025_v4  ;;  %v4038_v24 = vrot.slane %v4036_v15, 4  ;;  %v10646_v16 = vpop.f32.mrf.mxu0 }
 0x20a   : > { %8270 = vmatmul.mubr.bf16.gmra.mxu0 %v7491_v49  ;;  %8292 = vmatpush3.bf16.msra.mxu1 %v8606_v38  ;;  %v7494_v37 = vcombine.low %v4639_v48, %v4642_v36  ;;  %v4044_v53 = vrot.slane %v4042_v46, 5  ;;  %v7463_v21 = vrot.slane %v4501_v62, 9  ;;  %v4645_v14 = vrot.slane %v10589_v45, 5  ;;  %v10656_v46 = vld [vmem:[#allocation2 + $0xc4] sm:$0xf] }
 0x20b   : > { %8273 = vmatprep.mubr.bf16.mxu0 %v7492_v55  ;;  %8293 = vmatprep.subr.bf16.mxu1 %v8609_v59  ;;  %v4030_v49 = vrot.slane %v4029_v31, 4  ;;  %v4039_v56 = vor.u32 %v4038_v24, %v4034_v9  ;;  %v4047_v12 = vshrl.u32 %v3767_v0, 16  ;;  %v4050_v32 = vshll.u32 %v3767_v0, 16 }
 0x20c   : > { %v4647_v20 = vrot.slane %v4645_v14, 4  ;;  %v4648_v58 = vrot.slane %v10604_v52, 5  ;;  %v4056_v33 = vshll.u32 %v10505_v47, 16  ;;  %v4060_v55 = vshrl.u32 %v10505_v47, 16 }
 0x20d   : > { %8214 = vmatmul.mubr.bf16.gmra.mxu1 %v10442_v23  ;;  %v4040_v38 = vrot.slane %v4039_v56, 4  ;;  %v10620_v30 = vsel %vm9936_vm14, %v7463_v21, %v4645_v14  ;;  %v4049_v2 = vrot.slane %v4047_v12, 4  ;;  %v4052_v43 = vrot.slane %v4050_v32, 5 }
 0x20e   : > { %8217 = vmatprep.mubr.bf16.mxu1 %v10488_v28  ;;  %8294 = vmatpush3.bf16.msra.mxu1 %v8609_v59  ;;  %v10626_v23 = vsel %vm9936_vm14, %v4647_v20, %v4648_v58  ;;  %v4058_v1 = vrot.slane %v4056_v33, 5  ;;  %v4062_v47 = vrot.slane %v4060_v55, 4  ;;  %v4066_v27 = vshll.u32 %v10526_v22, 16  ;;  %v3770_v28 = vld [vmem:[#allocation2 + $0x9c] sm:$0xf] }
 0x20f   : > { %8295 = vmatprep.subr.bf16.mxu1 %v8612_v25  ;;  %v4035_v34 = vsel %vm9232_vm3, %v4030_v49, %v4034_v9  ;;  %v4045_v40 = vsel %vm9232_vm3, %v4040_v38, %v4044_v53  ;;  %v7495_v50 = vcombine.low %v10620_v30, %v10626_v23  ;;  %v4053_v3 = vor.u32 %v4052_v43, %v4049_v2  ;;  %v5373_v30 = vld [vmem:[#allocation2 + $0x18] sm:$0xf] }
 0x210   : > { %v10640_v29 = vcombine.low %v4035_v34, %v4045_v40  ;;  %v4063_v22 = vor.u32 %v4062_v47, %v4058_v1  ;;  %v7464_v11 = vrot.slane %v4502_v19, 9  ;;  %v4652_v62 = vrot.slane %v10622_v6, 5 }
 0x211   : > { %v4054_v59 = vrot.slane %v4053_v3, 4  ;;  %v4068_v51 = vrot.slane %v4066_v27, 5  ;;  %v4071_v60 = vshrl.u32 %v3770_v28, 16  ;;  %v4074_v7 = vshll.u32 %v3770_v28, 16 }
 0x212   : > { %8274 = vmatmul.mubr.bf16.gmra.mxu0 %v7493_v42  ;;  %8296 = vmatpush3.bf16.msra.mxu1 %v8612_v25  ;;  %v4064_v4 = vrot.slane %v4063_v22, 4  ;;  %v4654_v63 = vrot.slane %v4652_v62, 4  ;;  %v4655_v15 = vrot.slane %v10638_v8, 5  ;;  %v4080_v13 = vshll.u32 %v10549_v35, 16  ;;  %v10671_v25 = vpop.f32.mrf.mxu0  ;;  %v5375_v22 = vld [vmem:[#allocation2 + $0x20] sm:$0x1] }
 0x213   : > { %8277 = vmatprep.mubr.bf16.mxu0 %v7494_v37  ;;  %8297 = vmatprep.subr.bf16.mxu1 %v8615_v57  ;;  %v4059_v17 = vsel %vm9232_vm3, %v4054_v59, %v4058_v1  ;;  %v4073_v42 = vrot.slane %v4071_v60, 4  ;;  %v4076_v36 = vrot.slane %v4074_v7, 5  ;;  %v4084_v9 = vshrl.u32 %v10549_v35, 16  ;;  %v3773_v37 = vld [vmem:[#allocation2 + $0xa8] sm:$0xf] }
 0x214   : > { %v4069_v0 = vsel %vm9232_vm3, %v4064_v4, %v4068_v51  ;;  %v4656_v48 = vsel %vm9936_vm14, %v4654_v63, %v4655_v15  ;;  %v4082_v31 = vrot.slane %v4080_v13, 5  ;;  %v4090_v24 = vshll.u32 %v10568_v44, 16  ;;  %v10679_v47 = vpop.f32.mrf.mxu0 }
 0x215   : > { %8218 = vmatmul.mubr.bf16.gmra.mxu1 %v10520_v41  ;;  %v10665_v53 = vcombine.low %v4059_v17, %v4069_v0  ;;  %v4653_v35 = vsel %vm9936_vm14, %v7464_v11, %v4652_v62  ;;  %v4077_v21 = vor.u32 %v4076_v36, %v4073_v42  ;;  %v4086_v14 = vrot.slane %v4084_v9, 4  ;;  %v10669_v41 = vld [vmem:[#allocation2 + $0xc8] sm:$0x1]  ;;  %v3776_v62 = vld [vmem:[#allocation2 + $0xb4] sm:$0xf] }
 0x216   : > { %8221 = vmatprep.mubr.bf16.mxu1 %v10571_v39  ;;  %8298 = vmatpush3.bf16.msra.mxu1 %v8615_v57  ;;  %v7496_v49 = vcombine.low %v4653_v35, %v4656_v48  ;;  %v4092_v56 = vrot.slane %v4090_v24, 5  ;;  %v7465_v12 = vrot.slane %v4503_v26, 9  ;;  %v4659_v44 = vrot.slane %v10656_v46, 5  ;;  %v10691_v15 = vpop.f32.mrf.mxu0  ;;  %v5376_v48 = vld [vmem:[#allocation2 + $0x24] sm:$0xf] }
 0x217   : > { %8299 = vmatprep.subr.bf16.mxu1 %v8618_v18  ;;  %v4078_v32 = vrot.slane %v4077_v21, 4  ;;  %v4087_v39 = vor.u32 %v4086_v14, %v4082_v31  ;;  %v4095_v20 = vshrl.u32 %v3773_v37, 16  ;;  %v4098_v58 = vshll.u32 %v3773_v37, 16 }
 0x218   : > { %v4661_v33 = vrot.slane %v4659_v44, 4  ;;  %v4662_v55 = vrot.slane %v10669_v41, 5  ;;  %v4104_v19 = vshll.u32 %v10589_v45, 16  ;;  %v4108_v38 = vshrl.u32 %v10589_v45, 16  ;;  %v5374_v45 = vld [vmem:[#allocation2 + $0x1c] sm:$0xf] }
 0x219   : > { %v4088_v2 = vrot.slane %v4087_v39, 4  ;;  %v4660_v43 = vsel %vm9936_vm14, %v7465_v12, %v4659_v44  ;;  %v4097_v23 = vrot.slane %v4095_v20, 4  ;;  %v4100_v1 = vrot.slane %v4098_v58, 5  ;;  %v10702_v39 = vld [vmem:[#allocation2 + $0x28] sm:$0xf] }
 0x21a   : > { %8278 = vmatmul.mubr.bf16.gmra.mxu0 %v7495_v50  ;;  %8300 = vmatpush3.bf16.msra.mxu1 %v8618_v18  ;;  %v4663_v27 = vsel %vm9936_vm14, %v4661_v33, %v4662_v55  ;;  %v4106_v28 = vrot.slane %v4104_v19, 5  ;;  %v4110_v57 = vrot.slane %v4108_v38, 4  ;;  %v4114_v34 = vshll.u32 %v10604_v52, 16 }
 0x21b   : > { %8281 = vmatprep.mubr.bf16.mxu0 %v7496_v49  ;;  %8429 = vmatprep.subr.bf16.mxu1 %v10578_v10  ;;  %v4083_v40 = vsel %vm9232_vm3, %v4078_v32, %v4082_v31  ;;  %v4093_v50 = vsel %vm9232_vm3, %v4088_v2, %v4092_v56  ;;  %v4101_v3 = vor.u32 %v4100_v1, %v4097_v23  ;;  %v5422_v11 = vshrl.u32 %v5373_v30, 16  ;;  %v10698_v56 = vpop.f32.mrf.mxu0  ;;  %v3779_v1 = vld [vmem:[#allocation2 + $0xc0] sm:$0xf] }
 0x21c   : > { %v7497_v59 = vcombine.low %v4660_v43, %v4663_v27  ;;  %v4111_v51 = vor.u32 %v4110_v57, %v4106_v28  ;;  %v4116_v60 = vrot.slane %v4114_v34, 5  ;;  %v5425_v7 = vshll.u32 %v5373_v30, 16  ;;  %v5378_v43 = vld [vmem:[#allocation2 + $0x2c] sm:$0x1] }
 0x21d   : > { %8222 = vmatmul.mubr.bf16.gmra.mxu1 %v10600_v61  ;;  %v4102_v52 = vrot.slane %v4101_v3, 4  ;;  %v5424_v26 = vrot.slane %v5422_v11, 4  ;;  %v5431_v4 = vshll.u32 %v5374_v45, 16  ;;  %v5435_v63 = vshrl.u32 %v5374_v45, 16  ;;  %v10710_v57 = vpop.f32.mrf.mxu0 }
 0x21e   : > { %8225 = vmatprep.mubr.bf16.mxu1 %v10640_v29  ;;  %v4112_v13 = vrot.slane %v4111_v51, 4  ;;  %v5427_v18 = vrot.slane %v5425_v7, 5  ;;  %v5441_v17 = vshll.u32 %v5375_v22, 16  ;;  %v4119_v42 = vshrl.u32 %v3776_v62, 16 }
 0x21f   : > { %v7438_v36 = vcombine.low %v4083_v40, %v4093_v50  ;;  %v5433_v9 = vrot.slane %v5431_v4, 5  ;;  %v5437_v0 = vrot.slane %v5435_v63, 4  ;;  %v4122_v61 = vshll.u32 %v3776_v62, 16  ;;  %v5379_v63 = vld [vmem:[#allocation2 + $0x30] sm:$0xf] }
 0x220   : > { %v4107_v31 = vsel %vm9232_vm3, %v4102_v52, %v4106_v28  ;;  %v4117_v29 = vsel %vm9232_vm3, %v4112_v13, %v4116_v60  ;;  %v5428_v24 = vor.u32 %v5427_v18, %v5424_v26  ;;  %v4121_v37 = vrot.slane %v4119_v42, 4  ;;  %v10717_v13 = vpop.f32.mrf.mxu0 }
 0x221   : > { %v5438_v35 = vor.u32 %v5437_v0, %v5433_v9  ;;  %v5443_v21 = vrot.slane %v5441_v17, 5  ;;  %v4124_v14 = vrot.slane %v4122_v61, 5  ;;  %v4128_v49 = vshll.u32 %v10622_v6, 16 }
 0x222   : > { %8282 = vmatmul.mubr.bf16.gmra.mxu0 %v7497_v59  ;;  %v5429_v12 = vrot.slane %v5428_v24, 4  ;;  %v4132_v44 = vshrl.u32 %v10622_v6, 16  ;;  %v4138_v32 = vshll.u32 %v10638_v8, 16  ;;  %v5446_v20 = vshrl.u32 %v5376_v48, 16 }
 0x223   : > { %v5439_v58 = vrot.slane %v5438_v35, 4  ;;  %v4125_v33 = vor.u32 %v4124_v14, %v4121_v37  ;;  %v4130_v55 = vrot.slane %v4128_v49, 5  ;;  %v5449_v19 = vshll.u32 %v5376_v48, 16  ;;  %v10728_v35 = vld [vmem:[#allocation2 + $0x38] sm:$0x1] }
 0x224   : > { %v7439_v38 = vcombine.low %v4107_v31, %v4117_v29  ;;  %v5434_v30 = vsel %vm9232_vm3, %v5429_v12, %v5433_v9  ;;  %v4134_v2 = vrot.slane %v4132_v44, 4  ;;  %v5448_v23 = vrot.slane %v5446_v20, 4  ;;  %v10722_v9 = vld [vmem:[#allocation2 + $0x34] sm:$0xf]  ;;  %v5382_v44 = vld [vmem:[#allocation2 + $0x3c] sm:$0xf] }
 0x225   : > { %8226 = vmatmul.mubr.bf16.gmra.mxu1 %v10665_v53  ;;  %v5444_v6 = vsel %vm9232_vm3, %v5439_v58, %v5443_v21  ;;  %v4126_v8 = vrot.slane %v4125_v33, 4  ;;  %v5451_v27 = vrot.slane %v5449_v19, 5  ;;  %v5455_v28 = vshll.u32 %v10702_v39, 16  ;;  %v10736_v19 = vld [vmem:[#allocation2 + $0x40] sm:$0xf] }
 0x226   : > { %8229 = vmatprep.mubr.bf16.mxu1 %v7438_v36  ;;  %v7562_v34 = vcombine.low %v5434_v30, %v5444_v6  ;;  %v4135_v53 = vor.u32 %v4134_v2, %v4130_v55  ;;  %v4140_v45 = vrot.slane %v4138_v32, 5  ;;  %v5459_v40 = vshrl.u32 %v10702_v39, 16  ;;  %v10732_v32 = vpop.f32.mrf.mxu0 }
 0x227   : > { %v5452_v50 = vor.u32 %v5451_v27, %v5448_v23  ;;  %v5457_v3 = vrot.slane %v5455_v28, 5  ;;  %v5465_v22 = vshll.u32 %v5378_v43, 16  ;;  %v4143_v11 = vshrl.u32 %v3779_v1, 16  ;;  %v10748_v28 = vld [vmem:[#allocation2 + $0x44] sm:$0x1] }
 0x228   : > { %8349 = vmatprep.mubr.bf16.mxu0 %v7562_v34  ;;  %v4131_v62 = vsel %vm9232_vm3, %v4126_v8, %v4130_v55  ;;  %v4136_v59 = vrot.slane %v4135_v53, 4  ;;  %v5461_v51 = vrot.slane %v5459_v40, 4  ;;  %v4146_v60 = vshll.u32 %v3779_v1, 16  ;;  %v10724_v0 = vpop.f32.mrf.mxu1  ;;  %v10743_v1 = vld [vmem:[%s12096_s5 + $0x230] sm:$0xff]  }
 0x229   : > { %v5453_v7 = vrot.slane %v5452_v50, 4  ;;  %v4145_v52 = vrot.slane %v4143_v11, 4  ;;  %v4152_v26 = vshll.u32 %v10656_v46, 16  ;;  %v4156_v4 = vshrl.u32 %v10656_v46, 16 }
 0x22a   : > { %v4141_v18 = vsel %vm9232_vm3, %v4136_v59, %v4140_v45  ;;  %v5462_v17 = vor.u32 %v5461_v51, %v5457_v3  ;;  %v4148_v42 = vrot.slane %v4146_v60, 5  ;;  %v4162_v36 = vshll.u32 %v10669_v41, 16  ;;  %v5385_v51 = vld [vmem:[#allocation2 + $0x48] sm:$0xf] }
 0x22b   : > { %v7440_v61 = vcombine.low %v4131_v62, %v4141_v18  ;;  %v5467_v48 = vrot.slane %v5465_v22, 5  ;;  %v4154_v31 = vrot.slane %v4152_v26, 5  ;;  %v4158_v29 = vrot.slane %v4156_v4, 4 }
 0x22c   : > { %v5458_v46 = vsel %vm9232_vm3, %v5453_v7, %v5457_v3  ;;  %v5463_v24 = vrot.slane %v5462_v17, 4  ;;  %v4149_v37 = vor.u32 %v4148_v42, %v4145_v52  ;;  %v5470_v21 = vshrl.u32 %v5379_v63, 16  ;;  %v8619_v52 = vld [vmem:[#allocation2 + $0x18] sm:$0xff]   ;;  %v10763_v17 = vld [vmem:[%s12096_s5 + $0x228] sm:$0xff]  }
 0x22d   : > { %8230 = vmatmul.mubr.bf16.gmra.mxu1 %v7439_v38  ;;  %v4159_v14 = vor.u32 %v4158_v29, %v4154_v31  ;;  %v5473_v41 = vshll.u32 %v5379_v63, 16  ;;  %v5479_v49 = vshll.u32 %v10722_v9, 16  ;;  %v5483_v12 = vshrl.u32 %v10722_v9, 16  ;;  %v10738_v38 = vpop.f32.mrf.mxu1 }
 0x22e   : > { %8233 = vmatprep.mubr.bf16.mxu1 %v7440_v61  ;;  %v5468_v20 = vsel %vm9232_vm3, %v5463_v24, %v5467_v48  ;;  %v4150_v58 = vrot.slane %v4149_v37, 4  ;;  %v4164_v33 = vrot.slane %v4162_v36, 5  ;;  %v5472_v55 = vrot.slane %v5470_v21, 4  ;;  %v10766_v48 = vld [vmem:[#allocation2 + $0x4c] sm:$0xf] }
 0x22f   : > { %v7563_v30 = vcombine.low %v5458_v46, %v5468_v20  ;;  %v4160_v2 = vrot.slane %v4159_v14, 4  ;;  %v5475_v43 = vrot.slane %v5473_v41, 5  ;;  %v5481_v23 = vrot.slane %v5479_v49, 5  ;;  %v8016_v60 = vpop.f32.mrf.mxu1  ;;  %v10774_v24 = vld [vmem:[#allocation2 + $0x50] sm:$0x1] }
 0x230   : > { %v4155_v6 = vsel %vm9232_vm3, %v4150_v58, %v4154_v31  ;;  %v5485_v8 = vrot.slane %v5483_v12, 4  ;;  %v5489_v27 = vshll.u32 %v10728_v35, 16  ;;  %v5494_v34 = vshrl.u32 %v5382_v44, 16  ;;  %v10753_v3 = vpop.f32.mrf.mxu0 }
 0x231   : > { %8350 = vmatmul.mubr.bf16.vlgmr.msra.gmra.mxu0 %v7563_v30  ;;  %v4165_v53 = vsel %vm9232_vm3, %v4160_v2, %v4164_v33  ;;  %v5476_v45 = vor.u32 %v5475_v43, %v5472_v55  ;;  %v5497_v40 = vshll.u32 %v5382_v44, 16  ;;  %v5503_v50 = vshll.u32 %v10736_v19, 16  ;;  %v10780_v12 = vpop.f32.mrf.mxu1  ;;  %v10789_v33 = vld [vmem:[%s12096_s5 + $0x220] sm:$0xff]  }
 0x232   : > { %v7441_v22 = vcombine.low %v4155_v6, %v4165_v53  ;;  %v5486_v11 = vor.u32 %v5485_v8, %v5481_v23  ;;  %v5496_v62 = vrot.slane %v5494_v34, 4  ;;  %v5507_v59 = vshrl.u32 %v10736_v19, 16  ;;  %8382 = vmatpush3.bf16.msra.mxu0 %v10578_v10  ;;  %v10758_v18 = vpop.f32.mrf.mxu0  ;;  %v10798_v34 = vld [vmem:[#allocation2 + $0x58] sm:$0xf] }
 0x233   : > { %v5477_v7 = vrot.slane %v5476_v45, 4  ;;  %v5499_v26 = vrot.slane %v5497_v40, 5  ;;  %v5505_v4 = vrot.slane %v5503_v50, 5  ;;  %v5513_v63 = vshll.u32 %v10748_v28, 16  ;;  %8383 = vmatprep.subr.bf16.mxu0 %v10743_v1  ;;  %v8621_v40 = vld [vmem:[#allocation2 + $0x24] sm:$0xff]  }
 0x234   : > { %v5487_v42 = vrot.slane %v5486_v11, 4  ;;  %v5491_v36 = vrot.slane %v5489_v27, 5  ;;  %v5509_v61 = vrot.slane %v5507_v59, 4  ;;  %v10772_v46 = vadd.f32 %v10646_v16, %v10724_v0  ;;  %v10776_v37 = vpop.f32.mrf.mxu0  ;;  %v10807_v11 = vld [vmem:[#allocation2 + $0x5c] sm:$0x1] }
 0x235   : > { %8234 = vmatmul.mubr.bf16.gmra.mxu1 %v7441_v22  ;;  %v5482_v31 = vsel %vm9232_vm3, %v5477_v7, %v5481_v23  ;;  %v5500_v29 = vor.u32 %v5499_v26, %v5496_v62  ;;  %v5515_v41 = vrot.slane %v5513_v63, 5  ;;  %v5518_v49 = vshrl.u32 %v5385_v51, 16  ;;  %v5388_v23 = vld [vmem:[#allocation2 + $0x54] sm:$0xf]  ;;  %v5391_v63 = vld [vmem:[#allocation2 + $0x60] sm:$0xf] }
 0x236   : > { %8301 = vmatprep.mubr.bf16.mxu1 %v8619_v52  ;;  %v5492_v21 = vsel %vm9232_vm3, %v5487_v42, %v5491_v36  ;;  %v5510_v14 = vor.u32 %v5509_v61, %v5505_v4  ;;  %8384 = vmatpush3.bf16.msra.mxu0 %v10743_v1  ;;  %v5521_v58 = vshll.u32 %v5385_v51, 16  ;;  %v5527_v16 = vshll.u32 %v10766_v48, 16  ;;  %v10784_v0 = vpop.f32.mrf.mxu0  ;;  %v8622_v51 = vld [vmem:[#allocation2 + $0x30] sm:$0xff]   ;;  %v10818_v36 = vld [vmem:[%s12096_s5 + $0x218] sm:$0xff]  }
 0x237   : > { %v7564_v44 = vcombine.low %v5482_v31, %v5492_v21  ;;  %v5501_v20 = vrot.slane %v5500_v29, 4  ;;  %8385 = vmatprep.subr.bf16.mxu0 %v10763_v17  ;;  %v5520_v30 = vrot.slane %v5518_v49, 4  ;;  %v5531_v2 = vshrl.u32 %v10766_v48, 16 }
 0x238   : > { %v5511_v55 = vrot.slane %v5510_v14, 4  ;;  %v5537_v43 = vshll.u32 %v10774_v24, 16  ;;  %v5523_v6 = vrot.slane %v5521_v58, 5  ;;  %v5529_v8 = vrot.slane %v5527_v16, 5  ;;  %v10825_v14 = vld [vmem:[#allocation2 + $0x64] sm:$0xf] }
 0x239   : > { %8353 = vmatprep.mubr.bf16.mxu0 %v7564_v44  ;;  %v10796_v27 = vadd.f32 %v10671_v25, %v10738_v38  ;;  %v5506_v53 = vsel %vm9232_vm3, %v5501_v20, %v5505_v4  ;;  %v5533_v50 = vrot.slane %v5531_v2, 4  ;;  %v10805_v22 = vadd.f32 %v10679_v47, %v8016_v60 }
 0x23a   : > { %v5516_v45 = vsel %vm9232_vm3, %v5511_v55, %v5515_v41  ;;  %v8019_v62 = vpop.f32.mrf.mxu1  ;;  %8386 = vmatpush3.bf16.msra.mxu0 %v10763_v17  ;;  %v5524_v38 = vor.u32 %v5523_v6, %v5520_v30  ;;  %v5539_v59 = vrot.slane %v5537_v43, 5  ;;  %v5542_v7 = vshrl.u32 %v5388_v23, 16  ;;  %v10832_v30 = vld [vmem:[#allocation2 + $0x68] sm:$0x1] }
 0x23b   : > { %v7565_v25 = vcombine.low %v5506_v53, %v5516_v45  ;;  %v10810_v52 = vpop.f32.mrf.mxu0  ;;  %8387 = vmatprep.subr.bf16.mxu0 %v10789_v33  ;;  %v5534_v26 = vor.u32 %v5533_v50, %v5529_v8  ;;  %v5545_v4 = vshll.u32 %v5388_v23, 16  ;;  %v5551_v47 = vshll.u32 %v10798_v34, 16 }
 0x23c   : > { %v5555_v60 = vshrl.u32 %v10798_v34, 16  ;;  %v2447_v42 = vpop.f32.mrf.mxu1  ;;  %v5525_v61 = vrot.slane %v5524_v38, 4  ;;  %v5544_v31 = vrot.slane %v5542_v7, 4  ;;  %v5561_v29 = vshll.u32 %v10807_v11, 16 }
 0x23d   : > { %8302 = vmatmul.mubr.bf16.vlgmr.msra.gmra.mxu1 %v8621_v40  ;;  %8354 = vmatmul.mubr.bf16.gmra.mxu0 %v7565_v25  ;;  %v10823_v21 = vadd.f32 %v10698_v56, %v8019_v62  ;;  %v10827_v41 = vpop.f32.mrf.mxu0  ;;  %v5535_v49 = vrot.slane %v5534_v26, 4  ;;  %v5547_v44 = vrot.slane %v5545_v4, 5  ;;  %v5553_v20 = vrot.slane %v5551_v47, 5  ;;  %v8624_v62 = vld [vmem:[#allocation2 + $0x3c] sm:$0xff]   ;;  %v5394_v47 = vld [vmem:[#allocation2 + $0x6c] sm:$0xf] }
 0x23e   : > { %8437 = vmatpush3.bf16.msra.mxu1 %v10578_v10  ;;  %8305 = vmatprep.mubr.bf16.mxu1 %v8622_v51  ;;  %v5557_v58 = vrot.slane %v5555_v60, 4  ;;  %v8020_v16 = vpop.f32.mrf.mxu1  ;;  %v5530_v10 = vsel %vm9232_vm3, %v5525_v61, %v5529_v8  ;;  %v5563_v55 = vrot.slane %v5561_v29, 5  ;;  %v5566_v56 = vshrl.u32 %v5391_v63, 16  ;;  %v10844_v8 = vld [vmem:[%s12096_s5 + $0x210] sm:$0xff]  }
 0x23f   : > { %8430 = vmatprep.subr.bf16.mxu1 %v10743_v1  ;;  %v5569_v2 = vshll.u32 %v5391_v63, 16  ;;  %v10834_v43 = vpop.f32.mrf.mxu0  ;;  %8388 = vmatpush3.bf16.msra.mxu0 %v10789_v33  ;;  %v5540_v23 = vsel %vm9232_vm3, %v5535_v49, %v5539_v59  ;;  %v5548_v6 = vor.u32 %v5547_v44, %v5544_v31  ;;  %v5575_v45 = vshll.u32 %v10825_v14, 16  ;;  %v8625_v31 = vld [vmem:[#allocation2 + $0x48] sm:$0xff]   ;;  %v10860_v44 = vld [vmem:[#allocation2 + $0x74] sm:$0x1] }
 0x240   : > { %v5558_v53 = vor.u32 %v5557_v58, %v5553_v20  ;;  %v2450_v40 = vpop.f32.mrf.mxu1  ;;  %8389 = vmatprep.subr.bf16.mxu0 %v10818_v36  ;;  %v7566_v50 = vcombine.low %v5530_v10, %v5540_v23  ;;  %v5568_v25 = vrot.slane %v5566_v56, 4  ;;  %v5579_v51 = vshrl.u32 %v10825_v14, 16 }
 0x241   : > { %v5571_v38 = vrot.slane %v5569_v2, 5  ;;  %v5549_v59 = vrot.slane %v5548_v6, 4  ;;  %v5577_v26 = vrot.slane %v5575_v45, 5  ;;  %v5585_v4 = vshll.u32 %v10832_v30, 16  ;;  %v10850_v60 = vpop.f32.mrf.mxu0  ;;  %v5397_v6 = vld [vmem:[#allocation2 + $0x78] sm:$0xf] }
 0x242   : > { %8438 = vmatpush3.bf16.msra.mxu1 %v10743_v1  ;;  %v5559_v7 = vrot.slane %v5558_v53, 4  ;;  %8357 = vmatprep.mubr.bf16.mxu0 %v7566_v50  ;;  %v5581_v61 = vrot.slane %v5579_v51, 4  ;;  %v10853_v29 = vadd.f32 %v10710_v57, %v2447_v42  ;;  %v10856_v49 = vadd.f32 %v10717_v13, %v8020_v16  ;;  %v10858_v1 = vld [vmem:[#allocation2 + $0x70] sm:$0xf] }
 0x243   : > { %8431 = vmatprep.subr.bf16.mxu1 %v10763_v17  ;;  %v5572_v63 = vor.u32 %v5571_v38, %v5568_v25  ;;  %8390 = vmatpush3.bf16.msra.mxu0 %v10818_v36  ;;  %v5554_v58 = vsel %vm9232_vm3, %v5549_v59, %v5553_v20  ;;  %v5587_v56 = vrot.slane %v5585_v4, 5  ;;  %v10868_v57 = vadd.f32 %v10732_v32, %v2450_v40  ;;  %v10875_v20 = vld [vmem:[%s12096_s5 + $0x208] sm:$0xff]   ;;  %v10880_v40 = vld [vmem:[#allocation2 + $0x7c] sm:$0xf] }
 0x244   : > { %12133 = vst [vmem:[#allocation6_spill] sm:$0xff] %v10856_v49  ;;  %v5564_v10 = vsel %vm9232_vm3, %v5559_v7, %v5563_v55  ;;  %v8023_v42 = vpop.f32.mrf.mxu1  ;;  %8391 = vmatprep.subr.bf16.mxu0 %v10844_v8  ;;  %v5582_v2 = vor.u32 %v5581_v61, %v5577_v26  ;;  %v5590_v23 = vshrl.u32 %v5394_v47, 16  ;;  %v5593_v55 = vshll.u32 %v5394_v47, 16 }
 0x245   : > { %8306 = vmatmul.mubr.bf16.gmra.mxu1 %v8624_v62  ;;  %12134 = vst [vmem:[#allocation7_spill] sm:$0xff] %v10868_v57  ;;  %v7567_v13 = vcombine.low %v5554_v58, %v5564_v10  ;;  %v5573_v16 = vrot.slane %v5572_v63, 4  ;;  %v5599_v32 = vshll.u32 %v10858_v1, 16  ;;  %v5603_v53 = vshrl.u32 %v10858_v1, 16  ;;  %v10890_v63 = vld [vmem:[#allocation2 + $0x80] sm:$0x1] }
 0x246   : > { %8309 = vmatprep.mubr.bf16.mxu1 %v8625_v31  ;;  %8439 = vmatpush3.bf16.msra.mxu1 %v10763_v17  ;;  %v5609_v45 = vshll.u32 %v10860_v44, 16  ;;  %v2463_v50 = vpop.f32.mrf.mxu1  ;;  %v10882_v62 = vpop.f32.mrf.mxu0  ;;  %v5583_v25 = vrot.slane %v5582_v2, 4  ;;  %v5592_v38 = vrot.slane %v5590_v23, 4  ;;  %v10888_v51 = vadd.f32 %v10753_v3, %v8023_v42  ;;  %v8627_v2 = vld [vmem:[#allocation2 + $0x54] sm:$0xff]  }
 0x247   : > { %8432 = vmatprep.subr.bf16.mxu1 %v10789_v33  ;;  %8358 = vmatmul.mubr.bf16.gmra.mxu0 %v7567_v13  ;;  %v5578_v17 = vsel %vm9232_vm3, %v5573_v16, %v5577_v26  ;;  %v5595_v59 = vrot.slane %v5593_v55, 5  ;;  %v5601_v7 = vrot.slane %v5599_v32, 5  ;;  %v5605_v4 = vrot.slane %v5603_v53, 4  ;;  %v5400_v32 = vld [vmem:[#allocation2 + $0x84] sm:$0xf] }
 0x248   : > { %12135 = vst [vmem:[#allocation8_spill] sm:$0xff] %v10888_v51  ;;  %v5611_v47 = vrot.slane %v5609_v45, 5  ;;  %v8024_v61 = vpop.f32.mrf.mxu1  ;;  %v10892_v31 = vpop.f32.mrf.mxu0  ;;  %8392 = vmatpush3.bf16.msra.mxu0 %v10844_v8  ;;  %v5588_v58 = vsel %vm9232_vm3, %v5583_v25, %v5587_v56  ;;  %v5614_v26 = vshrl.u32 %v5397_v6, 16  ;;  %v5617_v10 = vshll.u32 %v5397_v6, 16  ;;  %v10913_v51 = vld [vmem:[#allocation2 + $0x88] sm:$0xf] }
 0x249   : > { %v5623_v13 = vshll.u32 %v10880_v40, 16  ;;  %8393 = vmatprep.subr.bf16.mxu0 %v10875_v20  ;;  %v7568_v3 = vcombine.low %v5578_v17, %v5588_v58  ;;  %v5596_v42 = vor.u32 %v5595_v59, %v5592_v38  ;;  %v5606_v16 = vor.u32 %v5605_v4, %v5601_v7  ;;  %v10908_v17 = vld [vmem:[%s12096_s5 + $0x200] sm:$0xff]  }
 0x24a   : > { %8440 = vmatpush3.bf16.msra.mxu1 %v10789_v33  ;;  %v5627_v23 = vshrl.u32 %v10880_v40, 16  ;;  %v2466_v55 = vpop.f32.mrf.mxu1  ;;  %v10901_v53 = vpop.f32.mrf.mxu0  ;;  %v5616_v56 = vrot.slane %v5614_v26, 4  ;;  %v5619_v6 = vrot.slane %v5617_v10, 5  ;;  %v5633_v25 = vshll.u32 %v10890_v63, 16  ;;  %v8628_v33 = vld [vmem:[#allocation2 + $0x60] sm:$0xff]  }
 0x24b   : > { %8433 = vmatprep.subr.bf16.mxu1 %v10818_v36  ;;  %v5625_v45 = vrot.slane %v5623_v13, 5  ;;  %8361 = vmatprep.mubr.bf16.mxu0 %v7568_v3  ;;  %v5597_v38 = vrot.slane %v5596_v42, 4  ;;  %v5607_v59 = vrot.slane %v5606_v16, 4  ;;  %v10911_v58 = vadd.f32 %v10758_v18, %v2463_v50  ;;  %v10923_v3 = vld [vmem:[#allocation2 + $0x8c] sm:$0x1] }
 0x24c   : > { %v5629_v4 = vrot.slane %v5627_v23, 4  ;;  %v10915_v26 = vpop.f32.mrf.mxu0  ;;  %v5620_v10 = vor.u32 %v5619_v6, %v5616_v56  ;;  %v5635_v13 = vrot.slane %v5633_v25, 5  ;;  %v10918_v57 = vadd.f32 %v10776_v37, %v8024_v61  ;;  %12139 = vst [vmem:[#allocation12_spill] sm:$0xff] %v10923_v3  ;;  %8394 = vmatpush3.bf16.msra.mxu0 %v10875_v20  ;;  %v5403_v23 = vld [vmem:[#allocation2 + $0x90] sm:$0xf] }
 0x24d   : > { %8310 = vmatmul.mubr.bf16.gmra.mxu1 %v8627_v2  ;;  %12136 = vst [vmem:[#allocation9_spill] sm:$0xff] %v10911_v58  ;;  %v10921_v49 = vadd.f32 %v10784_v0, %v2466_v55  ;;  %v5602_v18 = vsel %vm9232_vm3, %v5597_v38, %v5601_v7  ;;  %v5612_v50 = vsel %vm9232_vm3, %v5607_v59, %v5611_v47  ;;  %v5638_v16 = vshrl.u32 %v5400_v32, 16  ;;  %v10938_v25 = vld [vmem:[#allocation2 + $0x94] sm:$0xf] }
 0x24e   : > { %8313 = vmatprep.mubr.bf16.mxu1 %v8628_v33  ;;  %12137 = vst [vmem:[#allocation10_spill] sm:$0xff] %v10918_v57  ;;  %8441 = vmatpush3.bf16.msra.mxu1 %v10818_v36  ;;  %v5630_v42 = vor.u32 %v5629_v4, %v5625_v45  ;;  %v7569_v37 = vcombine.low %v5602_v18, %v5612_v50  ;;  %v5621_v61 = vrot.slane %v5620_v10, 4  ;;  %v5641_v0 = vshll.u32 %v5400_v32, 16  ;;  %v10933_v55 = vpop.f32.mrf.mxu0  ;;  %v10945_v4 = vld [vmem:[#allocation2 + $0x98] sm:$0x1] }
 0x24f   : > { %12138 = vst [vmem:[#allocation11_spill] sm:$0xff] %v10921_v49  ;;  %8434 = vmatprep.subr.bf16.mxu1 %v10844_v8  ;;  %v5647_v2 = vshll.u32 %v10913_v51, 16  ;;  %8395 = vmatprep.subr.bf16.mxu0 %v10908_v17  ;;  %v5640_v7 = vrot.slane %v5638_v16, 4  ;;  %v5651_v47 = vshrl.u32 %v10913_v51, 16  ;;  %v5657_v56 = vshll.u32 %v10923_v3, 16  ;;  %12141 = vst [vmem:[#allocation14_spill] sm:$0xff] %v10945_v4 }
 0x250   : > { %v5631_v36 = vrot.slane %v5630_v42, 4  ;;  %v8027_v6 = vpop.f32.mrf.mxu1  ;;  %8362 = vmatmul.mubr.bf16.gmra.mxu0 %v7569_v37  ;;  %v5626_v32 = vsel %vm9232_vm3, %v5621_v61, %v5625_v45  ;;  %v5643_v33 = vrot.slane %v5641_v0, 5  ;;  %v10947_v10 = vpop.f32.mrf.mxu0  ;;  %v8630_v16 = vld [vmem:[#allocation2 + $0x6c] sm:$0xff]   ;;  %v5662_v37 = vshrl.u32 %v5403_v23, 16 }
 0x251   : > { %v5649_v38 = vrot.slane %v5647_v2, 5  ;;  %v10943_v59 = vadd.f32 %v10810_v52, %v8027_v6  ;;  %v5653_v50 = vrot.slane %v5651_v47, 4  ;;  %v5659_v42 = vrot.slane %v5657_v56, 5  ;;  %8396 = vmatpush3.bf16.msra.mxu0 %v10908_v17  ;;  %v8631_v2 = vld [vmem:[#allocation2 + $0x78] sm:$0xff]  }
 0x252   : > { %8442 = vmatpush3.bf16.msra.mxu1 %v10844_v8  ;;  %v5636_v18 = vsel %vm9232_vm3, %v5631_v36, %v5635_v13  ;;  %v2479_v49 = vpop.f32.mrf.mxu1  ;;  %v5644_v45 = vor.u32 %v5643_v33, %v5640_v7  ;;  %v5665_v61 = vshll.u32 %v5403_v23, 16  ;;  %v5671_v0 = vshll.u32 %v10938_v25, 16  ;;  %v10955_v6 = vpop.f32.mrf.mxu0  ;;  %v10962_v7 = vld [vmem:[#allocation2 + $0xa0] sm:$0xf] }
 0x253   : > { %12140 = vst [vmem:[#allocation13_spill] sm:$0xff] %v10943_v59  ;;  %8435 = vmatprep.subr.bf16.mxu1 %v10875_v20  ;;  %v7570_v52 = vcombine.low %v5626_v32, %v5636_v18  ;;  %v5654_v8 = vor.u32 %v5653_v50, %v5649_v38  ;;  %v5664_v13 = vrot.slane %v5662_v37, 4  ;;  %v5675_v36 = vshrl.u32 %v10938_v25, 16  ;;  %v5406_v59 = vld [vmem:[#allocation2 + $0x9c] sm:$0xf]  ;;  %12143 = vst [vmem:[#allocation16_spill] sm:$0xff] %v10962_v7 }
 0x254   : > { %v5681_v47 = vshll.u32 %v10945_v4, 16  ;;  %v8028_v56 = vpop.f32.mrf.mxu1  ;;  %v5645_v57 = vrot.slane %v5644_v45, 4  ;;  %v5667_v58 = vrot.slane %v5665_v61, 5  ;;  %v5673_v32 = vrot.slane %v5671_v0, 5  ;;  %v10964_v33 = vpop.f32.mrf.mxu0 }
 0x255   : > { %8314 = vmatmul.mubr.bf16.gmra.mxu1 %v8630_v16  ;;  %8365 = vmatprep.mubr.bf16.mxu0 %v7570_v52  ;;  %v10960_v23 = vadd.f32 %v10827_v41, %v2479_v49  ;;  %v5655_v18 = vrot.slane %v5654_v8, 4  ;;  %v5677_v50 = vrot.slane %v5675_v36, 4  ;;  %v10967_v37 = vadd.f32 %v10834_v43, %v8028_v56  ;;  %v10975_v49 = vld [vmem:[#allocation2 + $0xa4] sm:$0x1]  ;;  %v5409_v36 = vld [vmem:[#allocation2 + $0xa8] sm:$0xf] }
 0x256   : > { %8317 = vmatprep.mubr.bf16.mxu1 %v8631_v2  ;;  %v5683_v16 = vrot.slane %v5681_v47, 5  ;;  %v2482_v4 = vpop.f32.mrf.mxu1  ;;  %8443 = vmatpush3.bf16.msra.mxu1 %v10875_v20  ;;  %v5650_v52 = vsel %vm9232_vm3, %v5645_v57, %v5649_v38  ;;  %v5668_v45 = vor.u32 %v5667_v58, %v5664_v13  ;;  %12146 = vst [vmem:[#allocation19_spill] sm:$0xff] %v10975_v49  ;;  %v5686_v61 = vshrl.u32 %v5406_v59, 16 }
 0x257   : > { %12142 = vst [vmem:[#allocation15_spill] sm:$0xff] %v10960_v23  ;;  %12144 = vst [vmem:[#allocation17_spill] sm:$0xff] %v10967_v37  ;;  %v10973_v41 = vadd.f32 %v10850_v60, %v2482_v4  ;;  %v10977_v0 = vpop.f32.mrf.mxu0  ;;  %8436 = vmatprep.subr.bf16.mxu1 %v10908_v17  ;;  %v5660_v43 = vsel %vm9232_vm3, %v5655_v18, %v5659_v42  ;;  %v5678_v2 = vor.u32 %v5677_v50, %v5673_v32  ;;  %v8633_v4 = vld [vmem:[#allocation2 + $0x84] sm:$0xff]   ;;  %v10987_v42 = vld [vmem:[#allocation2 + $0xac] sm:$0xf] }
 0x258   : > { %v5689_v8 = vshll.u32 %v5406_v59, 16  ;;  %v5695_v20 = vshll.u32 %v10962_v7, 16  ;;  %v7571_v57 = vcombine.low %v5650_v52, %v5660_v43  ;;  %v5669_v58 = vrot.slane %v5668_v45, 4  ;;  %12147 = vst [vmem:[#allocation20_spill] sm:$0xff] %v10987_v42  ;;  %v10995_v52 = vld [vmem:[#allocation2 + $0xb0] sm:$0x1] }
 0x259   : > { %12145 = vst [vmem:[#allocation18_spill] sm:$0xff] %v10973_v41  ;;  %v5688_v38 = vrot.slane %v5686_v61, 4  ;;  %v5699_v60 = vshrl.u32 %v10962_v7, 16  ;;  %v10984_v13 = vpop.f32.mrf.mxu0  ;;  %v5679_v47 = vrot.slane %v5678_v2, 4  ;;  %v5705_v37 = vshll.u32 %v10975_v49, 16  ;;  %v8031_v23 = vpop.f32.mrf.mxu1  ;;  %12149 = vst [vmem:[#allocation22_spill] sm:$0xff] %v10995_v52 }
 0x25a   : > { %v5691_v56 = vrot.slane %v5689_v8, 5  ;;  %v5697_v41 = vrot.slane %v5695_v20, 5  ;;  %8444 = vmatpush3.bf16.msra.mxu1 %v10908_v17  ;;  %8366 = vmatmul.mubr.bf16.gmra.mxu0 %v7571_v57  ;;  %v5674_v59 = vsel %vm9232_vm3, %v5669_v58, %v5673_v32  ;;  %v10993_v50 = vadd.f32 %v10882_v62, %v8031_v23  ;;  %v8634_v61 = vld [vmem:[#allocation2 + $0x90] sm:$0xff]  }
 0x25b   : > { %v5701_v18 = vrot.slane %v5699_v60, 4  ;;  %v5710_v45 = vshrl.u32 %v5409_v36, 16  ;;  %v10997_v43 = vpop.f32.mrf.mxu0  ;;  %v5684_v2 = vsel %vm9232_vm3, %v5679_v47, %v5683_v16  ;;  %v5707_v20 = vrot.slane %v5705_v37, 5  ;;  %v2495_v57 = vpop.f32.mrf.mxu1 }
 0x25c   : > { %12148 = vst [vmem:[#allocation21_spill] sm:$0xff] %v10993_v50  ;;  %v5692_v8 = vor.u32 %v5691_v56, %v5688_v38  ;;  %v5713_v17 = vshll.u32 %v5409_v36, 16  ;;  %v7572_v49 = vcombine.low %v5674_v59, %v5684_v2  ;;  %v5719_v62 = vshll.u32 %v10987_v42, 16  ;;  %v5412_v38 = vld [vmem:[#allocation2 + $0xb4] sm:$0xf] }
 0x25d   : > { %8318 = vmatmul.mubr.bf16.gmra.mxu1 %v8633_v4  ;;  %v5702_v32 = vor.u32 %v5701_v18, %v5697_v41  ;;  %v5712_v58 = vrot.slane %v5710_v45, 4  ;;  %v11002_v23 = vpop.f32.mrf.mxu0  ;;  %v5723_v7 = vshrl.u32 %v10987_v42, 16  ;;  %v5729_v3 = vshll.u32 %v10995_v52, 16  ;;  %v8032_v16 = vpop.f32.mrf.mxu1  ;;  %v11012_v56 = vld [vmem:[#allocation2 + $0xb8] sm:$0xf] }
 0x25e   : > { %8321 = vmatprep.mubr.bf16.mxu1 %v8634_v61  ;;  %v5693_v60 = vrot.slane %v5692_v8, 4  ;;  %v5715_v50 = vrot.slane %v5713_v17, 5  ;;  %8369 = vmatprep.mubr.bf16.mxu0 %v7572_v49  ;;  %v5721_v36 = vrot.slane %v5719_v62, 5  ;;  %v11007_v4 = vadd.f32 %v10892_v31, %v2495_v57  ;;  %12152 = vst [vmem:[#allocation25_spill] sm:$0xff] %v11012_v56  ;;  %v11016_v8 = vld [vmem:[#allocation2 + $0xbc] sm:$0x1] }
 0x25f   : > { %v5703_v37 = vrot.slane %v5702_v32, 4  ;;  %v11010_v47 = vadd.f32 %v10901_v53, %v8032_v16  ;;  %v5725_v45 = vrot.slane %v5723_v7, 4  ;;  %v5731_v61 = vrot.slane %v5729_v3, 5  ;;  %v2498_v2 = vpop.f32.mrf.mxu1  ;;  %12153 = vst [vmem:[#allocation26_spill] sm:$0xff] %v11016_v8  ;;  %v8636_v3 = vld [vmem:[#allocation2 + $0x9c] sm:$0xff]  }
 0x260   : > { %12150 = vst [vmem:[#allocation23_spill] sm:$0xff] %v11007_v4  ;;  %v5698_v59 = vsel %vm9232_vm3, %v5693_v60, %v5697_v41  ;;  %v5716_v18 = vor.u32 %v5715_v50, %v5712_v58  ;;  %v11021_v31 = vadd.f32 %v10915_v26, %v2498_v2  ;;  %v5734_v17 = vshrl.u32 %v5412_v38, 16  ;;  %v11023_v57 = vpop.f32.mrf.mxu0  ;;  %v5415_v50 = vld [vmem:[#allocation2 + $0xc0] sm:$0xf]  ;;  %v8637_v58 = vld [vmem:[#allocation2 + $0xa8] sm:$0xff]  }
 0x261   : > { %12151 = vst [vmem:[#allocation24_spill] sm:$0xff] %v11010_v47  ;;  %v5708_v49 = vsel %vm9232_vm3, %v5703_v37, %v5707_v20  ;;  %v5737_v53 = vshll.u32 %v5412_v38, 16  ;;  %v5726_v16 = vor.u32 %v5725_v45, %v5721_v36  ;;  %v5743_v41 = vshll.u32 %v11012_v56, 16  ;;  %v11028_v37 = vld [vmem:[#allocation2 + $0xc4] sm:$0xf] }
 0x262   : > { %12154 = vst [vmem:[#allocation27_spill] sm:$0xff] %v11021_v31  ;;  %v7573_v32 = vcombine.low %v5698_v59, %v5708_v49  ;;  %v5717_v62 = vrot.slane %v5716_v18, 4  ;;  %v8035_v7 = vpop.f32.mrf.mxu1  ;;  %v5736_v60 = vrot.slane %v5734_v17, 4  ;;  %v5747_v20 = vshrl.u32 %v11012_v56, 16  ;;  %v11030_v38 = vpop.f32.mrf.mxu0  ;;  %v11037_v4 = vld [vmem:[#allocation2 + $0xc8] sm:$0x1] }
 0x263   : > { %v5739_v47 = vrot.slane %v5737_v53, 5  ;;  %v5753_v26 = vshll.u32 %v11016_v8, 16  ;;  %v5727_v18 = vrot.slane %v5726_v16, 4  ;;  %v5745_v45 = vrot.slane %v5743_v41, 5 }
 0x264   : > { %8370 = vmatmul.mubr.bf16.gmra.mxu0 %v7573_v32  ;;  %v5722_v59 = vsel %vm9232_vm3, %v5717_v62, %v5721_v36  ;;  %v11035_v2 = vadd.f32 %v10933_v55, %v8035_v7  ;;  %v2511_v49 = vpop.f32.mrf.mxu1  ;;  %v5749_v53 = vrot.slane %v5747_v20, 4  ;;  %v5758_v8 = vshrl.u32 %v5415_v50, 16  ;;  %v11039_v56 = vpop.f32.mrf.mxu0 }
 0x265   : > { %8322 = vmatmul.mubr.bf16.gmra.mxu1 %v8636_v3  ;;  %v5740_v17 = vor.u32 %v5739_v47, %v5736_v60  ;;  %v5755_v31 = vrot.slane %v5753_v26, 5  ;;  %v5732_v32 = vsel %vm9232_vm3, %v5727_v18, %v5731_v61  ;;  %v5761_v36 = vshll.u32 %v5415_v50, 16  ;;  %v5418_v60 = vld [vmem:[#allocation2 + $0xcc] sm:$0xf]  ;;  %v11048_v61 = vld [vmem:[#allocation2 + $0xd0] sm:$0xf] }
 0x266   : > { %12155 = vst [vmem:[#allocation28_spill] sm:$0xff] %v11035_v2  ;;  %8325 = vmatprep.mubr.bf16.mxu1 %v8637_v58  ;;  %v5767_v62 = vshll.u32 %v11028_v37, 16  ;;  %v5771_v55 = vshrl.u32 %v11028_v37, 16  ;;  %v8036_v16 = vpop.f32.mrf.mxu1  ;;  %v7574_v41 = vcombine.low %v5722_v59, %v5732_v32  ;;  %v5750_v47 = vor.u32 %v5749_v53, %v5745_v45  ;;  %v11045_v20 = vpop.f32.mrf.mxu0 }
 0x267   : > { %v5741_v7 = vrot.slane %v5740_v17, 4  ;;  %v5760_v3 = vrot.slane %v5758_v8, 4  ;;  %v5763_v26 = vrot.slane %v5761_v36, 5  ;;  %v5777_v52 = vshll.u32 %v11037_v4, 16 }
 0x268   : > { %v5769_v58 = vrot.slane %v5767_v62, 5  ;;  %v5773_v2 = vrot.slane %v5771_v55, 4  ;;  %v2514_v42 = vpop.f32.mrf.mxu1  ;;  %8373 = vmatprep.mubr.bf16.mxu0 %v7574_v41  ;;  %v5751_v18 = vrot.slane %v5750_v47, 4  ;;  %v11053_v59 = vadd.f32 %v10947_v10, %v2511_v49  ;;  %v11058_v17 = vpop.f32.mrf.mxu0  ;;  %v11063_v55 = vld [vmem:[#allocation2 + $0xd4] sm:$0x1] }
 0x269   : > { %v5746_v50 = vsel %vm9232_vm3, %v5741_v7, %v5745_v45  ;;  %v11056_v8 = vadd.f32 %v10955_v6, %v8036_v16  ;;  %v5764_v53 = vor.u32 %v5763_v26, %v5760_v3  ;;  %v5779_v36 = vrot.slane %v5777_v52, 5  ;;  %12159 = vst [vmem:[#allocation32_spill] sm:$0xff] %v11063_v55  ;;  %v8639_v41 = vld [vmem:[#allocation2 + $0xb4] sm:$0xff]   ;;  %v8640_v6 = vld [vmem:[#allocation2 + $0xc0] sm:$0xff]  }
 0x26a   : > { %12156 = vst [vmem:[#allocation29_spill] sm:$0xff] %v11053_v59  ;;  %v5774_v32 = vor.u32 %v5773_v2, %v5769_v58  ;;  %v11061_v62 = vadd.f32 %v10964_v33, %v2514_v42  ;;  %v5756_v45 = vsel %vm9232_vm3, %v5751_v18, %v5755_v31  ;;  %v5782_v7 = vshrl.u32 %v5418_v60, 16  ;;  %v11068_v16 = vpop.f32.mrf.mxu0  ;;  %v8921_v59 = vld [vmem:[#allocation2 + $0x1c] sm:$0xf] }
 0x26b   : > { %12157 = vst [vmem:[#allocation30_spill] sm:$0xff] %v11056_v8  ;;  %v5785_v10 = vshll.u32 %v5418_v60, 16  ;;  %v5791_v49 = vshll.u32 %v11048_v61, 16  ;;  %v7575_v47 = vcombine.low %v5746_v50, %v5756_v45  ;;  %v5765_v3 = vrot.slane %v5764_v53, 4  ;;  %v8039_v33 = vpop.f32.mrf.mxu1 }
 0x26c   : > { %12158 = vst [vmem:[#allocation31_spill] sm:$0xff] %v11061_v62  ;;  %v5775_v2 = vrot.slane %v5774_v32, 4  ;;  %v5795_v52 = vshrl.u32 %v11048_v61, 16  ;;  %v5784_v42 = vrot.slane %v5782_v7, 4  ;;  %v5801_v8 = vshll.u32 %v11063_v55, 16  ;;  %v11072_v31 = vpop.f32.mrf.mxu0 }
 0x26d   : > { %8326 = vmatmul.mubr.bf16.gmra.mxu1 %v8639_v41  ;;  %v5787_v26 = vrot.slane %v5785_v10, 5  ;;  %v5793_v62 = vrot.slane %v5791_v49, 5  ;;  %8374 = vmatmul.mubr.bf16.gmra.mxu0 %v7575_v47  ;;  %v5770_v60 = vsel %vm9232_vm3, %v5765_v3, %v5769_v58  ;;  %v11079_v53 = vadd.f32 %v10977_v0, %v8039_v33  ;;  %v2527_v32 = vpop.f32.mrf.mxu1  ;;  %v6127_v47 = vld [vmem:[#allocation2 + $0x18] sm:$0xe]  ;;  %v8642_v3 = vld [vmem:[#allocation2 + $0xcc] sm:$0xff]  }
 0x26e   : > { %8329 = vmatprep.mubr.bf16.mxu1 %v8640_v6  ;;  %v5780_v50 = vsel %vm9232_vm3, %v5775_v2, %v5779_v36  ;;  %v5797_v18 = vrot.slane %v5795_v52, 4  ;;  %v12108_v41 = vrot.slane %v10736_v19, 5  ;;  %v11082_v10 = vpop.f32.mrf.mxu0  ;;  %v5803_v6 = vrot.slane %v5801_v8, 5 }
 0x26f   : > { %v7576_v45 = vcombine.low %v5770_v60, %v5780_v50  ;;  %v5788_v7 = vor.u32 %v5787_v26, %v5784_v42  ;;  %v6193_v55 = vrot.slane %v8921_v59, 5  ;;  %v11085_v58 = vadd.f32 %v10984_v13, %v2527_v32  ;;  %v8040_v36 = vpop.f32.mrf.mxu1  ;;  %v8922_v60 = vld [vmem:[#allocation2 + $0x20] sm:$0x1] }
 0x270   : > { %v5798_v49 = vor.u32 %v5797_v18, %v5793_v62  ;;  %v11088_v2 = vadd.f32 %v10997_v43, %v8040_v36  ;;  %v6200_v52 = vrot.slane %v10702_v39, 5  ;;  %v11091_v33 = vpop.f32.mrf.mxu0  ;;  %v6217_v42 = vrot.slane %v10748_v28, 5  ;;  %v6129_v39 = vld [vmem:[#allocation2 + $0x30] sm:$0xe] }
 0x271   : > { %8377 = vmatprep.mubr.bf16.mxu0 %v7576_v45  ;;  %v5789_v0 = vrot.slane %v5788_v7, 4  ;;  %v6195_v26 = vrot.slane %v6193_v55, 4  ;;  %v6196_v59 = vrot.slane %v8922_v60, 5  ;;  %v2530_v50 = vpop.f32.mrf.mxu1  ;;  %v6216_v13 = vrot.slane %v12108_v41, 4 }
 0x272   : > { %v5799_v8 = vrot.slane %v5798_v49, 4  ;;  %v7586_v32 = vrot.slane %v6127_v47, 9  ;;  %v11099_v43 = vadd.f32 %v11002_v23, %v2530_v50  ;;  %v11101_v45 = vpop.f32.mrf.mxu0  ;;  %v6128_v49 = vld [vmem:[#allocation2 + $0x24] sm:$0xe]  ;;  %v6202_v36 = vrot.slane %v6200_v52, 4 }
 0x273   : > { %v5794_v18 = vsel %vm9232_vm3, %v5789_v0, %v5793_v62  ;;  %v6197_v7 = vsel %vm9936_vm14, %v6195_v26, %v6196_v59  ;;  %v8043_v60 = vpop.f32.mrf.mxu1  ;;  %v6207_v41 = vrot.slane %v10722_v9, 5  ;;  %v6130_v62 = vld [vmem:[#allocation2 + $0x3c] sm:$0xe]  ;;  %v8923_v0 = vld [vmem:[#allocation2 + $0x2c] sm:$0x1]  ;;  %v6210_v59 = vrot.slane %v10728_v35, 5 }
 0x274   : > { %12160 = vst [vmem:[#allocation33_spill] sm:$0xff] %v11099_v43  ;;  %v5804_v28 = vsel %vm9232_vm3, %v5799_v8, %v5803_v6  ;;  %v6194_v23 = vsel %vm9936_vm14, %v7586_v32, %v6193_v55  ;;  %v6203_v50 = vrot.slane %v8923_v0, 5  ;;  %v11111_v43 = vadd.f32 %v11023_v57, %v8043_v60  ;;  %v11113_v54 = vpop.f32.mrf.mxu0  ;;  %v6131_v32 = vld [vmem:[#allocation2 + $0x48] sm:$0xe] }
 0x275   : > { %8330 = vmatmul.mubr.bf16.gmra.mxu1 %v8642_v3  ;;  %v7577_v47 = vcombine.low %v5794_v18, %v5804_v28  ;;  %v7618_v6 = vcombine.low %v6194_v23, %v6197_v7  ;;  %v7588_v8 = vrot.slane %v6129_v39, 9  ;;  %v6209_v26 = vrot.slane %v6207_v41, 4  ;;  %v2543_v3 = vpop.f32.mrf.mxu1 }
 0x276   : > { %v7587_v9 = vrot.slane %v6128_v49, 9  ;;  %v11117_v18 = vadd.f32 %v11030_v38, %v2543_v3  ;;  %v7589_v28 = vrot.slane %v6130_v62, 9  ;;  %v6218_v55 = vsel %vm9936_vm14, %v6216_v13, %v6217_v42  ;;  %v11121_v57 = vpop.f32.mrf.mxu0  ;;  %v6132_v3 = vld [vmem:[#allocation2 + $0x54] sm:$0xe] }
 0x277   : > { %8378 = vmatmul.mubr.bf16.gmra.mxu0 %v7577_v47  ;;  %v6204_v39 = vsel %vm9936_vm14, %v6202_v36, %v6203_v50  ;;  %v6208_v35 = vsel %vm9936_vm14, %v7588_v8, %v6207_v41  ;;  %v6211_v7 = vsel %vm9936_vm14, %v6209_v26, %v6210_v59  ;;  %v8044_v49 = vpop.f32.mrf.mxu1  ;;  %v6221_v38 = vrot.slane %v10766_v48, 5 }
 0x278   : > { %8397 = vmatprep.mubr.bf16.mxu0 %v7618_v6  ;;  %v7620_v60 = vcombine.low %v6208_v35, %v6211_v7  ;;  %v11131_v62 = vadd.f32 %v11039_v56, %v8044_v49  ;;  %v12161_v42 = vrot.slane %v10736_v19, 5  ;;  %v11137_v47 = vpop.f32.mrf.mxu0  ;;  %v6228_v36 = vrot.slane %v10798_v34, 5  ;;  %v6133_v35 = vld [vmem:[#allocation2 + $0x60] sm:$0xe] }
 0x279   : > { %v2546_v41 = vpop.f32.mrf.mxu1  ;;  %v7590_v0 = vrot.slane %v6131_v32, 9  ;;  %v6223_v50 = vrot.slane %v6221_v38, 4  ;;  %v6224_v6 = vrot.slane %v10774_v24, 5  ;;  %v6201_v19 = vsel %vm9936_vm14, %v7587_v9, %v6200_v52 }
 0x27a   : > { %v6215_v13 = vsel %vm9936_vm14, %v7589_v28, %v12161_v42  ;;  %8401 = vmatprep.mubr.bf16.mxu1 %v7620_v60  ;;  %v11142_v48 = vadd.f32 %v11045_v20, %v2546_v41  ;;  %v6230_v56 = vrot.slane %v6228_v36, 4  ;;  %v11144_v8 = vpop.f32.mrf.mxu0  ;;  %v6235_v24 = vrot.slane %v10825_v14, 5 }
 0x27b   : > { %v7621_v23 = vcombine.low %v6215_v13, %v6218_v55  ;;  %v8111_v26 = vpop.f32.mrf.mxu1  ;;  %v6222_v34 = vsel %vm9936_vm14, %v7590_v0, %v6221_v38  ;;  %v6225_v59 = vsel %vm9936_vm14, %v6223_v50, %v6224_v6  ;;  %v7619_v28 = vcombine.low %v6201_v19, %v6204_v39 }
 0x27c   : > { %v11154_v20 = vadd.f32 %v8111_v26, %v10772_v46  ;;  %v7622_v55 = vcombine.low %v6222_v34, %v6225_v59  ;;  %v6231_v32 = vrot.slane %v10807_v11, 5  ;;  %v11157_v52 = vpop.f32.mrf.mxu0  ;;  %v6237_v7 = vrot.slane %v6235_v24, 4 }
 0x27d   : > { %8402 = vmatmul.mubr.bf16.vlgmr.msra.gmra.mxu1 %v7621_v23  ;;  %v3189_v9 = vpop.f32.mrf.mxu1  ;;  %v6238_v49 = vrot.slane %v10832_v30, 5  ;;  %v7591_v14 = vrot.slane %v6132_v3, 9  ;;  %v6242_v11 = vrot.slane %v10858_v1, 5  ;;  %v7592_v42 = vrot.slane %v6133_v35, 9  ;;  %v6135_v3 = vld [vmem:[#allocation2 + $0x78] sm:$0xe] }
 0x27e   : > { %8405 = vmatprep.mubr.bf16.mxu1 %v7622_v55  ;;  %v11161_v38 = vadd.f32 %v3189_v9, %v10796_v27  ;;  %v6232_v46 = vsel %vm9936_vm14, %v6230_v56, %v6231_v32  ;;  %v11165_v39 = vpop.f32.mrf.mxu0  ;;  %v6249_v30 = vrot.slane %v10880_v40, 5  ;;  %v2740_v41 = vadd.f32 %v10691_v15, %v10780_v12  ;;  %v6134_v15 = vld [vmem:[#allocation2 + $0x6c] sm:$0xe] }
 0x27f   : > { %8398 = vmatmul.mubr.bf16.vlgmr.msra.gmra.mxu0 %v7619_v28  ;;  %v8112_v60 = vpop.f32.mrf.mxu1  ;;  %v6239_v13 = vsel %vm9936_vm14, %v6237_v7, %v6238_v49  ;;  %v6229_v23 = vsel %vm9936_vm14, %v7591_v14, %v6228_v36  ;;  %v6236_v6 = vsel %vm9936_vm14, %v7592_v42, %v6235_v24  ;;  %v6244_v26 = vrot.slane %v6242_v11, 4  ;;  %v6136_v42 = vld [vmem:[#allocation2 + $0x84] sm:$0xe] }
 0x280   : > { %v11174_v27 = vadd.f32 %v8112_v60, %v10805_v22  ;;  %v11178_v0 = vpop.f32.mrf.mxu0  ;;  %v7623_v1 = vcombine.low %v6229_v23, %v6232_v46  ;;  %v7624_v19 = vcombine.low %v6236_v6, %v6239_v13  ;;  %v6251_v12 = vrot.slane %v6249_v30, 4  ;;  %v12162_v46 = vld [vmem:[#allocation6_spill] sm:$0xff] }
 0x281   : > { %v3192_v50 = vpop.f32.mrf.mxu1  ;;  %v6256_v22 = vrot.slane %v10913_v51, 5  ;;  %v6245_v59 = vrot.slane %v10860_v44, 5  ;;  %v6252_v55 = vrot.slane %v10890_v63, 5  ;;  %v7593_v35 = vrot.slane %v6134_v15, 9 }
 0x282   : > { %v3317_v56 = vadd.f32 %v3192_v50, %v2740_v41  ;;  %v11182_v40 = vpop.f32.mrf.mxu0  ;;  %v6263_v51 = vrot.slane %v10938_v25, 5  ;;  %v7594_v49 = vrot.slane %v6135_v3, 9  ;;  %v12163_v25 = vld [vmem:[#allocation12_spill] sm:$0xff] }
 0x283   : > { %v8115_v34 = vpop.f32.mrf.mxu1  ;;  %v6246_v9 = vsel %vm9936_vm14, %v6244_v26, %v6245_v59  ;;  %v6253_v44 = vsel %vm9936_vm14, %v6251_v12, %v6252_v55  ;;  %v6258_v14 = vrot.slane %v6256_v22, 4  ;;  %v6243_v63 = vsel %vm9936_vm14, %v7593_v35, %v6242_v11  ;;  %v12165_v3 = vld [vmem:[#allocation8_spill] sm:$0xff]  ;;  %v12166_v55 = vld [vmem:[#allocation14_spill] sm:$0xff] }
 0x284   : > { %v3322_v36 = vadd.f32 %v8115_v34, %v10823_v21  ;;  %v11187_v28 = vpop.f32.mrf.mxu0  ;;  %v7625_v41 = vcombine.low %v6243_v63, %v6246_v9  ;;  %v6250_v23 = vsel %vm9936_vm14, %v7594_v49, %v6249_v30  ;;  %v6259_v50 = vrot.slane %v12163_v25, 5  ;;  %v6137_v34 = vld [vmem:[#allocation2 + $0x90] sm:$0xe]  ;;  %v12167_v9 = vld [vmem:[#allocation16_spill] sm:$0xff] }
 0x285   : > { %8406 = vmatmul.mubr.bf16.gmra.mxu1 %v7623_v1  ;;  %v3205_v24 = vpop.f32.mrf.mxu1  ;;  %v12164_v1 = vld [vmem:[#allocation7_spill] sm:$0xff]  ;;  %v6265_v15 = vrot.slane %v6263_v51, 4  ;;  %v7595_v11 = vrot.slane %v6136_v42, 9  ;;  %v6266_v30 = vrot.slane %v12166_v55, 5  ;;  %v12168_v63 = vld [vmem:[#allocation9_spill] sm:$0xff] }
 0x286   : > { %8409 = vmatprep.mubr.bf16.mxu1 %v7624_v19  ;;  %v3320_v32 = vadd.f32 %v3205_v24, %v10853_v29  ;;  %v11193_v7 = vpop.f32.mrf.mxu0  ;;  %v7626_v19 = vcombine.low %v6250_v23, %v6253_v44  ;;  %v6260_v59 = vsel %vm9936_vm14, %v6258_v14, %v6259_v50  ;;  %v11225_v23 = vadd.f32 %v11058_v17, %v11154_v20  ;;  %v12169_v50 = vld [vmem:[#allocation20_spill] sm:$0xff] }
 0x287   : > { %v8116_v21 = vpop.f32.mrf.mxu1  ;;  %v6257_v44 = vsel %vm9936_vm14, %v7595_v11, %v6256_v22  ;;  %v6267_v14 = vsel %vm9936_vm14, %v6265_v15, %v6266_v30  ;;  %v11234_v22 = vadd.f32 %v11072_v31, %v11174_v27  ;;  %v12170_v15 = vld [vmem:[#allocation10_spill] sm:$0xff]  ;;  %v12171_v27 = vld [vmem:[#allocation11_spill] sm:$0xff] }
 0x288   : > { %v3323_v60 = vadd.f32 %v8116_v21, %v12162_v46  ;;  %v11201_v29 = vpop.f32.mrf.mxu0  ;;  %v6270_v21 = vrot.slane %v12167_v9, 5  ;;  %v7596_v46 = vrot.slane %v6137_v34, 9  ;;  %v7627_v42 = vcombine.low %v6257_v44, %v6260_v59  ;;  %v6139_v9 = vld [vmem:[#allocation2 + $0xa8] sm:$0xe]  ;;  %v12174_v44 = vld [vmem:[#allocation22_spill] sm:$0xff] }
 0x289   : > { %v3208_v13 = vpop.f32.mrf.mxu1  ;;  %v11237_v34 = vadd.f32 %v11082_v10, %v3317_v56  ;;  %v11245_v59 = vadd.f32 %v11091_v33, %v3322_v36 }
 0x28a   : > { %v3321_v6 = vadd.f32 %v3208_v13, %v12164_v1  ;;  %v11207_v26 = vpop.f32.mrf.mxu0  ;;  %v6277_v1 = vrot.slane %v12169_v50, 5  ;;  %v6264_v17 = vsel %vm9936_vm14, %v7596_v46, %v6263_v51  ;;  %v6272_v11 = vrot.slane %v6270_v21, 4  ;;  %v6138_v51 = vld [vmem:[#allocation2 + $0x9c] sm:$0xe] }
 0x28b   : > { %v8119_v12 = vpop.f32.mrf.mxu1  ;;  %v11251_v31 = vadd.f32 %v11113_v54, %v3323_v60  ;;  %v12173_v60 = vld [vmem:[#allocation19_spill] sm:$0xff]  ;;  %v6280_v46 = vrot.slane %v12174_v44, 5  ;;  %v12180_v44 = vld [vmem:[#allocation26_spill] sm:$0xff] }
 0x28c   : > { %v3326_v24 = vadd.f32 %v8119_v12, %v12165_v3  ;;  %v11213_v35 = vpop.f32.mrf.mxu0  ;;  %v11248_v3 = vadd.f32 %v11101_v45, %v3320_v32  ;;  %v11254_v10 = vadd.f32 %v11121_v57, %v3321_v6  ;;  %v6279_v54 = vrot.slane %v6277_v1, 4  ;;  %v12172_v32 = vld [vmem:[#allocation13_spill] sm:$0xff] }
 0x28d   : > { %8410 = vmatmul.mubr.bf16.gmra.mxu1 %v7625_v41  ;;  %v3221_v49 = vpop.f32.mrf.mxu1  ;;  %v6273_v6 = vrot.slane %v12173_v60, 5  ;;  %v6140_v60 = vld [vmem:[#allocation2 + $0xb4] sm:$0xe] }
 0x28e   : > { %8413 = vmatprep.mubr.bf16.mxu1 %v7626_v19  ;;  %v3324_v13 = vadd.f32 %v3221_v49, %v12168_v63  ;;  %v11221_v41 = vpop.f32.mrf.mxu0  ;;  %v11230_v19 = vadd.f32 %v11068_v16, %v11161_v38  ;;  %v7628_v38 = vcombine.low %v6264_v17, %v6267_v14  ;;  %v11260_v30 = vadd.f32 %v11137_v47, %v3326_v24  ;;  %v12176_v14 = vld [vmem:[#allocation25_spill] sm:$0xff] }
 0x28f   : > { %v8120_v25 = vpop.f32.mrf.mxu1  ;;  %v6291_v17 = vrot.slane %v11028_v37, 5 }
 0x290   : > { %v3327_v12 = vadd.f32 %v8120_v25, %v12170_v15  ;;  %v11242_v20 = vpop.f32.mrf.mxu0  ;;  %v11263_v33 = vadd.f32 %v11144_v8, %v3324_v13  ;;  %v7597_v8 = vrot.slane %v6138_v51, 9  ;;  %v6274_v13 = vsel %vm9936_vm14, %v6272_v11, %v6273_v6 }
 0x291   : > { %v3224_v16 = vpop.f32.mrf.mxu1  ;;  %v6284_v25 = vrot.slane %v12176_v14, 5 }
 0x292   : > { %v3325_v56 = vadd.f32 %v3224_v16, %v12171_v27  ;;  %v11257_v55 = vpop.f32.mrf.mxu0  ;;  %v11266_v45 = vadd.f32 %v11157_v52, %v3327_v12  ;;  %v12175_v52 = vld [vmem:[#allocation15_spill] sm:$0xff]  ;;  %v7598_v12 = vrot.slane %v6139_v9, 9  ;;  %v12177_v16 = vld [vmem:[#allocation17_spill] sm:$0xff]  ;;  %v6271_v27 = vsel %vm9936_vm14, %v7597_v8, %v6270_v21 }
 0x293   : > { %v8123_v36 = vpop.f32.mrf.mxu1  ;;  %v6286_v37 = vrot.slane %v6284_v25, 4 }
 0x294   : > { %v3330_v57 = vadd.f32 %v8123_v36, %v12172_v32  ;;  %v11270_v49 = vpop.f32.mrf.mxu0  ;;  %v11273_v47 = vadd.f32 %v11165_v39, %v3325_v56  ;;  %v6281_v39 = vsel %vm9936_vm14, %v6279_v54, %v6280_v46  ;;  %v6278_v36 = vsel %vm9936_vm14, %v7598_v12, %v6277_v1  ;;  %v12178_v32 = vld [vmem:[#allocation18_spill] sm:$0xff] }
 0x295   : > { %8414 = vmatmul.mubr.bf16.gmra.mxu1 %v7627_v42  ;;  %v3237_v24 = vpop.f32.mrf.mxu1  ;;  %v7630_v54 = vcombine.low %v6278_v36, %v6281_v39  ;;  %v6287_v46 = vrot.slane %v12180_v44, 5  ;;  %v6294_v12 = vrot.slane %v11037_v4, 5  ;;  %v12181_v39 = vld [vmem:[#allocation23_spill] sm:$0xff] }
 0x296   : > { %8417 = vmatprep.mubr.bf16.mxu1 %v7628_v38  ;;  %v3328_v63 = vadd.f32 %v3237_v24, %v12175_v52  ;;  %v11279_v42 = vpop.f32.mrf.mxu0  ;;  %v11283_v50 = vadd.f32 %v11178_v0, %v3330_v57  ;;  %v7629_v0 = vcombine.low %v6271_v27, %v6274_v13  ;;  %v6293_v24 = vrot.slane %v6291_v17, 4  ;;  %v6141_v52 = vld [vmem:[#allocation2 + $0xc0] sm:$0xe] }
 0x297   : > { %v8124_v15 = vpop.f32.mrf.mxu1  ;;  %v6298_v13 = vrot.slane %v11048_v61, 5  ;;  %v7600_v36 = vrot.slane %v6141_v52, 9 }
 0x298   : > { %v3331_v38 = vadd.f32 %v8124_v15, %v12177_v16  ;;  %v11291_v11 = vpop.f32.mrf.mxu0  ;;  %v11294_v56 = vadd.f32 %v11182_v40, %v3328_v63  ;;  %v12179_v40 = vld [vmem:[#allocation21_spill] sm:$0xff]  ;;  %v6142_v63 = vld [vmem:[#allocation2 + $0xcc] sm:$0xe] }
 0x299   : > { %v3240_v51 = vpop.f32.mrf.mxu1  ;;  %v6292_v44 = vsel %vm9936_vm14, %v7600_v36, %v6291_v17 }
 0x29a   : > { %v3329_v57 = vadd.f32 %v3240_v51, %v12178_v32  ;;  %v11299_v6 = vpop.f32.mrf.mxu0  ;;  %v11302_v9 = vadd.f32 %v11187_v28, %v3331_v38  ;;  %v7599_v28 = vrot.slane %v6140_v60, 9  ;;  %v6288_v38 = vsel %vm9936_vm14, %v6286_v37, %v6287_v46 }
 0x29b   : > { %v8127_v21 = vpop.f32.mrf.mxu1  ;;  %v7601_v32 = vrot.slane %v6142_v63, 9  ;;  %v6300_v60 = vrot.slane %v6298_v13, 4 }
 0x29c   : > { %v3334_v8 = vadd.f32 %v8127_v21, %v12179_v40  ;;  %v11306_v1 = vpop.f32.mrf.mxu0  ;;  %v11310_v14 = vadd.f32 %v11193_v7, %v3329_v57  ;;  %v6285_v61 = vsel %vm9936_vm14, %v7599_v28, %v6284_v25  ;;  %v6295_v7 = vsel %vm9936_vm14, %v6293_v24, %v6294_v12  ;;  %v12182_v57 = vld [vmem:[#allocation24_spill] sm:$0xff]  ;;  %v12184_v25 = vld [vmem:[#allocation27_spill] sm:$0xff] }
 0x29d   : > { %8418 = vmatmul.mubr.bf16.gmra.mxu1 %v7629_v0  ;;  %v3253_v15 = vpop.f32.mrf.mxu1  ;;  %v12183_v21 = vld [vmem:[#allocation32_spill] sm:$0xff]  ;;  %v7632_v52 = vcombine.low %v6292_v44, %v6295_v7 }
 0x29e   : > { %8421 = vmatprep.mubr.bf16.mxu1 %v7630_v54  ;;  %v3332_v16 = vadd.f32 %v3253_v15, %v12181_v39  ;;  %v3674_v27 = vpop.f32.mrf.mxu0  ;;  %v11317_v51 = vadd.f32 %v11201_v29, %v3334_v8  ;;  %v6301_v40 = vrot.slane %v12183_v21, 5  ;;  %v7631_v8 = vcombine.low %v6285_v61, %v6288_v38  ;;  %v12185_v28 = vld [vmem:[#allocation28_spill] sm:$0xff] }
 0x29f   : > { %v8128_v0 = vpop.f32.mrf.mxu1 }
 0x2a0   : > { %v3335_v4 = vadd.f32 %v8128_v0, %v12182_v57  ;;  %v8187_v54 = vpop.f32.mrf.mxu0  ;;  %v11326_v37 = vadd.f32 %v11207_v26, %v3332_v16  ;;  %v6299_v26 = vsel %vm9936_vm14, %v7601_v32, %v6298_v13  ;;  %v6302_v39 = vsel %vm9936_vm14, %v6300_v60, %v6301_v40  ;;  %v12186_v0 = vld [vmem:[#allocation29_spill] sm:$0xff]  ;;  %v12188_v32 = vld [vmem:[#allocation31_spill] sm:$0xff] }
 0x2a1   : > { %v3256_v29 = vpop.f32.mrf.mxu1  ;;  %v7633_v57 = vcombine.low %v6299_v26, %v6302_v39 }
 0x2a2   : > { %v3333_v46 = vadd.f32 %v3256_v29, %v12184_v25  ;;  %v3687_v15 = vpop.f32.mrf.mxu0  ;;  %v11332_v24 = vadd.f32 %v11213_v35, %v3335_v4  ;;  %v12187_v4 = vld [vmem:[#allocation30_spill] sm:$0xff] }
 0x2a4   : > { %v8131_v63 = vpop.f32.mrf.mxu1  ;;  %v8188_v16 = vpop.f32.mrf.mxu0  ;;  %v11340_v17 = vadd.f32 %v11221_v41, %v3333_v46 }
 0x2a5   : > { %8422 = vmatmul.mubr.bf16.gmra.mxu1 %v7631_v8  ;;  %v3338_v12 = vadd.f32 %v8131_v63, %v12185_v28 }
 0x2a6   : > { %8425 = vmatprep.mubr.bf16.mxu1 %v7632_v52  ;;  %v3269_v38 = vpop.f32.mrf.mxu1  ;;  %v3690_v35 = vpop.f32.mrf.mxu0 }
 0x2a7   : > { %v3336_v61 = vadd.f32 %v3269_v38, %v12186_v0  ;;  %v11344_v36 = vadd.f32 %v11242_v20, %v3338_v12 }
 0x2a8   : > { %v8132_v7 = vpop.f32.mrf.mxu1 }
 0x2a9   : > { %v3339_v21 = vadd.f32 %v8132_v7, %v12187_v4  ;;  %v11348_v13 = vadd.f32 %v11257_v55, %v3336_v61 }
 0x2aa   : > { %v8255_v29 = vpop.f32.mrf.mxu0  ;;  %v3272_v5 = vpop.f32.mrf.mxu1 }
 0x2ab   : > { %v3337_v60 = vadd.f32 %v3272_v5, %v12188_v32  ;;  %v11352_v40 = vadd.f32 %v11270_v49, %v3339_v21 }
 0x2ac   : > { %v4827_v41 = vpop.f32.mrf.mxu0 }
 0x2ad   : > { %v8135_v8 = vpop.f32.mrf.mxu1  ;;  %8426 = vmatmul.mubr.bf16.gmra.mxu1 %v7633_v57  ;;  %v11356_v25 = vadd.f32 %v11279_v42, %v3337_v60 }
 0x2ae   : > { %v3342_v20 = vadd.f32 %v8135_v8, %v11079_v53  ;;  %v8256_v44 = vpop.f32.mrf.mxu0  ;;  %v12189_v53 = vld [vmem:[#allocation33_spill] sm:$0xff] }
 0x2af   : > { %v3285_v46 = vpop.f32.mrf.mxu1 }
 0x2b0   : > { %v3340_v52 = vadd.f32 %v3285_v46, %v11085_v58  ;;  %v4830_v55 = vpop.f32.mrf.mxu0  ;;  %v11360_v63 = vadd.f32 %v11291_v11, %v3342_v20 }
 0x2b1   : > { %v8136_v28 = vpop.f32.mrf.mxu1 }
 0x2b2   : > { %v3343_v12 = vadd.f32 %v8136_v28, %v11088_v2  ;;  %v8259_v49 = vpop.f32.mrf.mxu0  ;;  %v11364_v26 = vadd.f32 %v11299_v6, %v3340_v52 }
 0x2b3   : > { %v3288_v39 = vpop.f32.mrf.mxu1 }
 0x2b4   : > { %v3341_v38 = vadd.f32 %v3288_v39, %v12189_v53  ;;  %v4843_v0 = vpop.f32.mrf.mxu0  ;;  %v11368_v42 = vadd.f32 %v11306_v1, %v3343_v12 }
 0x2b5   : > { %v8139_v61 = vpop.f32.mrf.mxu1 }
 0x2b6   : > { %v3346_v58 = vadd.f32 %v8139_v61, %v11111_v43  ;;  %v8260_v7 = vpop.f32.mrf.mxu0  ;;  %v11371_v11 = vadd.f32 %v3674_v27, %v3341_v38 }
 0x2b7   : > { %v3301_v57 = vpop.f32.mrf.mxu1 }
 0x2b8   : > { %v3344_v2 = vadd.f32 %v3301_v57, %v11117_v18  ;;  %v4846_v4 = vpop.f32.mrf.mxu0  ;;  %v11374_v21 = vadd.f32 %v8187_v54, %v3346_v58 }
 0x2b9   : > { %v8140_v6 = vpop.f32.mrf.mxu1 }
 0x2ba   : > { %v3347_v5 = vadd.f32 %v8140_v6, %v11131_v62  ;;  %v8263_v32 = vpop.f32.mrf.mxu0  ;;  %v11377_v60 = vadd.f32 %v3687_v15, %v3344_v2 }
 0x2bb   : > { %v3304_v1 = vpop.f32.mrf.mxu1 }
 0x2bc   : > { %v3345_v8 = vadd.f32 %v3304_v1, %v11142_v48  ;;  %v4859_v20 = vpop.f32.mrf.mxu0  ;;  %v11380_v43 = vadd.f32 %v8188_v16, %v3347_v5 }
 0x2bd   : > { %v8207_v27 = vpop.f32.mrf.mxu1 }
 0x2be   : > { %v4458_v46 = vadd.f32 %v8207_v27, %v11225_v23  ;;  %v8264_v52 = vpop.f32.mrf.mxu0  ;;  %v11383_v18 = vadd.f32 %v3690_v35, %v3345_v8 }
 0x2bf   : > { %v4329_v54 = vpop.f32.mrf.mxu1 }
 0x2c0   : > { %v4456_v28 = vadd.f32 %v4329_v54, %v11230_v19  ;;  %v4862_v12 = vpop.f32.mrf.mxu0  ;;  %v11386_v62 = vadd.f32 %v8255_v29, %v4458_v46 }
 0x2c1   : > { %v8208_v15 = vpop.f32.mrf.mxu1 }
 0x2c2   : > { %v4459_v39 = vadd.f32 %v8208_v15, %v11234_v22  ;;  %v8267_v53 = vpop.f32.mrf.mxu0  ;;  %v11389_v48 = vadd.f32 %v4827_v41, %v4456_v28 }
 0x2c3   : > { %v4332_v16 = vpop.f32.mrf.mxu1 }
 0x2c4   : > { %v4457_v38 = vadd.f32 %v4332_v16, %v11237_v34  ;;  %v4875_v61 = vpop.f32.mrf.mxu0  ;;  %v11392_v23 = vadd.f32 %v8256_v44, %v4459_v39 }
 0x2c5   : > { %v8211_v35 = vpop.f32.mrf.mxu1 }
 0x2c6   : > { %v4462_v58 = vadd.f32 %v8211_v35, %v11245_v59  ;;  %v8268_v57 = vpop.f32.mrf.mxu0  ;;  %v11395_v19 = vadd.f32 %v4830_v55, %v4457_v38 }
 0x2c7   : > { %v4345_v29 = vpop.f32.mrf.mxu1 }
 0x2c8   : > { %v4460_v2 = vadd.f32 %v4345_v29, %v11248_v3  ;;  %v4878_v6 = vpop.f32.mrf.mxu0  ;;  %v11398_v22 = vadd.f32 %v8259_v49, %v4462_v58 }
 0x2c9   : > { %v8212_v41 = vpop.f32.mrf.mxu1 }
 0x2ca   : > { %v4463_v5 = vadd.f32 %v8212_v41, %v11251_v31  ;;  %v8271_v1 = vpop.f32.mrf.mxu0  ;;  %v11401_v34 = vadd.f32 %v4843_v0, %v4460_v2 }
 0x2cb   : > { %v4348_v44 = vpop.f32.mrf.mxu1 }
 0x2cc   : > { %v4461_v8 = vadd.f32 %v4348_v44, %v11254_v10  ;;  %v4891_v27 = vpop.f32.mrf.mxu0  ;;  %v11404_v59 = vadd.f32 %v8260_v7, %v4463_v5 }
 0x2cd   : > { %v8215_v55 = vpop.f32.mrf.mxu1 }
 0x2ce   : > { %v4466_v46 = vadd.f32 %v8215_v55, %v11260_v30  ;;  %v8272_v54 = vpop.f32.mrf.mxu0  ;;  %v11407_v3 = vadd.f32 %v4846_v4, %v4461_v8 }
 0x2cf   : > { %v4361_v49 = vpop.f32.mrf.mxu1 }
 0x2d0   : > { %v4464_v28 = vadd.f32 %v4361_v49, %v11263_v33  ;;  %v4894_v15 = vpop.f32.mrf.mxu0  ;;  %v11410_v31 = vadd.f32 %v8263_v32, %v4466_v46 }
 0x2d1   : > { %v8216_v0 = vpop.f32.mrf.mxu1 }
 0x2d2   : > { %v4467_v39 = vadd.f32 %v8216_v0, %v11266_v45  ;;  %v8275_v16 = vpop.f32.mrf.mxu0  ;;  %v11413_v10 = vadd.f32 %v4859_v20, %v4464_v28 }
 0x2d3   : > { %v4364_v7 = vpop.f32.mrf.mxu1 }
 0x2d4   : > { %v4465_v38 = vadd.f32 %v4364_v7, %v11273_v47  ;;  %v4907_v35 = vpop.f32.mrf.mxu0  ;;  %v11416_v30 = vadd.f32 %v8264_v52, %v4467_v39 }
 0x2d5   : > { %v8219_v4 = vpop.f32.mrf.mxu1 }
 0x2d6   : > { %v4470_v58 = vadd.f32 %v8219_v4, %v11283_v50  ;;  %v8276_v29 = vpop.f32.mrf.mxu0  ;;  %v11419_v33 = vadd.f32 %v4862_v12, %v4465_v38 }
 0x2d7   : > { %v4377_v32 = vpop.f32.mrf.mxu1 }
 0x2d8   : > { %v4468_v2 = vadd.f32 %v4377_v32, %v11294_v56  ;;  %v4910_v41 = vpop.f32.mrf.mxu0  ;;  %v11422_v45 = vadd.f32 %v8267_v53, %v4470_v58 }
 0x2d9   : > { %v8220_v20 = vpop.f32.mrf.mxu1 }
 0x2da   : > { %v4471_v5 = vadd.f32 %v8220_v20, %v11302_v9  ;;  %v8279_v44 = vpop.f32.mrf.mxu0  ;;  %v11425_v47 = vadd.f32 %v4875_v61, %v4468_v2 }
 0x2db   : > { %v4380_v52 = vpop.f32.mrf.mxu1 }
 0x2dc   : > { %v4469_v8 = vadd.f32 %v4380_v52, %v11310_v14  ;;  %v4923_v55 = vpop.f32.mrf.mxu0  ;;  %v11428_v50 = vadd.f32 %v8268_v57, %v4471_v5 }
 0x2dd   : > { %v8223_v12 = vpop.f32.mrf.mxu1 }
 0x2de   : > { %v4474_v46 = vadd.f32 %v8223_v12, %v11317_v51  ;;  %v8280_v49 = vpop.f32.mrf.mxu0  ;;  %v11431_v56 = vadd.f32 %v4878_v6, %v4469_v8 }
 0x2df   : > { %v4393_v53 = vpop.f32.mrf.mxu1 }
 0x2e0   : > { %v4472_v28 = vadd.f32 %v4393_v53, %v11326_v37  ;;  %v4926_v0 = vpop.f32.mrf.mxu0  ;;  %v11434_v9 = vadd.f32 %v8271_v1, %v4474_v46 }
 0x2e1   : > { %v8224_v61 = vpop.f32.mrf.mxu1 }
 0x2e2   : > { %v4475_v39 = vadd.f32 %v8224_v61, %v11332_v24  ;;  %v8283_v7 = vpop.f32.mrf.mxu0  ;;  %v11437_v14 = vadd.f32 %v4891_v27, %v4472_v28 }
 0x2e3   : > { %v4396_v57 = vpop.f32.mrf.mxu1 }
 0x2e4   : > { %v4473_v38 = vadd.f32 %v4396_v57, %v11340_v17  ;;  %v11440_v4 = vadd.f32 %v8272_v54, %v4475_v39  ;;  %v4939_v58 = vpop.f32.mrf.mxu0 }
 0x2e5   : > { %v8227_v51 = vpop.f32.mrf.mxu1 }
 0x2e6   : > { %v4478_v6 = vadd.f32 %v8227_v51, %v11344_v36  ;;  %v11443_v32 = vadd.f32 %v4894_v15, %v4473_v38  ;;  %v8284_v20 = vpop.f32.mrf.mxu0 }
 0x2e7   : > { %v4409_v37 = vpop.f32.mrf.mxu1 }
 0x2e8   : > { %12190 = vst [vmem:[#allocation6_spill] sm:$0xff] %v11443_v32  ;;  %v4476_v1 = vadd.f32 %v4409_v37, %v11348_v13  ;;  %v11446_v2 = vadd.f32 %v8275_v16, %v4478_v6  ;;  %v4942_v8 = vpop.f32.mrf.mxu0 }
 0x2e9   : > { %v8228_v24 = vpop.f32.mrf.mxu1 }
 0x2ea   : > { %12191 = vst [vmem:[#allocation12_spill] sm:$0xff] %v11446_v2  ;;  %v4479_v27 = vadd.f32 %v8228_v24, %v11352_v40  ;;  %v11449_v5 = vadd.f32 %v4907_v35, %v4476_v1 }
 0x2eb   : > { %v4412_v17 = vpop.f32.mrf.mxu1 }
 0x2ec   : > { %12192 = vst [vmem:[#allocation7_spill] sm:$0xff] %v11449_v5  ;;  %v4477_v54 = vadd.f32 %v4412_v17, %v11356_v25  ;;  %v11452_v52 = vadd.f32 %v8276_v29, %v4479_v27 }
 0x2ed   : > { %v8231_v36 = vpop.f32.mrf.mxu1 }
 0x2ee   : > { %12193 = vst [vmem:[#allocation8_spill] sm:$0xff] %v11452_v52  ;;  %v4482_v15 = vadd.f32 %v8231_v36, %v11360_v63  ;;  %v11455_v12 = vadd.f32 %v4910_v41, %v4477_v54 }
 0x2ef   : > { %v4425_v13 = vpop.f32.mrf.mxu1 }
 0x2f0   : > { %12194 = vst [vmem:[#allocation14_spill] sm:$0xff] %v11455_v12  ;;  %v4480_v16 = vadd.f32 %v4425_v13, %v11364_v26  ;;  %v11458_v46 = vadd.f32 %v8279_v44, %v4482_v15 }
 0x2f1   : > { %v8232_v40 = vpop.f32.mrf.mxu1  ;;  %v11461_v53 = vpop.f32.mrf.mxu0 }
 0x2f2   : > { %12195 = vst [vmem:[#allocation16_spill] sm:$0xff] %v11458_v46  ;;  %v4483_v35 = vadd.f32 %v8232_v40, %v11368_v42  ;;  %v11463_v28 = vadd.f32 %v4923_v55, %v4480_v16 }
 0x2f3   : > { %v4428_v25 = vpop.f32.mrf.mxu1  ;;  %v11466_v61 = vpop.f32.mrf.mxu0 }
 0x2f4   : > { %12196 = vst [vmem:[#allocation9_spill] sm:$0xff] %v11463_v28  ;;  %v4481_v29 = vadd.f32 %v4428_v25, %v11371_v11  ;;  %v11468_v63 = vadd.f32 %v8280_v49, %v4483_v35 }
 0x2f5   : > { %v8235_v41 = vpop.f32.mrf.mxu1  ;;  %v11471_v26 = vpop.f32.mrf.mxu0 }
 0x2f6   : > { %12197 = vst [vmem:[#allocation20_spill] sm:$0xff] %v11468_v63  ;;  %v4486_v39 = vadd.f32 %v8235_v41, %v11374_v21  ;;  %v11473_v44 = vadd.f32 %v4926_v0, %v4481_v29 }
 0x2f7   : > { %v4441_v57 = vpop.f32.mrf.mxu1  ;;  %v11479_v11 = vpop.f32.mrf.mxu0 }
 0x2f8   : > { %v4484_v42 = vadd.f32 %v4441_v57, %v11377_v60  ;;  %v11476_v38 = vadd.f32 %v8283_v7, %v4486_v39 }
 0x2f9   : > { %v8236_v55 = vpop.f32.mrf.mxu1 }
 0x2fa   : > { %12198 = vst [vmem:[#allocation10_spill] sm:$0xff] %v11476_v38  ;;  %v4487_v51 = vadd.f32 %v8236_v55, %v11380_v43  ;;  %v11481_v6 = vadd.f32 %v4939_v58, %v4484_v42 }
 0x2fb   : > { %v4444_v49 = vpop.f32.mrf.mxu1 }
 0x2fc   : > { %12199 = vst [vmem:[#allocation11_spill] sm:$0xff] %v11481_v6  ;;  %v4485_v37 = vadd.f32 %v4444_v49, %v11383_v18  ;;  %v11484_v21 = vadd.f32 %v8284_v20, %v4487_v51 }
 0x2fd   : > { %v11486_v1 = vpop.f32.mrf.mxu1  ;;  %v11488_v0 = vpop.f32.mrf.mxu0 }
 0x2fe   : > { %12200 = vst [vmem:[#allocation13_spill] sm:$0xff] %v11484_v21  ;;  %v11490_v24 = vadd.f32 %v4942_v8, %v4485_v37 }
 0x2ff   : > { %v11492_v60 = vpop.f32.mrf.mxu1  ;;  %v11494_v7 = vpop.f32.mrf.mxu0 }
 0x300   : > { %12201 = vst [vmem:[#allocation19_spill] sm:$0xff] %v11490_v24 }
 0x301   : > { %v11496_v43 = vpop.f32.mrf.mxu1  ;;  %v11498_v27 = vpop.f32.mrf.mxu0 }
 0x303   : > { %v11500_v58 = vpop.f32.mrf.mxu1  ;;  %v11502_v17 = vpop.f32.mrf.mxu0 }
 0x305   : > { %v8307_v18 = vpop.f32.mrf.mxu1 }
 0x307   : > { %v11504_v20 = vpop.f32.mrf.mxu1  ;;  %v11506_v54 = vpop.f32.mrf.mxu0 }
 0x309   : > { %v11508_v36 = vpop.f32.mrf.mxu1  ;;  %v11510_v15 = vpop.f32.mrf.mxu0 }
 0x30b   : > { %v11512_v8 = vpop.f32.mrf.mxu1  ;;  %v11514_v13 = vpop.f32.mrf.mxu0 }
 0x30d   : > { %v11516_v16 = vpop.f32.mrf.mxu1  ;;  %v11518_v40 = vpop.f32.mrf.mxu0 }
 0x30f   : > { %v11520_v35 = vpop.f32.mrf.mxu1 }
 0x310   : > { %v11524_v29 = vpop.f32.mrf.mxu0 }
 0x311   : > { %v11522_v25 = vpop.f32.mrf.mxu1 }
 0x312   : > { %v11528_v39 = vpop.f32.mrf.mxu0 }
 0x313   : > { %v11526_v41 = vpop.f32.mrf.mxu1 }
 0x314   : > { %v11532_v42 = vpop.f32.mrf.mxu0 }
 0x315   : > { %v11530_v57 = vpop.f32.mrf.mxu1 }
 0x316   : > { %v11536_v51 = vpop.f32.mrf.mxu0 }
 0x317   : > { %v11534_v55 = vpop.f32.mrf.mxu1  ;;  %12202 = vst [vmem:[#allocation22_spill] sm:$0xff] %v11536_v51 }
 0x319   : > { %v11538_v49 = vpop.f32.mrf.mxu1 }
 0x31a   : > { %v11542_v24 = vpop.f32.mrf.mxu0 }
 0x31b   : > { %v11540_v37 = vpop.f32.mrf.mxu1  ;;  %12203 = vst [vmem:[#allocation15_spill] sm:$0xff] %v11542_v24 }
 0x31c   : > { %v11546_v6 = vpop.f32.mrf.mxu0 }
 0x31d   : > { %v11544_v21 = vpop.f32.mrf.mxu1  ;;  %12204 = vst [vmem:[#allocation25_spill] sm:$0xff] %v11546_v6 }
 0x31e   : > { %v11550_v63 = vpop.f32.mrf.mxu0 }
 0x31f   : > { %v11548_v38 = vpop.f32.mrf.mxu1  ;;  %12205 = vst [vmem:[#allocation17_spill] sm:$0xff] %v11550_v63 }
 0x320   : > { %v11554_v46 = vpop.f32.mrf.mxu0 }
 0x321   : > { %v11552_v28 = vpop.f32.mrf.mxu1  ;;  %12206 = vst [vmem:[#allocation18_spill] sm:$0xff] %v11554_v46 }
 0x323   : > { %v11556_v12 = vpop.f32.mrf.mxu1 }
 0x324   : > { %12207 = vst [vmem:[#allocation21_spill] sm:$0xff] %v11556_v12  ;;  %v11558_v52 = vpop.f32.mrf.mxu0 }
 0x325   : > { %12208 = vst [vmem:[#allocation26_spill] sm:$0xff] %v11558_v52  ;;  %v11560_v5 = vpop.f32.mrf.mxu1 }
 0x326   : > { %12209 = vst [vmem:[#allocation23_spill] sm:$0xff] %v11560_v5  ;;  %v11562_v2 = vpop.f32.mrf.mxu0 }
 0x327   : > { %12210 = vst [vmem:[#allocation24_spill] sm:$0xff] %v11562_v2  ;;  %v11564_v24 = vpop.f32.mrf.mxu1 }
 0x328   : > { %12211 = vst [vmem:[#allocation32_spill] sm:$0xff] %v11564_v24  ;;  %v11566_v6 = vpop.f32.mrf.mxu0 }
 0x329   : > { %12212 = vst [vmem:[#allocation27_spill] sm:$0xff] %v11566_v6  ;;  %v11568_v32 = vpop.f32.mrf.mxu1 }
 0x32a   : > { %12213 = vst [vmem:[#allocation28_spill] sm:$0xff] %v11568_v32  ;;  %v11570_v63 = vpop.f32.mrf.mxu0 }
 0x32b   : > { %12214 = vst [vmem:[#allocation29_spill] sm:$0xff] %v11570_v63  ;;  %v11572_v51 = vpop.f32.mrf.mxu1 }
 0x32c   : > { %12215 = vst [vmem:[#allocation30_spill] sm:$0xff] %v11572_v51  ;;  %v11594_v51 = vld [vmem:[%s9141_s0] sm:$0xff]  }
 0x32d   : > { %v11574_v46 = vpop.f32.mrf.mxu1  ;;  %v11576_v12 = vpop.f32.mrf.mxu0  ;;  %12224 = vst [vmem:[#allocation40_spill] sm:$0xff] %v11594_v51 }
 0x32e   : > { %12216 = vst [vmem:[#allocation31_spill] sm:$0xff] %v11574_v46  ;;  %12217 = vst [vmem:[#allocation33_spill] sm:$0xff] %v11576_v12 }
 0x32f   : > { %v11578_v52 = vpop.f32.mrf.mxu1  ;;  %v11580_v5 = vpop.f32.mrf.mxu0 }
 0x330   : > { %12218 = vst [vmem:[#allocation34_spill] sm:$0xff] %v11578_v52  ;;  %12219 = vst [vmem:[#allocation35_spill] sm:$0xff] %v11580_v5  ;;  %v5343_v5 = vadd.f32 %v11486_v1, %v11386_v62  ;;  %v11633_v1 = vld [vmem:[%s9141_s0 + $0x20] sm:$0xff]   ;;  %v5346_v62 = vadd.f32 %v11512_v8, %v11407_v3 }
 0x331   : > { %v11582_v2 = vpop.f32.mrf.mxu1  ;;  %v11584_v24 = vpop.f32.mrf.mxu0 }
 0x332   : > { %12220 = vst [vmem:[#allocation36_spill] sm:$0xff] %v11582_v2  ;;  %12221 = vst [vmem:[#allocation37_spill] sm:$0xff] %v11584_v24  ;;  %v5347_v2 = vadd.f32 %v8307_v18, %v11398_v22  ;;  %v11617_v22 = vld [vmem:[%s9141_s0 + $0x10] sm:$0xff]  }
 0x333   : > { %v5313_v6 = vpop.f32.mrf.mxu1  ;;  %v11589_v63 = vpop.f32.mrf.mxu0 }
 0x334   : > { %v11587_v32 = vadd.f32 %v5313_v6, %v11473_v44  ;;  %12223 = vst [vmem:[#allocation39_spill] sm:$0xff] %v11589_v63  ;;  %v11604_v44 = vld [vmem:[%s9141_s0 + $0x8] sm:$0xff]   ;;  %v5341_v63 = vadd.f32 %v11492_v60, %v11389_v48  ;;  %v5345_v6 = vadd.f32 %v11504_v20, %v11401_v34  ;;  %v5342_v48 = vadd.f32 %v11500_v58, %v11395_v19  ;;  %v11659_v20 = vld [vmem:[%s9141_s0 + $0x38] sm:$0xff]  }
 0x335   : > { %v11591_v46 = vpop.f32.mrf.mxu1  ;;  %12227 = vst [vmem:[#allocation43_spill] sm:$0xff] %v11604_v44  ;;  %v11629_v44 = vld [vmem:[%s9141_s0 + $0x28] sm:$0xff]   ;;  %v5348_v34 = vadd.f32 %v11508_v36, %v11404_v59  ;;  %v5349_v19 = vadd.f32 %v11520_v35, %v11413_v10  ;;  %v5352_v59 = vadd.f32 %v11522_v25, %v11416_v30  ;;  %v6097_v58 = vadd.f32 %v11461_v53, %v5343_v5  ;;  %v11673_v5 = vld [vmem:[%s12097_s6] ss:$0 sm:$0xff] }
 0x336   : > { %12222 = vst [vmem:[#allocation38_spill] sm:$0xff] %v11587_v32  ;;  %v11609_v32 = vld [vmem:[%s9141_s0 + $0x18] sm:$0xff]   ;;  %v6902_v3 = vunpack.c.l.bf16 %v11659_v20  ;;  %v6099_v10 = vadd.f32 %v11494_v7, %v5345_v6  ;;  %v5355_v30 = vadd.f32 %v11530_v57, %v11422_v45  ;;  %v6100_v7 = vadd.f32 %v11502_v17, %v5346_v62 }
 0x337   : > { %v11598_v52 = vpop.f32.mrf.mxu1  ;;  %v11601_v24 = vpop.f32.mrf.mxu0  ;;  %v6102_v35 = vadd.f32 %v11498_v27, %v5348_v34 }
 0x338   : > { %12225 = vst [vmem:[#allocation41_spill] sm:$0xff] %v11598_v52  ;;  %12226 = vst [vmem:[#allocation42_spill] sm:$0xff] %v11601_v24  ;;  %v5344_v52 = vadd.f32 %v11496_v43, %v11392_v23  ;;  %v5351_v24 = vadd.f32 %v11516_v16, %v11410_v31  ;;  %v6101_v23 = vadd.f32 %v11488_v0, %v5347_v2  ;;  %v6897_v43 = vunpack.c.h.bf16 %v11633_v1 }
 0x339   : > { %v11614_v51 = vpop.f32.mrf.mxu1  ;;  %v11626_v12 = vpop.f32.mrf.mxu0  ;;  %v5350_v31 = vadd.f32 %v11526_v41, %v11419_v33  ;;  %v6095_v2 = vadd.f32 %v11466_v61, %v5341_v63  ;;  %v6096_v16 = vadd.f32 %v11479_v11, %v5342_v48  ;;  %v5353_v41 = vadd.f32 %v11534_v55, %v11425_v47 }
 0x33a   : > { %v6098_v53 = vadd.f32 %v11471_v26, %v5344_v52  ;;  %v6105_v45 = vadd.f32 %v11506_v54, %v5351_v24  ;;  %v6103_v52 = vadd.f32 %v11510_v15, %v5349_v19  ;;  %v6106_v26 = vadd.f32 %v11514_v13, %v5352_v59 }
 0x33b   : > { %v11642_v60 = vpop.f32.mrf.mxu1  ;;  %v11649_v18 = vpop.f32.mrf.mxu0  ;;  %v6104_v17 = vadd.f32 %v11518_v40, %v5350_v31  ;;  %v5356_v24 = vadd.f32 %v11538_v49, %v11428_v50  ;;  %v6109_v15 = vadd.f32 %v11524_v29, %v5355_v30 }
 0x33d   : > { %v8403_v36 = vpop.f32.mrf.mxu1  ;;  %v11664_v8 = vpop.f32.mrf.mxu0 }
 0x33e   : > { %v6599_v0 = vadd.f32 %v8403_v36, %v6101_v23 }
 0x33f   : > { %v6482_v33 = vpop.f32.mrf.mxu1  ;;  %v8399_v25 = vpop.f32.mrf.mxu0 }
 0x340   : > { %v11679_v61 = vadd.f32 %v11673_v5, %v6599_v0  ;;  %v6597_v63 = vadd.f32 %v6482_v33, %v6099_v10  ;;  %v6595_v57 = vadd.f32 %v8399_v25, %v6097_v58  ;;  %v6107_v58 = vadd.f32 %v11528_v39, %v5353_v41 }
 0x341   : > { %v8404_v6 = vpop.f32.mrf.mxu1  ;;  %v6466_v11 = vpop.f32.mrf.mxu0  ;;  %v5354_v25 = vadd.f32 %v11540_v37, %v11431_v56 }
 0x342   : > { %v7649_v27 = vmul.f32 -1.442695, %v11679_v61  ;;  %v11689_v48 = vadd.f32 %v11673_v5, %v6597_v63  ;;  %v6600_v34 = vadd.f32 %v8404_v6, %v6102_v35  ;;  %v11695_v47 = vadd.f32 %v11673_v5, %v6595_v57 }
 0x343   : > { %v6593_v54 = vadd.f32 %v6466_v11, %v6095_v2  ;;  %v6485_v55 = vpop.f32.mrf.mxu1  ;;  %v8400_v13 = vpop.f32.mrf.mxu0  ;;  %v5359_v6 = vadd.f32 %v11544_v21, %v11434_v9  ;;  %v12228_v21 = vld [vmem:[#allocation22_spill] sm:$0xff] }
 0x344   : > { %8787 = vpow2.f32 %v7649_v27  ;;  %v7647_v62 = vmul.f32 -1.442695, %v11689_v48  ;;  %v11700_v23 = vadd.f32 %v11673_v5, %v6600_v34  ;;  %v6598_v19 = vadd.f32 %v6485_v55, %v6100_v7 }
 0x345   : > { %v7645_v40 = vmul.f32 -1.442695, %v11695_v47  ;;  %v11704_v59 = vadd.f32 %v11673_v5, %v6593_v54  ;;  %v6596_v50 = vadd.f32 %v8400_v13, %v6098_v53  ;;  %v8407_v49 = vpop.f32.mrf.mxu1  ;;  %v6469_v36 = vpop.f32.mrf.mxu0  ;;  %v5357_v54 = vadd.f32 %v11548_v38, %v11437_v14  ;;  %v12233_v38 = vld [vmem:[#allocation7_spill] sm:$0xff] }
 0x346   : > { %8789 = vpow2.f32 %v7647_v62  ;;  %v7650_v29 = vmul.f32 -1.442695, %v11700_v23  ;;  %v11709_v31 = vadd.f32 %v11673_v5, %v6598_v19  ;;  %v6603_v2 = vadd.f32 %v8407_v49, %v6105_v45  ;;  %v12229_v62 = vld [vmem:[#allocation6_spill] sm:$0xff]  ;;  %v12230_v19 = vld [vmem:[#allocation21_spill] sm:$0xff]  ;;  %v12234_v49 = vld [vmem:[#allocation32_spill] sm:$0xff] }
 0x347   : > { %8791 = vpow2.f32 %v7645_v40  ;;  %v7643_v0 = vmul.f32 -1.442695, %v11704_v59  ;;  %v11713_v10 = vadd.f32 %v11673_v5, %v6596_v50  ;;  %v6594_v30 = vadd.f32 %v6469_v36, %v6096_v16  ;;  %v6498_v33 = vpop.f32.mrf.mxu1  ;;  %v12231_v40 = vld [vmem:[#allocation12_spill] sm:$0xff]  ;;  %v12232_v50 = vld [vmem:[#allocation23_spill] sm:$0xff] }
 0x348   : > { %8793 = vpow2.f32 %v7650_v29  ;;  %v7648_v53 = vmul.f32 -1.442695, %v11709_v31  ;;  %v11717_v39 = vadd.f32 %v11673_v5, %v6603_v2  ;;  %v6601_v35 = vadd.f32 %v6498_v33, %v6103_v52  ;;  %v12235_v36 = vld [vmem:[#allocation15_spill] sm:$0xff]  ;;  %v12236_v2 = vld [vmem:[#allocation8_spill] sm:$0xff] }
 0x349   : > { %8795 = vpow2.f32 %v7643_v0  ;;  %v7646_v63 = vmul.f32 -1.442695, %v11713_v10  ;;  %v11723_v7 = vadd.f32 %v11673_v5, %v6594_v30  ;;  %v8408_v45 = vpop.f32.mrf.mxu1  ;;  %v6110_v52 = vadd.f32 %v11532_v42, %v5356_v24  ;;  %v12237_v0 = vld [vmem:[#allocation28_spill] sm:$0xff] }
 0x34a   : > { %8797 = vpow2.f32 %v7648_v53  ;;  %v7653_v16 = vmul.f32 -1.442695, %v11717_v39  ;;  %v11727_v41 = vadd.f32 %v11673_v5, %v6601_v35  ;;  %v6604_v57 = vadd.f32 %v8408_v45, %v6106_v26  ;;  %v12238_v35 = vld [vmem:[#allocation14_spill] sm:$0xff]  ;;  %v12240_v45 = vld [vmem:[#allocation16_spill] sm:$0xff] }
 0x34b   : > { %8799 = vpow2.f32 %v7646_v63  ;;  %v7644_v56 = vmul.f32 -1.442695, %v11723_v7  ;;  %v6501_v37 = vpop.f32.mrf.mxu1  ;;  %v5360_v26 = vadd.f32 %v11552_v28, %v11440_v4  ;;  %v6108_v55 = vadd.f32 %v12228_v21, %v5354_v25  ;;  %v12239_v25 = vld [vmem:[#allocation30_spill] sm:$0xff] }
 0x34c   : > { %8801 = vpow2.f32 %v7653_v16  ;;  %v7651_v11 = vmul.f32 -1.442695, %v11727_v41  ;;  %v11735_v27 = vadd.f32 %v11673_v5, %v6604_v57  ;;  %v6602_v34 = vadd.f32 %v6501_v37, %v6104_v17  ;;  %v12241_v16 = vld [vmem:[#allocation31_spill] sm:$0xff]  ;;  %v12242_v37 = vld [vmem:[#allocation25_spill] sm:$0xff]  ;;  %v12245_v21 = vld [vmem:[#allocation34_spill] sm:$0xff] }
 0x34d   : > { %8803 = vpow2.f32 %v7644_v56  ;;  %v8411_v9 = vpop.f32.mrf.mxu1  ;;  %v5358_v17 = vadd.f32 %v12230_v19, %v12229_v62  ;;  %v5363_v14 = vadd.f32 %v12232_v50, %v12231_v40  ;;  %v5361_v4 = vadd.f32 %v12234_v49, %v12233_v38  ;;  %v12246_v38 = vld [vmem:[#allocation18_spill] sm:$0xff] }
 0x34e   : > { %8805 = vpow2.f32 %v7651_v11  ;;  %v7654_v42 = vmul.f32 -1.442695, %v11735_v27  ;;  %v11744_v24 = vadd.f32 %v11673_v5, %v6602_v34  ;;  %v6607_v13 = vadd.f32 %v8411_v9, %v6109_v15  ;;  %v12244_v9 = vld [vmem:[#allocation9_spill] sm:$0xff] }
 0x34f   : > { %v6514_v28 = vpop.f32.mrf.mxu1  ;;  %v6113_v29 = vadd.f32 %v12235_v36, %v5359_v6  ;;  %v5364_v30 = vadd.f32 %v12237_v0, %v12236_v2  ;;  %v5362_v63 = vadd.f32 %v12239_v25, %v12238_v35  ;;  %v5367_v57 = vadd.f32 %v12241_v16, %v12240_v45  ;;  %v12243_v6 = vld [vmem:[#allocation17_spill] sm:$0xff]  ;;  %v12247_v36 = vld [vmem:[#allocation26_spill] sm:$0xff]  ;;  %v12248_v0 = vld [vmem:[#allocation24_spill] sm:$0xff] }
 0x350   : > { %8807 = vpow2.f32 %v7654_v42  ;;  %v7652_v33 = vmul.f32 -1.442695, %v11744_v24  ;;  %v11757_v15 = vadd.f32 %v11673_v5, %v6607_v13  ;;  %v6111_v11 = vadd.f32 %v12242_v37, %v5357_v54  ;;  %v12250_v25 = vld [vmem:[#allocation36_spill] sm:$0xff] }
 0x351   : > { %v8788_v53 = vpop.eup %8787  ;;  %v8412_v56 = vpop.f32.mrf.mxu1  ;;  %v6114_v34 = vadd.f32 %v12243_v6, %v5360_v26  ;;  %v5365_v42 = vadd.f32 %v12245_v21, %v12244_v9  ;;  %v6605_v40 = vadd.f32 %v6514_v28, %v6107_v58  ;;  %v6112_v49 = vadd.f32 %v12246_v38, %v5358_v17  ;;  %v12249_v26 = vld [vmem:[#allocation20_spill] sm:$0xff]  ;;  %v12252_v6 = vld [vmem:[#allocation29_spill] sm:$0xff] }
 0x352   : > { %v6766_v62 = vadd.f32 1.0, %v8788_v53  ;;  %8809 = vpow2.f32 %v7652_v33  ;;  %v7657_v13 = vmul.f32 -1.442695, %v11757_v15  ;;  %v11770_v2 = vadd.f32 %v12247_v36, %v5363_v14  ;;  %v12251_v33 = vld [vmem:[#allocation27_spill] sm:$0xff]  ;;  %v12253_v21 = vld [vmem:[#allocation33_spill] sm:$0xff] }
 0x353   : > { %v8790_v19 = vpop.eup %8789  ;;  %v6517_v50 = vpop.f32.mrf.mxu1  ;;  %v11773_v35 = vadd.f32 %v12248_v0, %v5361_v4  ;;  %v5368_v45 = vadd.f32 %v12250_v25, %v12249_v26  ;;  %v11778_v16 = vadd.f32 %v12251_v33, %v5364_v30  ;;  %v6608_v28 = vadd.f32 %v8412_v56, %v6110_v52  ;;  %v12254_v36 = vld [vmem:[#allocation35_spill] sm:$0xff]  ;;  %v12255_v26 = vld [vmem:[#allocation37_spill] sm:$0xff] }
 0x354   : > { %v8792_v54 = vpop.eup %8791  ;;  %8811 = vrcp.f32 %v6766_v62  ;;  %v6764_v53 = vadd.f32 1.0, %v8790_v19  ;;  %v11781_v14 = vadd.f32 %v12252_v6, %v5362_v63  ;;  %v11784_v38 = vadd.f32 %v12253_v21, %v5367_v57 }
 0x355   : > { %v8794_v37 = vpop.eup %8793  ;;  %v6762_v58 = vadd.f32 1.0, %v8792_v54  ;;  %8813 = vpow2.f32 %v7657_v13  ;;  %v8415_v17 = vpop.f32.mrf.mxu1  ;;  %v11787_v62 = vadd.f32 %v12254_v36, %v5365_v42  ;;  %v11790_v0 = vadd.f32 %v11673_v5, %v6605_v40  ;;  %v12256_v40 = vld [vmem:[#allocation10_spill] sm:$0xff] }
 0x356   : > { %v8796_v9 = vpop.eup %8795  ;;  %8815 = vrcp.f32 %v6764_v53  ;;  %v6767_v4 = vadd.f32 1.0, %v8794_v37  ;;  %v6606_v52 = vadd.f32 %v6517_v50, %v6108_v55  ;;  %v6611_v54 = vadd.f32 %v8415_v17, %v6113_v29 }
 0x357   : > { %v8798_v19 = vpop.eup %8797  ;;  %8817 = vrcp.f32 %v6762_v58  ;;  %v6760_v30 = vadd.f32 1.0, %v8796_v9  ;;  %v6530_v56 = vpop.f32.mrf.mxu1  ;;  %v11793_v25 = vadd.f32 %v12255_v26, %v5368_v45  ;;  %v11796_v42 = vadd.f32 %v11673_v5, %v6608_v28  ;;  %v12260_v26 = vld [vmem:[#allocation39_spill] sm:$0xff] }
 0x358   : > { %v8800_v13 = vpop.eup %8799  ;;  %8819 = vrcp.f32 %v6767_v4  ;;  %v6765_v63 = vadd.f32 1.0, %v8798_v19  ;;  %v6609_v33 = vadd.f32 %v6530_v56, %v6111_v11  ;;  %v11800_v55 = vadd.f32 %v11591_v46, %v12256_v40  ;;  %v12258_v56 = vld [vmem:[#allocation41_spill] sm:$0xff] }
 0x359   : > { %v8802_v57 = vpop.eup %8801  ;;  %8821 = vrcp.f32 %v6760_v30  ;;  %v6763_v53 = vadd.f32 1.0, %v8800_v13  ;;  %v8416_v37 = vpop.f32.mrf.mxu1  ;;  %v7655_v17 = vmul.f32 -1.442695, %v11790_v0  ;;  %v11804_v9 = vadd.f32 %v11673_v5, %v6606_v52  ;;  %v12257_v52 = vld [vmem:[#allocation11_spill] sm:$0xff] }
 0x35a   : > { %v8804_v58 = vpop.eup %8803  ;;  %8823 = vrcp.f32 %v6765_v63  ;;  %v6770_v50 = vadd.f32 1.0, %v8802_v57  ;;  %v6612_v6 = vadd.f32 %v8416_v37, %v6114_v34  ;;  %v11807_v4 = vadd.f32 %v11673_v5, %v6611_v54  ;;  %v12259_v54 = vld [vmem:[#allocation38_spill] sm:$0xff] }
 0x35b   : > { %v8806_v29 = vpop.eup %8805  ;;  %8825 = vrcp.f32 %v6763_v53  ;;  %v6761_v45 = vadd.f32 1.0, %v8804_v58  ;;  %v6533_v28 = vpop.f32.mrf.mxu1  ;;  %v7658_v34 = vmul.f32 -1.442695, %v11796_v42  ;;  %v11811_v36 = vadd.f32 %v11673_v5, %v6609_v33 }
 0x35c   : > { %8827 = vrcp.f32 %v6770_v50  ;;  %v6768_v11 = vadd.f32 1.0, %v8806_v29  ;;  %v6610_v46 = vadd.f32 %v6533_v28, %v6112_v49  ;;  %v11814_v19 = vadd.f32 %v11673_v5, %v6612_v6 }
 0x35d   : > { %v8808_v21 = vpop.eup %8807  ;;  %8829 = vrcp.f32 %v6761_v45  ;;  %v8419_v30 = vpop.f32.mrf.mxu1  ;;  %v11818_v13 = vadd.f32 %v12258_v56, %v12257_v52  ;;  %v11822_v49 = vadd.f32 %v12260_v26, %v12259_v54  ;;  %v7656_v53 = vmul.f32 -1.442695, %v11804_v9 }
 0x35e   : > { %8831 = vrcp.f32 %v6768_v11  ;;  %v6771_v63 = vadd.f32 1.0, %v8808_v21  ;;  %v11827_v33 = vadd.f32 %v11673_v5, %v6610_v46  ;;  %v6615_v37 = vadd.f32 %v8419_v30, %v11770_v2 }
 0x35f   : > { %v8810_v57 = vpop.eup %8809  ;;  %8833 = vpow2.f32 %v7655_v17  ;;  %v6546_v58 = vpop.f32.mrf.mxu1  ;;  %v7661_v50 = vmul.f32 -1.442695, %v11807_v4  ;;  %v7659_v45 = vmul.f32 -1.442695, %v11811_v36  ;;  %v7662_v17 = vmul.f32 -1.442695, %v11814_v19 }
 0x360   : > { %8835 = vrcp.f32 %v6771_v63  ;;  %v6769_v40 = vadd.f32 1.0, %v8810_v57  ;;  %v6613_v6 = vadd.f32 %v6546_v58, %v11773_v35  ;;  %v11835_v28 = vadd.f32 %v11673_v5, %v6615_v37 }
 0x361   : > { %v8812_v29 = vpop.eup %8811  ;;  %8837 = vpow2.f32 %v7658_v34  ;;  %v8420_v11 = vpop.f32.mrf.mxu1  ;;  %v7660_v52 = vmul.f32 -1.442695, %v11827_v33  ;;  %v12261_v26 = vunpack.c.l.bf16 %v11609_v32 }
 0x362   : > { %v8814_v46 = vpop.eup %8813  ;;  %v6862_v2 = vmul.f32 %v8812_v29, %v11679_v61  ;;  %8839 = vrcp.f32 %v6769_v40  ;;  %v11841_v21 = vadd.f32 %v11673_v5, %v6613_v6  ;;  %v6616_v35 = vadd.f32 %v8420_v11, %v11778_v16 }
 0x363   : > { %v8816_v34 = vpop.eup %8815  ;;  %v6774_v30 = vadd.f32 1.0, %v8814_v46  ;;  %8841 = vpow2.f32 %v7656_v53  ;;  %v7665_v56 = vmul.f32 -1.442695, %v11835_v28  ;;  %v6549_v63 = vpop.f32.mrf.mxu1 }
 0x364   : > { %v8818_v54 = vpop.eup %8817  ;;  %v6926_v57 = vadd.f32 %v12261_v26, %v6862_v2  ;;  %v6860_v61 = vmul.f32 %v8816_v34, %v11689_v48  ;;  %8843 = vpow2.f32 %v7661_v50  ;;  %v7663_v37 = vmul.f32 -1.442695, %v11841_v21  ;;  %v12263_v2 = vld [vmem:[#allocation43_spill] sm:$0xff] }
 0x365   : > { %v8820_v58 = vpop.eup %8819  ;;  %v6858_v16 = vmul.f32 %v8818_v54, %v11695_v47  ;;  %8845 = vrcp.f32 %v6774_v30  ;;  %v11852_v53 = vadd.f32 %v11673_v5, %v6616_v35  ;;  %v6614_v40 = vadd.f32 %v6549_v63, %v11781_v14  ;;  %v8423_v6 = vpop.f32.mrf.mxu1 }
 0x366   : > { %v8822_v29 = vpop.eup %8821  ;;  %6958 = vst.msk [vmem:[%s11855_s8 + $0x30] sm:$0xff] %vm641_vm0, %v6926_v57  ;;  %v12262_v48 = vunpack.c.l.bf16 %v11617_v22  ;;  %v6863_v11 = vmul.f32 %v8820_v58, %v11700_v23  ;;  %8847 = vpow2.f32 %v7659_v45  ;;  %v6619_v47 = vadd.f32 %v8423_v6, %v11784_v38 }
 0x367   : > { %v8824_v46 = vpop.eup %8823  ;;  %v12264_v14 = vunpack.c.l.bf16 %v12263_v2  ;;  %v6856_v34 = vmul.f32 %v8822_v29, %v11704_v59  ;;  %8849 = vpow2.f32 %v7662_v17  ;;  %v7666_v30 = vmul.f32 -1.442695, %v11852_v53  ;;  %v6562_v63 = vpop.f32.mrf.mxu1  ;;  %v12266_v59 = vld [vmem:[#allocation40_spill] sm:$0xff] }
 0x368   : > { %v6924_v50 = vadd.f32 %v12262_v48, %v6860_v61  ;;  %v8826_v54 = vpop.eup %8825  ;;  %v12265_v23 = vunpack.c.h.bf16 %v11609_v32  ;;  %v6861_v45 = vmul.f32 %v8824_v46, %v11709_v31  ;;  %8851 = vpow2.f32 %v7660_v52 }
 0x369   : > { %v6922_v35 = vadd.f32 %v12264_v14, %v6858_v16  ;;  %v11873_v38 = vadd.f32 %v11673_v5, %v6614_v40  ;;  %v8828_v57 = vpop.eup %8827  ;;  %v12267_v17 = vunpack.c.l.bf16 %v12266_v59  ;;  %v6859_v58 = vmul.f32 %v8826_v54, %v11713_v10  ;;  %v8424_v32 = vpop.f32.mrf.mxu1 }
 0x36a   : > { %6956 = vst.msk [vmem:[%s11855_s8 + $0x20] sm:$0xff] %vm641_vm0, %v6924_v50  ;;  %v6927_v26 = vadd.f32 %v12265_v23, %v6863_v11  ;;  %8853 = vpow2.f32 %v7665_v56  ;;  %v11881_v16 = vadd.f32 %v11673_v5, %v6619_v47  ;;  %v8830_v31 = vpop.eup %8829  ;;  %v12268_v52 = vunpack.c.h.bf16 %v11617_v22 }
 0x36b   : > { %6954 = vst.msk [vmem:[%s11855_s8 + $0x10] sm:$0xff] %vm641_vm0, %v6922_v35  ;;  %v6920_v61 = vadd.f32 %v12267_v17, %v6856_v34  ;;  %v6866_v6 = vmul.f32 %v8828_v57, %v11717_v39  ;;  %8855 = vpow2.f32 %v7663_v37  ;;  %v7664_v29 = vmul.f32 -1.442695, %v11873_v38  ;;  %v8832_v48 = vpop.eup %8831  ;;  %v6565_v22 = vpop.f32.mrf.mxu1  ;;  %v12274_v17 = vld [vmem:[#allocation13_spill] sm:$0xff] }
 0x36c   : > { %6959 = vst.msk [vmem:[%s11855_s8 + $0x38] sm:$0xff] %vm641_vm0, %v6927_v26  ;;  %v6925_v40 = vadd.f32 %v12268_v52, %v6861_v45  ;;  %v12269_v10 = vunpack.c.h.bf16 %v12263_v2  ;;  %v6857_v50 = vmul.f32 %v8830_v31, %v11723_v7  ;;  %8857 = vpow2.f32 %v7666_v30  ;;  %v8834_v47 = vpop.eup %8833  ;;  %v12273_v45 = vld [vmem:[#allocation42_spill] sm:$0xff]  ;;  %v12275_v31 = vld [vmem:[#allocation19_spill] sm:$0xff] }
 0x36d   : > { %6952 = vst.msk [vmem:[%s11855_s8] sm:$0xff] %vm641_vm0, %v6920_v61  ;;  %v7669_v11 = vmul.f32 -1.442695, %v11881_v16  ;;  %v12270_v39 = vunpack.c.l.bf16 %v11629_v44  ;;  %v6864_v46 = vmul.f32 %v8832_v48, %v11727_v41  ;;  %8859 = vpow2.f32 %v7664_v29  ;;  %v8836_v2 = vpop.eup %8835  ;;  %v8427_v54 = vpop.f32.mrf.mxu1 }
 0x36e   : > { %v6923_v56 = vadd.f32 %v12269_v10, %v6859_v58  ;;  %6957 = vst.msk [vmem:[%s11855_s8 + $0x28] sm:$0xff] %vm641_vm0, %v6925_v40  ;;  %v6617_v14 = vadd.f32 %v6562_v63, %v11787_v62  ;;  %v12271_v7 = vunpack.c.h.bf16 %v12266_v59  ;;  %v6772_v34 = vadd.f32 1.0, %v8834_v47  ;;  %v8838_v23 = vpop.eup %8837 }
 0x36f   : > { %v6930_v37 = vadd.f32 %v12270_v39, %v6866_v6  ;;  %8861 = vpow2.f32 %v7669_v11  ;;  %v6620_v30 = vadd.f32 %v8424_v32, %v11793_v25  ;;  %v12272_v41 = vunpack.c.l.bf16 %v11633_v1  ;;  %v8840_v59 = vpop.eup %8839  ;;  %v6578_v32 = vpop.f32.mrf.mxu1 }
 0x370   : > { %6955 = vst.msk [vmem:[%s11855_s8 + $0x18] sm:$0xff] %vm641_vm0, %v6923_v56  ;;  %v6921_v35 = vadd.f32 %v12271_v7, %v6857_v50  ;;  %v6867_v62 = vmul.f32 %v8836_v2, %v11735_v27  ;;  %v11912_v63 = vadd.f32 %v11673_v5, %v6617_v14  ;;  %v6125_v57 = vadd.f32 %v12273_v45, %v11800_v55  ;;  %v8842_v27 = vpop.eup %8841 }
 0x371   : > { %6962 = vst.msk [vmem:[%s11855_s8 + $0x50] sm:$0xff] %vm641_vm0, %v6930_v37  ;;  %v6928_v26 = vadd.f32 %v12272_v41, %v6864_v46  ;;  %v5372_v25 = vadd.f32 %v11614_v51, %v12274_v17  ;;  %8863 = vrcp.f32 %v6772_v34  ;;  %v6775_v61 = vadd.f32 1.0, %v8838_v23  ;;  %v8844_v29 = vpop.eup %8843  ;;  %v8428_v50 = vpop.f32.mrf.mxu1 }
 0x372   : > { %6953 = vst.msk [vmem:[%s11855_s8 + $0x8] sm:$0xff] %vm641_vm0, %v6921_v35  ;;  %v11921_v58 = vadd.f32 %v11673_v5, %v6620_v30  ;;  %v5370_v52 = vadd.f32 %v11642_v60, %v12275_v31  ;;  %v12276_v55 = vunpack.c.h.bf16 %v11629_v44  ;;  %v6865_v51 = vmul.f32 %v8840_v59, %v11744_v24  ;;  %v8846_v60 = vpop.eup %8845  ;;  %v8931_v59 = vld [vmem:[%s9141_s0 + $0x30] sm:$0xff]  }
 0x373   : > { %6960 = vst.msk [vmem:[%s11855_s8 + $0x40] sm:$0xff] %vm641_vm0, %v6928_v26  ;;  %v7667_v6 = vmul.f32 -1.442695, %v11912_v63  ;;  %8865 = vrcp.f32 %v6775_v61  ;;  %v6773_v48 = vadd.f32 1.0, %v8842_v27  ;;  %v6123_v56 = vadd.f32 %v11626_v12, %v11818_v13  ;;  %v8848_v47 = vpop.eup %8847 }
 0x374   : > { %v6931_v40 = vadd.f32 %v12276_v55, %v6867_v62  ;;  %v7670_v10 = vmul.f32 -1.442695, %v11921_v58  ;;  %v6929_v44 = vadd.f32 %v6897_v43, %v6865_v51  ;;  %v6778_v11 = vadd.f32 1.0, %v8844_v29  ;;  %v8850_v14 = vpop.eup %8849  ;;  %v6581_v43 = vpop.f32.mrf.mxu1 }
 0x375   : > { %8867 = vpow2.f32 %v7667_v6  ;;  %v6618_v24 = vadd.f32 %v6565_v22, %v11822_v49  ;;  %v6870_v39 = vmul.f32 %v8846_v60, %v11757_v15  ;;  %v6623_v37 = vadd.f32 %v8427_v54, %v6125_v57  ;;  %v8852_v2 = vpop.eup %8851 }
 0x376   : > { %6963 = vst.msk [vmem:[%s11855_s8 + $0x58] sm:$0xff] %vm641_vm0, %v6931_v40  ;;  %8869 = vrcp.f32 %v6773_v48  ;;  %v6126_v46 = vadd.f32 %v11649_v18, %v5372_v25  ;;  %6961 = vst.msk [vmem:[%s11855_s8 + $0x48] sm:$0xff] %vm641_vm0, %v6929_v44  ;;  %v6776_v12 = vadd.f32 1.0, %v8848_v47  ;;  %v6621_v13 = vadd.f32 %v6578_v32, %v6123_v56 }
 0x377   : > { %8871 = vrcp.f32 %v6778_v11  ;;  %v6124_v1 = vadd.f32 %v11664_v8, %v5370_v52  ;;  %v6934_v49 = vadd.f32 %v6902_v3, %v6870_v39  ;;  %v6779_v22 = vadd.f32 1.0, %v8850_v14  ;;  %v8854_v7 = vpop.eup %8853 }
 0x378   : > { %8873 = vpow2.f32 %v7670_v10  ;;  %v6624_v15 = vadd.f32 %v8428_v50, %v6126_v46  ;;  %v6777_v18 = vadd.f32 1.0, %v8852_v2  ;;  %v11947_v35 = vadd.f32 %v11673_v5, %v6618_v24  ;;  %v8856_v34 = vpop.eup %8855 }
 0x379   : > { %8875 = vrcp.f32 %v6776_v12  ;;  %6966 = vst.msk [vmem:[%s11855_s8 + $0x70] sm:$0xff] %vm641_vm0, %v6934_v49  ;;  %v6782_v8 = vadd.f32 1.0, %v8854_v7  ;;  %v11952_v30 = vadd.f32 %v11673_v5, %v6623_v37  ;;  %v6622_v54 = vadd.f32 %v6581_v43, %v6124_v1  ;;  %v8858_v3 = vpop.eup %8857  ;;  %v8933_v37 = vld [vmem:[%s9141_s0 + $0x40] sm:$0xff]  }
 0x37a   : > { %8877 = vrcp.f32 %v6779_v22  ;;  %v6780_v23 = vadd.f32 1.0, %v8856_v34  ;;  %v11955_v41 = vadd.f32 %v11673_v5, %v6621_v13  ;;  %v8860_v26 = vpop.eup %8859  ;;  %v6783_v62 = vadd.f32 1.0, %v8858_v3 }
 0x37b   : > { %8879 = vrcp.f32 %v6777_v18  ;;  %v11958_v45 = vadd.f32 %v11673_v5, %v6624_v15  ;;  %v6900_v17 = vunpack.c.l.bf16 %v8931_v59  ;;  %v6781_v25 = vadd.f32 1.0, %v8860_v26  ;;  %v8934_v15 = vld [vmem:[%s9141_s0 + $0x58] sm:$0xff]  }
 0x37c   : > { %8881 = vrcp.f32 %v6782_v8  ;;  %v8862_v57 = vpop.eup %8861  ;;  %v7668_v61 = vmul.f32 -1.442695, %v11947_v35  ;;  %v7673_v27 = vmul.f32 -1.442695, %v11952_v30  ;;  %v11964_v31 = vadd.f32 %v11673_v5, %v6622_v54  ;;  %v8935_v54 = vld [vmem:[%s9141_s0 + $0x50] sm:$0xff]  }
 0x37d   : > { %8883 = vrcp.f32 %v6780_v23  ;;  %v6786_v32 = vadd.f32 1.0, %v8862_v57  ;;  %v7671_v55 = vmul.f32 -1.442695, %v11955_v41  ;;  %v6903_v51 = vunpack.c.h.bf16 %v11659_v20 }
 0x37e   : > { %8885 = vrcp.f32 %v6783_v62  ;;  %v8864_v52 = vpop.eup %8863  ;;  %v7674_v6 = vmul.f32 -1.442695, %v11958_v45  ;;  %v6901_v48 = vunpack.c.h.bf16 %v8931_v59  ;;  %v7672_v50 = vmul.f32 -1.442695, %v11964_v31 }
 0x37f   : > { %8887 = vrcp.f32 %v6781_v25  ;;  %v6868_v40 = vmul.f32 %v8864_v52, %v11790_v0  ;;  %v8932_v0 = vld [vmem:[%s9141_s0 + $0x48] sm:$0xff]   ;;  %v6904_v46 = vunpack.c.l.bf16 %v8933_v37  ;;  %v6905_v49 = vunpack.c.h.bf16 %v8933_v37 }
 0x380   : > { %8889 = vrcp.f32 %v6786_v32  ;;  %v8866_v29 = vpop.eup %8865  ;;  %v6906_v44 = vunpack.c.l.bf16 %v8932_v0  ;;  %v6907_v13 = vunpack.c.h.bf16 %v8932_v0  ;;  %v6910_v7 = vunpack.c.l.bf16 %v8934_v15  ;;  %v8936_v32 = vld [vmem:[%s9141_s0 + $0x68] sm:$0xff]  }
 0x381   : > { %8891 = vpow2.f32 %v7668_v61  ;;  %v6932_v56 = vadd.f32 %v6900_v17, %v6868_v40  ;;  %v6871_v5 = vmul.f32 %v8866_v29, %v11796_v42  ;;  %v6911_v62 = vunpack.c.h.bf16 %v8934_v15 }
 0x382   : > { %v8868_v10 = vpop.eup %8867  ;;  %8893 = vpow2.f32 %v7673_v27  ;;  %v6909_v17 = vunpack.c.h.bf16 %v8935_v54  ;;  %v6914_v27 = vunpack.c.l.bf16 %v8936_v32 }
 0x383   : > { %v8870_v60 = vpop.eup %8869  ;;  %v6784_v20 = vadd.f32 1.0, %v8868_v10  ;;  %8895 = vpow2.f32 %v7671_v55  ;;  %6964 = vst.msk [vmem:[%s11855_s8 + $0x60] sm:$0xff] %vm641_vm0, %v6932_v56  ;;  %v6935_v24 = vadd.f32 %v6903_v51, %v6871_v5 }
 0x384   : > { %v8872_v11 = vpop.eup %8871  ;;  %v6869_v47 = vmul.f32 %v8870_v60, %v11804_v9  ;;  %8897 = vpow2.f32 %v7674_v6 }
 0x385   : > { %v8874_v39 = vpop.eup %8873  ;;  %v6874_v42 = vmul.f32 %v8872_v11, %v11807_v4  ;;  %8899 = vrcp.f32 %v6784_v20  ;;  %6967 = vst.msk [vmem:[%s11855_s8 + $0x78] sm:$0xff] %vm641_vm0, %v6935_v24  ;;  %v6915_v11 = vunpack.c.h.bf16 %v8936_v32 }
 0x386   : > { %v8876_v14 = vpop.eup %8875  ;;  %v6933_v12 = vadd.f32 %v6901_v48, %v6869_v47  ;;  %v6787_v1 = vadd.f32 1.0, %v8874_v39  ;;  %8901 = vpow2.f32 %v7672_v50 }
 0x387   : > { %v8878_v43 = vpop.eup %8877  ;;  %v6938_v9 = vadd.f32 %v6906_v44, %v6874_v42  ;;  %v6872_v2 = vmul.f32 %v8876_v14, %v11811_v36  ;;  %v6908_v36 = vunpack.c.l.bf16 %v8935_v54 }
 0x388   : > { %v8880_v22 = vpop.eup %8879  ;;  %6965 = vst.msk [vmem:[%s11855_s8 + $0x68] sm:$0xff] %vm641_vm0, %v6933_v12  ;;  %v6875_v4 = vmul.f32 %v8878_v43, %v11814_v19  ;;  %8903 = vrcp.f32 %v6787_v1  ;;  %v8938_v12 = vld [vmem:[%s9141_s0 + $0x78] sm:$0xff]   ;;  %v8939_v43 = vld [vmem:[%s9141_s0 + $0x70] sm:$0xff]  }
 0x389   : > { %v8882_v18 = vpop.eup %8881  ;;  %6970 = vst.msk [vmem:[%s11855_s8 + $0x90] sm:$0xff] %vm641_vm0, %v6938_v9  ;;  %v6936_v34 = vadd.f32 %v6904_v46, %v6872_v2  ;;  %v6873_v8 = vmul.f32 %v8880_v22, %v11827_v33  ;;  %v6916_v9 = vunpack.c.l.bf16 %v8939_v43 }
 0x38a   : > { %v8884_v3 = vpop.eup %8883  ;;  %v6939_v23 = vadd.f32 %v6907_v13, %v6875_v4  ;;  %v6878_v26 = vmul.f32 %v8882_v18, %v11835_v28 }
 0x38b   : > { %v8886_v19 = vpop.eup %8885  ;;  %6968 = vst.msk [vmem:[%s11855_s8 + $0x80] sm:$0xff] %vm641_vm0, %v6936_v34  ;;  %v6937_v57 = vadd.f32 %v6905_v49, %v6873_v8  ;;  %v6876_v59 = vmul.f32 %v8884_v3, %v11841_v21  ;;  %v6919_v49 = vunpack.c.h.bf16 %v8938_v12  ;;  %v6917_v34 = vunpack.c.h.bf16 %v8939_v43 }
 0x38c   : > { %v8888_v25 = vpop.eup %8887  ;;  %6971 = vst.msk [vmem:[%s11855_s8 + $0x98] sm:$0xff] %vm641_vm0, %v6939_v23  ;;  %v6942_v33 = vadd.f32 %v6910_v7, %v6878_v26  ;;  %v6879_v61 = vmul.f32 %v8886_v19, %v11852_v53 }
 0x38d   : > { %v8890_v28 = vpop.eup %8889  ;;  %6969 = vst.msk [vmem:[%s11855_s8 + $0x88] sm:$0xff] %vm641_vm0, %v6937_v57  ;;  %v6940_v52 = vadd.f32 %v6908_v36, %v6876_v59  ;;  %v6877_v55 = vmul.f32 %v8888_v25, %v11873_v38  ;;  %v8937_v38 = vld [vmem:[%s9141_s0 + $0x60] sm:$0xff]   ;;  %s7001_s0 = sshll.u32 %s11855_s8, 4  ;;  %s12038_s0 = int_to_ptr.vmem [resolvable:$true] %s7001_s0 }
 0x38e   : > { %v8892_v21 = vpop.eup %8891  ;;  %6974 = vst.msk [vmem:[%s11855_s8 + $0xb0] sm:$0xff] %vm641_vm0, %v6942_v33  ;;  %v6943_v40 = vadd.f32 %v6911_v62, %v6879_v61  ;;  %v6882_v51 = vmul.f32 %v8890_v28, %v11881_v16  ;;  %v6912_v50 = vunpack.c.l.bf16 %v8937_v38  ;;  %v6913_v46 = vunpack.c.h.bf16 %v8937_v38  ;;  %s8940_s16 = scalar_lea.vmem %s12038_s0, 4096  ;;  %p8947_p1 = scmp.lt.s32.totalorder %s12038_s0, %s8945_s18 }
 0x38f   : > { %v8894_v6 = vpop.eup %8893  ;;  %6972 = vst.msk [vmem:[%s11855_s8 + $0xa0] sm:$0xff] %vm641_vm0, %v6940_v52  ;;  %v6941_v53 = vadd.f32 %v6909_v17, %v6877_v55  ;;  %v6785_v29 = vadd.f32 1.0, %v8892_v21  ;;  %p8941_p12 = scmp.ne.s32.totalorder %s12038_s0, %s8940_s16  ;;  %p8948_p2 = scmp.lt.s32.totalorder %s8946_s19, %s8940_s16 }
 0x390   : > { %v8896_v48 = vpop.eup %8895  ;;  %6975 = vst.msk [vmem:[%s11855_s8 + $0xb8] sm:$0xff] %vm641_vm0, %v6943_v40  ;;  %v6946_v10 = vadd.f32 %v6914_v27, %v6882_v51  ;;  %v6790_v56 = vadd.f32 1.0, %v8894_v6 }
 0x391   : > { %v8898_v5 = vpop.eup %8897  ;;  %6973 = vst.msk [vmem:[%s11855_s8 + $0xa8] sm:$0xff] %vm641_vm0, %v6941_v53  ;;  %8905 = vrcp.f32 %v6785_v29  ;;  %v6788_v60 = vadd.f32 1.0, %v8896_v48  ;;  %p8942_p13 = pnand %p8941_p12, %p9102_p4  ;;  %p8949_p3 = por %p8948_p2, %p8947_p1 }
 0x392   : > { %v8900_v16 = vpop.eup %8899  ;;  %6978 = vst.msk [vmem:[%s11855_s8 + $0xd0] sm:$0xff] %vm641_vm0, %v6946_v10  ;;  %8907 = vrcp.f32 %v6790_v56  ;;  %v6791_v0 = vadd.f32 1.0, %v8898_v5 }
 0x393   : > { %v8902_v44 = vpop.eup %8901  ;;  %v6880_v20 = vmul.f32 %v8900_v16, %v11912_v63  ;;  %8909 = vrcp.f32 %v6788_v60  ;;  %v6918_v63 = vunpack.c.l.bf16 %v8938_v12  ;;  %p8943_p0 = pneg %p8942_p13 }
 0x394   : > { %8911 = vrcp.f32 %v6791_v0  ;;  %v6789_v24 = vadd.f32 1.0, %v8902_v44 }
 0x395   : > { %v8904_v47 = vpop.eup %8903  ;;  %v6944_v39 = vadd.f32 %v6912_v50, %v6880_v20  ;;  %p8950_p5 = pnand %p8949_p3, %p8943_p0 }
 0x396   : > { %v6883_v42 = vmul.f32 %v8904_v47, %v11921_v58  ;;  %8913 = vrcp.f32 %v6789_v24 }
 0x397   : > { %6976 = vst.msk [vmem:[%s11855_s8 + $0xc0] sm:$0xff] %vm641_vm0, %v6944_v39 }
 0x398   : > { %v6947_v37 = vadd.f32 %v6915_v11, %v6883_v42 }
 0x39a   : > { %6979 = vst.msk [vmem:[%s11855_s8 + $0xd8] sm:$0xff] %vm641_vm0, %v6947_v37 }
 0x39e   : > { %v8906_v14 = vpop.eup %8905 }
 0x39f   : > { %v8908_v13 = vpop.eup %8907  ;;  %v6881_v1 = vmul.f32 %v8906_v14, %v11947_v35 }
 0x3a0   : > { %v8910_v58 = vpop.eup %8909  ;;  %v6886_v2 = vmul.f32 %v8908_v13, %v11952_v30 }
 0x3a1   : > { %v8912_v22 = vpop.eup %8911  ;;  %v6945_v4 = vadd.f32 %v6913_v46, %v6881_v1  ;;  %v6884_v15 = vmul.f32 %v8910_v58, %v11955_v41 }
 0x3a2   : > { %v6950_v7 = vadd.f32 %v6918_v63, %v6886_v2  ;;  %v6887_v18 = vmul.f32 %v8912_v22, %v11958_v45 }
 0x3a3   : > { %v8914_v35 = vpop.eup %8913  ;;  %6977 = vst.msk [vmem:[%s11855_s8 + $0xc8] sm:$0xff] %vm641_vm0, %v6945_v4  ;;  %v6948_v30 = vadd.f32 %v6916_v9, %v6884_v15 }
 0x3a4   : > { %6982 = vst.msk [vmem:[%s11855_s8 + $0xf0] sm:$0xff] %vm641_vm0, %v6950_v7  ;;  %v6951_v8 = vadd.f32 %v6919_v49, %v6887_v18  ;;  %v6885_v54 = vmul.f32 %v8914_v35, %v11964_v31 }
 0x3a5   : > { %6980 = vst.msk [vmem:[%s11855_s8 + $0xe0] sm:$0xff] %vm641_vm0, %v6948_v30 }
 0x3a6   : > { %6983 = vst.msk [vmem:[%s11855_s8 + $0xf8] sm:$0xff] %vm641_vm0, %v6951_v8  ;;  %v6949_v41 = vadd.f32 %v6917_v34, %v6885_v54 }
 0x3a8   : > { %6981 = vst.msk [vmem:[%s11855_s8 + $0xe8] sm:$0xff] %vm641_vm0, %v6949_v41 }
 0x3a9   : > { %8953 = shalt.err (!%p8950_p5)
}
 0x3aa   : > { %s8954_s20 = scalar_lea.hbm %s12036_s15, 4096  ;;  %s8958_s28 = scalar_lea.hbm %s12098_s7, 8192 }
 0x3ab   : > { %p8955_p6 = scmp.ne.s32.totalorder %s12036_s15, %s8954_s20  ;;  %p8959_p10 = scmp.lt.s32.totalorder %s12036_s15, %s12098_s7 }
 0x3ac   : > { %p8960_p11 = scmp.lt.s32.totalorder %s8958_s28, %s8954_s20 }
 0x3ad   : > { %p8956_p7 = pnand %p8955_p6, %p9102_p4 }
 0x3ae   : > { %p8961_p12 = por %p8960_p11, %p8959_p10 }
 0x3af   : > { %p8957_p9 = pneg %p8956_p7 }
 0x3b1   : > { %p8962_p13 = pnand %p8961_p12, %p8957_p9 }
 0x3b3   : > { %8965 = shalt.err (!%p8962_p13)
}
 0x3b4   : > { %s9020_s10 = smov 128   ;;  %s9021_s13 = smov 8  }
 0x3b5   : > { %8445 = dma.vmem_to_hbm [thread:$0]  (%p9102_p4), %s12038_s0, 4096, %s12036_s15, %s12046_s25, %s9020_s10, %s9020_s10, %s9021_s13  }
 0x3b6 PF: > { %p8451_p0 = scmp.ge.s32.totalorder %s9016_s27, 2  ;;  %s7016_s14 = sand.u32 1, %s8996_s23  }
 0x3b7   : > { %s7017_s16 = scalar_lea.sflag [#allocation4], %s7016_s14 }
 0x3b8   : > { %p8448_p1 = pnand %p8451_p0, %p9109_p8 }
 0x3ba   : > { %p8449_p2 = pneg %p8448_p1 }
 0x3bc   : > { %8991 = dma.done.wait (%p8449_p2), %s7017_s16, 4096  }
 0x3bd   : > { %8993 = vsyncadd (%p8449_p2), %s7017_s16, 4294963200  ;;  %s20_s27 = sadd.s32 1, %s9016_s27   ;;  %s12277_s23 = smov %s9000_s2 }
 0x3be   : > { %p17_p3 = scmp.ge.s32.totalorder %s20_s27, 4   ;;  %s12278_s2 = smov %s9004_s24 }
 0x3bf   : > { %s12279_s24 = smov %s9115_s12  ;;  %s12280_s25 = smov %s9012_s26 }
 0x3c0   : > { %s12281_s26 = smov %s12283_s30  ;;  %19 = sbr.rel (!%p17_p3) target bundleno = 4 (0x4), region = 108 }
 0x3c5   :  { %7022 = vsyncpa [#allocation4], 1 }
 0x3c6   :  { %7024 = vsyncpa [#allocation4 + $0x1], 1 }

</bundles_post_ra>
